<compile_context>
chip_gen: v7x
topology: tpu7x:2x2x1
jax: 0.10.0
libtpu: 0.0.40
codegen_flags: <defaults>
</compile_context>

<pallas_src>
import functools

import jax
import jax.numpy as jnp
from jax.experimental import pallas as pl
from jax.experimental.pallas import tpu as pltpu

NEG_SLOPE = 0.01
LN_EPS = 1e-5
LANE = 128            # feature axes (hidden / output) padded to this
DEFAULT_TILE_N = 512  # max batch rows per grid step (single tile below this)


def _leaky_relu(x):
    return jnp.where(x >= 0, x, NEG_SLOPE * x)


def _round_up(x, m):
    return ((x + m - 1) // m) * m


def _pad_to(a, shape):
    pads = [(0, t - s) for s, t in zip(a.shape, shape)]
    return jnp.pad(a, pads)


def theta_kernel(x_ref, w_in_ref, b_in_ref, w_h_ref, ln_ref, w_d_ref, b_d_ref,
                 out_ref, *, hidden_dim):
    """Fused ThetaNetwork MLP for one batch tile.

    x_ref:    (TILE_N, IN)     bf16   (IN = n_nod*n_dim, NOT lane-padded)
    w_in_ref: (IN, H_p)        bf16   b_in_ref: (1, H_p)   f32
    w_h_ref:  (L, H_p, H_p)    bf16
    ln_ref:   (L, 3, H_p)      f32    rows: [hidden bias, LN gamma, LN beta]
    w_d_ref:  (H_p, OUT_p)     bf16   b_d_ref:  (1, OUT_p) f32
    out_ref:  (TILE_N, OUT_p)  f32

    Padded lanes of all weights / biases / affines are zero, so padded
    activation lanes stay exactly zero throughout; LayerNorm statistics use a
    lane-validity mask so they are taken over the true hidden_dim only.
    """
    h_p = w_in_ref.shape[1]
    inv_h = 1.0 / float(hidden_dim)

    # Lane-validity mask for LayerNorm statistics (hoisted out of the loop).
    lane_idx = jax.lax.broadcasted_iota(jnp.int32, (1, h_p), 1)
    valid = (lane_idx < hidden_dim).astype(jnp.float32)

    # Input layer + leaky_relu (bf16 MXU operands, f32 accumulation).
    h = jnp.dot(x_ref[...], w_in_ref[...],
                preferred_element_type=jnp.float32) + b_in_ref[...]
    h = _leaky_relu(h)

    num_hidden = w_h_ref.shape[0]
    for l in range(num_hidden):  # static (trace-time) loop over hidden blocks
        ln = ln_ref[l]                       # (3, H_p): bias / gamma / beta
        z = jnp.dot(h.astype(jnp.bfloat16), w_h_ref[l],
                    preferred_element_type=jnp.float32) + ln[0:1, :]
        # TODO(synk): nn.Dropout treated as identity (inference / eval mode).
        # Two-pass LayerNorm: padded lanes of z are exactly zero, so the mean
        # over all lanes equals the mean over hidden_dim; centered values are
        # masked so the variance excludes padded lanes.
        mu = jnp.sum(z, axis=-1, keepdims=True) * inv_h
        c = (z - mu) * valid                 # padded lanes -> 0
        var = jnp.sum(c * c, axis=-1, keepdims=True) * inv_h
        zn = c * jax.lax.rsqrt(var + LN_EPS)
        # gamma/beta are zero on padded lanes -> padded lanes return to 0.
        h = _leaky_relu(zn * ln[1:2, :] + ln[2:3, :])

    out = jnp.dot(h.astype(jnp.bfloat16), w_d_ref[...],
                  preferred_element_type=jnp.float32) + b_d_ref[...]
    out_ref[...] = out


def init_theta_params(key, in_dim, out_dim, num_hidden, hidden_dim, num_params):
    """Deterministic synthetic parameters (shapes match the torch module;
    Linear weights stored transposed as (in_features, out_features))."""
    ks = jax.random.split(key, 8)
    p = {}
    p["w_in"] = jax.random.normal(ks[0], (in_dim, hidden_dim), jnp.float32) * 0.1
    p["b_in"] = jax.random.normal(ks[1], (1, hidden_dim), jnp.float32) * 0.1
    p["w_h"] = jax.random.normal(ks[2], (num_hidden, hidden_dim, hidden_dim),
                                 jnp.float32) * 0.1
    p["b_h"] = jax.random.normal(ks[3], (num_hidden, 1, hidden_dim),
                                 jnp.float32) * 0.1
    p["gamma"] = jnp.ones((num_hidden, 1, hidden_dim), jnp.float32)
    p["beta"] = jnp.zeros((num_hidden, 1, hidden_dim), jnp.float32)
    p["w_d"] = jax.random.normal(ks[4], (hidden_dim, out_dim * num_params),
                                 jnp.float32) * 0.1
    p["b_d"] = jax.random.normal(ks[5], (1, out_dim * num_params),
                                 jnp.float32) * 0.1
    return p


def pack_theta_params(params):
    """Zero-pad hidden/output feature axes to a multiple of 128 lanes, cast
    the matmul weights to bf16 (half the weight DMA), and fuse the per-layer
    f32 side inputs (hidden bias, LN gamma, LN beta) into one (L, 3, H_p)
    slab.  Done once, outside the jitted forward."""
    in_dim, hidden_dim = params["w_in"].shape
    num_hidden = params["w_h"].shape[0]
    out_cols = params["w_d"].shape[1]
    h_p = _round_up(hidden_dim, LANE)
    out_p = _round_up(out_cols, LANE)

    ln_side = jnp.concatenate(
        [_pad_to(params["b_h"], (num_hidden, 1, h_p)),
         _pad_to(params["gamma"], (num_hidden, 1, h_p)),
         _pad_to(params["beta"], (num_hidden, 1, h_p))], axis=1)

    packed = {
        "w_in": _pad_to(params["w_in"], (in_dim, h_p)).astype(jnp.bfloat16),
        "b_in": _pad_to(params["b_in"], (1, h_p)),
        "w_h": _pad_to(params["w_h"], (num_hidden, h_p, h_p)).astype(jnp.bfloat16),
        "ln_side": ln_side,
        "w_d": _pad_to(params["w_d"], (h_p, out_p)).astype(jnp.bfloat16),
        "b_d": _pad_to(params["b_d"], (1, out_p)),
    }

    # Padded-lane zero-preservation is load-bearing for the in-kernel
    # LayerNorm: gamma/beta (and biases) must be zero on padded lanes.
    if h_p > hidden_dim:
        assert bool(jnp.all(packed["ln_side"][:, :, hidden_dim:] == 0.0)), \
            "LN side inputs must be zero on padded lanes"
        assert bool(jnp.all(packed["b_in"][:, hidden_dim:] == 0.0))
    return packed


@functools.partial(jax.jit,
                   static_argnames=("hidden_dim", "out_dim", "num_params"))
def theta_forward(x, packed, *, hidden_dim, out_dim, num_params):
    """x: (n_samp, n_nod, n_dim) -> list of num_params arrays, each of shape
    (n_samp, out_dim // n_dim, n_dim)."""
    n_samp, n_nod, n_dim = x.shape
    in_dim = n_nod * n_dim

    h_p = packed["w_in"].shape[1]
    out_p = packed["w_d"].shape[1]
    num_hidden = packed["w_h"].shape[0]

    # Batch-tile policy: pick the number of tiles first (cap tile at
    # DEFAULT_TILE_N rows), then size tiles to minimize padding; 16-aligned
    # rows keep the bf16 x tile sublane-packed (no masked/relayout loads).
    # Small batches collapse to grid=(1,) -> no per-step overhead on the
    # single-TC v5e/v6e chips.
    n_tiles = pl.cdiv(n_samp, DEFAULT_TILE_N)
    tile_n = _round_up(pl.cdiv(n_samp, n_tiles), 16)
    n_pad = tile_n * n_tiles
    grid = (n_tiles,)

    # x is NOT lane-padded: block last dim == full array dim (legal), so
    # input DMA is in_dim*2 bytes/row instead of 256 bytes/row.
    x_flat = x.reshape(n_samp, in_dim)
    x_pad = _pad_to(x_flat, (n_pad, in_dim)).astype(jnp.bfloat16)

    kernel = functools.partial(theta_kernel, hidden_dim=hidden_dim)

    # Advisory cost estimate for the XLA scheduler.
    flops = 2 * n_pad * (in_dim * h_p + num_hidden * h_p * h_p + h_p * out_p)
    weight_bytes = sum(int(v.size) * v.dtype.itemsize for v in packed.values())
    bytes_accessed = int(x_pad.size) * 2 + weight_bytes + n_pad * out_p * 4
    # TODO(synk): weight_bytes is tiny here; switch to a streaming-weight grid
    # axis if it ever approaches the v7x scoped-VMEM budget (~20 MiB).

    const2 = lambda i: (0, 0)
    const3 = lambda i: (0, 0, 0)

    raw = pl.pallas_call(
        kernel,
        out_shape=jax.ShapeDtypeStruct((n_pad, out_p), jnp.float32),
        grid=grid,
        in_specs=[
            pl.BlockSpec((tile_n, in_dim), lambda i: (i, 0)),       # x tile
            pl.BlockSpec((in_dim, h_p), const2),                    # w_in
            pl.BlockSpec((1, h_p), const2),                         # b_in
            pl.BlockSpec((num_hidden, h_p, h_p), const3),           # w_h
            pl.BlockSpec((num_hidden, 3, h_p), const3),             # ln_side
            pl.BlockSpec((h_p, out_p), const2),                     # w_d
            pl.BlockSpec((1, out_p), const2),                       # b_d
        ],
        out_specs=pl.BlockSpec((tile_n, out_p), lambda i: (i, 0)),
        compiler_params=pltpu.CompilerParams(
            dimension_semantics=("parallel",),
            vmem_limit_bytes=32 * 1024 * 1024,
        ),
        cost_estimate=pl.CostEstimate(
            flops=flops,
            transcendentals=n_pad * num_hidden,
            bytes_accessed=bytes_accessed,
        ),
    )(
        x_pad,
        packed["w_in"], packed["b_in"],
        packed["w_h"], packed["ln_side"],
        packed["w_d"], packed["b_d"],
    )

    raw = raw[:n_samp, :out_dim * num_params]
    bp = raw.reshape(n_samp, out_dim // n_dim, n_dim, num_params)
    # torch .chunk(num_params, dim=-1) + squeeze(-1): single transpose, then
    # cheap leading-axis unstack (avoids num_params strided minor-axis slices).
    stacked = jnp.moveaxis(bp, -1, 0)
    return [stacked[i] for i in range(num_params)]


def theta_reference_f32(x, params, *, out_dim, num_params):
    """Torch-faithful f32 forward (two-pass LayerNorm, f32 matmuls)."""
    n_samp, n_nod, n_dim = x.shape
    h = x.reshape(n_samp, n_nod * n_dim)
    h = _leaky_relu(h @ params["w_in"] + params["b_in"])
    for l in range(params["w_h"].shape[0]):
        z = h @ params["w_h"][l] + params["b_h"][l]
        mu = jnp.mean(z, axis=-1, keepdims=True)
        var = jnp.mean((z - mu) ** 2, axis=-1, keepdims=True)
        zn = (z - mu) * jax.lax.rsqrt(var + LN_EPS)
        h = _leaky_relu(zn * params["gamma"][l] + params["beta"][l])
    raw = h @ params["w_d"] + params["b_d"]
    bp = raw.reshape(n_samp, out_dim // n_dim, n_dim, num_params)
    return [bp[..., i] for i in range(num_params)]


def theta_reference_bf16(x, params, *, out_dim, num_params):
    """Reference mirroring the kernel numerics: bf16 matmul operands with f32
    accumulation and two-pass LayerNorm statistics."""
    n_samp, n_nod, n_dim = x.shape

    def mm(a, b):
        return jnp.dot(a.astype(jnp.bfloat16), b.astype(jnp.bfloat16),
                       preferred_element_type=jnp.float32)

    h = x.reshape(n_samp, n_nod * n_dim)
    h = _leaky_relu(mm(h, params["w_in"]) + params["b_in"])
    for l in range(params["w_h"].shape[0]):
        z = mm(h, params["w_h"][l]) + params["b_h"][l]
        mu = jnp.mean(z, axis=-1, keepdims=True)
        c = z - mu
        var = jnp.mean(c * c, axis=-1, keepdims=True)
        zn = c * jax.lax.rsqrt(var + LN_EPS)
        h = _leaky_relu(zn * params["gamma"][l] + params["beta"][l])
    raw = mm(h, params["w_d"]) + params["b_d"]
    bp = raw.reshape(n_samp, out_dim // n_dim, n_dim, num_params)
    return [bp[..., i] for i in range(num_params)]


if __name__ == "__main__":
    # Small shapes consistent with the module; n_samp=300 exercises the
    # padding-minimizing tile policy (one 304-row tile, grid=(1,)).
    n_samp, n_nod, n_dim = 300, 4, 2
    in_dim = n_nod * n_dim          # 8
    hidden_dim = 32
    num_hidden = 2
    out_dim = 8                     # must be a multiple of n_dim
    num_params = 2                  # as in configure_theta
    # p_drop unused at inference (dropout = identity)

    key = jax.random.PRNGKey(0)
    k_x, k_p = jax.random.split(key)
    x = jax.random.normal(k_x, (n_samp, n_nod, n_dim), jnp.float32)
    params = init_theta_params(k_p, in_dim, out_dim, num_hidden, hidden_dim,
                               num_params)
    packed = pack_theta_params(params)

    outs = theta_forward(x, packed, hidden_dim=hidden_dim, out_dim=out_dim,
                         num_params=num_params)
    outs = [jax.block_until_ready(o) for o in outs]

    refs_bf16 = theta_reference_bf16(x, params, out_dim=out_dim,
                                     num_params=num_params)
    refs_f32 = theta_reference_f32(x, params, out_dim=out_dim,
                                   num_params=num_params)
    for o, rb, rf in zip(outs, refs_bf16, refs_f32):
        assert o.shape == (n_samp, out_dim // n_dim, n_dim), o.shape
        # tight check against a reference mirroring the kernel's bf16 numerics
        assert jnp.allclose(o, rb, atol=5e-3, rtol=5e-3), \
            float(jnp.max(jnp.abs(o - rb)))
        # loose check against the torch-faithful f32 forward (bf16 MXU budget)
        assert jnp.allclose(o, rf, atol=2e-2, rtol=2e-2), \
            float(jnp.max(jnp.abs(o - rf)))

    print("KERNEL_OK")
</pallas_src>

<mosaic_0001>
module attributes {stable_mosaic.version = 11 : i64} {
  func.func @theta_kernel(%arg0: i32, %arg1: memref<304x8xbf16, #tpu.memory_space<vmem>>, %arg2: memref<8x128xbf16, #tpu.memory_space<vmem>>, %arg3: memref<1x128xf32, #tpu.memory_space<vmem>>, %arg4: memref<2x128x128xbf16, #tpu.memory_space<vmem>>, %arg5: memref<2x3x128xf32, #tpu.memory_space<vmem>>, %arg6: memref<128x128xbf16, #tpu.memory_space<vmem>>, %arg7: memref<1x128xf32, #tpu.memory_space<vmem>>, %arg8: memref<304x128xf32, #tpu.memory_space<vmem>>) attributes {dimension_semantics = [#tpu.dimension_semantics<parallel>], iteration_bounds = array<i64: 1>, scalar_prefetch = 0 : i64, scratch_operands = 0 : i64, tpu.core_type = #tpu.core_type<tc>, window_params = [{transform_indices = @transform_0, window_bounds = array<i64: 304, 8>}, {pipeline_mode = #tpu.pipeline_mode<synchronous>, transform_indices = @transform_1, window_bounds = array<i64: 8, 128>}, {pipeline_mode = #tpu.pipeline_mode<synchronous>, transform_indices = @transform_2, window_bounds = array<i64: 1, 128>}, {pipeline_mode = #tpu.pipeline_mode<synchronous>, transform_indices = @transform_3, window_bounds = array<i64: 2, 128, 128>}, {pipeline_mode = #tpu.pipeline_mode<synchronous>, transform_indices = @transform_4, window_bounds = array<i64: 2, 3, 128>}, {pipeline_mode = #tpu.pipeline_mode<synchronous>, transform_indices = @transform_5, window_bounds = array<i64: 128, 128>}, {pipeline_mode = #tpu.pipeline_mode<synchronous>, transform_indices = @transform_6, window_bounds = array<i64: 1, 128>}, {transform_indices = @transform_7, window_bounds = array<i64: 304, 128>}]} {
    %0 = tpu.iota {dimensions = array<i32: 1>} : vector<1x128xi32>
    %c32_i32 = arith.constant 32 : i32
    %1 = vector.broadcast %c32_i32 : i32 to vector<1x128xi32>
    %2 = arith.cmpi slt, %0, %1 : vector<1x128xi32>
    %3 = arith.extui %2 : vector<1x128xi1> to vector<1x128xi32>
    %4 = arith.sitofp %3 : vector<1x128xi32> to vector<1x128xf32>
    %c0 = arith.constant 0 : index
    %c0_0 = arith.constant 0 : index
    %5 = vector.load %arg1[%c0, %c0_0] : memref<304x8xbf16, #tpu.memory_space<vmem>>, vector<304x8xbf16>
    %c0_1 = arith.constant 0 : index
    %c0_2 = arith.constant 0 : index
    %6 = vector.load %arg2[%c0_1, %c0_2] : memref<8x128xbf16, #tpu.memory_space<vmem>>, vector<8x128xbf16>
    %cst = arith.constant dense<0.000000e+00> : vector<304x128xf32>
    %7 = tpu.matmul %5, %6, %cst {dimension_numbers = #tpu.dot_dimension_numbers<[1], [0], [0], [1], [0, 0, 1, 1], [], []>} : vector<304x8xbf16>, vector<8x128xbf16>, vector<304x128xf32> -> vector<304x128xf32>
    %c0_3 = arith.constant 0 : index
    %c0_4 = arith.constant 0 : index
    %8 = vector.load %arg3[%c0_3, %c0_4] : memref<1x128xf32, #tpu.memory_space<vmem>>, vector<1x128xf32>
    %9 = vector.broadcast %8 : vector<1x128xf32> to vector<304x128xf32>
    %10 = arith.addf %7, %9 : vector<304x128xf32>
    %cst_5 = arith.constant 0.000000e+00 : f32
    %11 = vector.broadcast %cst_5 : f32 to vector<304x128xf32>
    %12 = arith.cmpf oge, %10, %11 : vector<304x128xf32>
    %cst_6 = arith.constant 0.00999999977 : f32
    %13 = vector.broadcast %cst_6 : f32 to vector<304x128xf32>
    %14 = arith.mulf %13, %10 : vector<304x128xf32>
    %15 = arith.select %12, %10, %14 : vector<304x128xi1>, vector<304x128xf32>
    %c0_7 = arith.constant 0 : index
    %c0_8 = arith.constant 0 : index
    %c0_9 = arith.constant 0 : index
    %16 = vector.load %arg5[%c0_7, %c0_8, %c0_9] : memref<2x3x128xf32, #tpu.memory_space<vmem>>, vector<1x3x128xf32>
    %17 = vector.shape_cast %16 : vector<1x3x128xf32> to vector<3x128xf32>
    %18 = arith.truncf %15 : vector<304x128xf32> to vector<304x128xbf16>
    %c0_10 = arith.constant 0 : index
    %c0_11 = arith.constant 0 : index
    %c0_12 = arith.constant 0 : index
    %19 = vector.load %arg4[%c0_10, %c0_11, %c0_12] : memref<2x128x128xbf16, #tpu.memory_space<vmem>>, vector<1x128x128xbf16>
    %20 = vector.shape_cast %19 : vector<1x128x128xbf16> to vector<128x128xbf16>
    %cst_13 = arith.constant dense<0.000000e+00> : vector<304x128xf32>
    %21 = tpu.matmul %18, %20, %cst_13 {dimension_numbers = #tpu.dot_dimension_numbers<[1], [0], [0], [1], [0, 0, 1, 1], [], []>} : vector<304x128xbf16>, vector<128x128xbf16>, vector<304x128xf32> -> vector<304x128xf32>
    %22 = vector.extract_strided_slice %17 {offsets = [0, 0], sizes = [1, 128], strides = [1, 1]} : vector<3x128xf32> to vector<1x128xf32>
    %23 = vector.broadcast %22 : vector<1x128xf32> to vector<304x128xf32>
    %24 = arith.addf %21, %23 : vector<304x128xf32>
    %cst_14 = arith.constant dense<0.000000e+00> : vector<304xf32>
    %25 = vector.multi_reduction <add>, %24, %cst_14 [1] : vector<304x128xf32> to vector<304xf32>
    %26 = vector.shape_cast %25 : vector<304xf32> to vector<304x1xf32>
    %cst_15 = arith.constant 3.125000e-02 : f32
    %27 = vector.broadcast %cst_15 : f32 to vector<304x1xf32>
    %28 = arith.mulf %26, %27 : vector<304x1xf32>
    %29 = vector.broadcast %28 : vector<304x1xf32> to vector<304x128xf32>
    %30 = arith.subf %24, %29 : vector<304x128xf32>
    %31 = vector.broadcast %4 : vector<1x128xf32> to vector<304x128xf32>
    %32 = arith.mulf %30, %31 : vector<304x128xf32>
    %33 = arith.mulf %32, %32 : vector<304x128xf32>
    %cst_16 = arith.constant dense<0.000000e+00> : vector<304xf32>
    %34 = vector.multi_reduction <add>, %33, %cst_16 [1] : vector<304x128xf32> to vector<304xf32>
    %35 = vector.shape_cast %34 : vector<304xf32> to vector<304x1xf32>
    %cst_17 = arith.constant 3.125000e-02 : f32
    %36 = vector.broadcast %cst_17 : f32 to vector<304x1xf32>
    %37 = arith.mulf %35, %36 : vector<304x1xf32>
    %cst_18 = arith.constant 9.99999974E-6 : f32
    %38 = vector.broadcast %cst_18 : f32 to vector<304x1xf32>
    %39 = arith.addf %37, %38 : vector<304x1xf32>
    %40 = math.rsqrt %39 : vector<304x1xf32>
    %41 = vector.broadcast %40 : vector<304x1xf32> to vector<304x128xf32>
    %42 = arith.mulf %32, %41 : vector<304x128xf32>
    %43 = vector.extract_strided_slice %17 {offsets = [1, 0], sizes = [1, 128], strides = [1, 1]} : vector<3x128xf32> to vector<1x128xf32>
    %44 = vector.broadcast %43 : vector<1x128xf32> to vector<304x128xf32>
    %45 = arith.mulf %42, %44 : vector<304x128xf32>
    %46 = vector.extract_strided_slice %17 {offsets = [2, 0], sizes = [1, 128], strides = [1, 1]} : vector<3x128xf32> to vector<1x128xf32>
    %47 = vector.broadcast %46 : vector<1x128xf32> to vector<304x128xf32>
    %48 = arith.addf %45, %47 : vector<304x128xf32>
    %cst_19 = arith.constant 0.000000e+00 : f32
    %49 = vector.broadcast %cst_19 : f32 to vector<304x128xf32>
    %50 = arith.cmpf oge, %48, %49 : vector<304x128xf32>
    %cst_20 = arith.constant 0.00999999977 : f32
    %51 = vector.broadcast %cst_20 : f32 to vector<304x128xf32>
    %52 = arith.mulf %51, %48 : vector<304x128xf32>
    %53 = arith.select %50, %48, %52 : vector<304x128xi1>, vector<304x128xf32>
    %c1 = arith.constant 1 : index
    %c0_21 = arith.constant 0 : index
    %c0_22 = arith.constant 0 : index
    %54 = vector.load %arg5[%c1, %c0_21, %c0_22] : memref<2x3x128xf32, #tpu.memory_space<vmem>>, vector<1x3x128xf32>
    %55 = vector.shape_cast %54 : vector<1x3x128xf32> to vector<3x128xf32>
    %56 = arith.truncf %53 : vector<304x128xf32> to vector<304x128xbf16>
    %c1_23 = arith.constant 1 : index
    %c0_24 = arith.constant 0 : index
    %c0_25 = arith.constant 0 : index
    %57 = vector.load %arg4[%c1_23, %c0_24, %c0_25] : memref<2x128x128xbf16, #tpu.memory_space<vmem>>, vector<1x128x128xbf16>
    %58 = vector.shape_cast %57 : vector<1x128x128xbf16> to vector<128x128xbf16>
    %cst_26 = arith.constant dense<0.000000e+00> : vector<304x128xf32>
    %59 = tpu.matmul %56, %58, %cst_26 {dimension_numbers = #tpu.dot_dimension_numbers<[1], [0], [0], [1], [0, 0, 1, 1], [], []>} : vector<304x128xbf16>, vector<128x128xbf16>, vector<304x128xf32> -> vector<304x128xf32>
    %60 = vector.extract_strided_slice %55 {offsets = [0, 0], sizes = [1, 128], strides = [1, 1]} : vector<3x128xf32> to vector<1x128xf32>
    %61 = vector.broadcast %60 : vector<1x128xf32> to vector<304x128xf32>
    %62 = arith.addf %59, %61 : vector<304x128xf32>
    %cst_27 = arith.constant dense<0.000000e+00> : vector<304xf32>
    %63 = vector.multi_reduction <add>, %62, %cst_27 [1] : vector<304x128xf32> to vector<304xf32>
    %64 = vector.shape_cast %63 : vector<304xf32> to vector<304x1xf32>
    %cst_28 = arith.constant 3.125000e-02 : f32
    %65 = vector.broadcast %cst_28 : f32 to vector<304x1xf32>
    %66 = arith.mulf %64, %65 : vector<304x1xf32>
    %67 = vector.broadcast %66 : vector<304x1xf32> to vector<304x128xf32>
    %68 = arith.subf %62, %67 : vector<304x128xf32>
    %69 = vector.broadcast %4 : vector<1x128xf32> to vector<304x128xf32>
    %70 = arith.mulf %68, %69 : vector<304x128xf32>
    %71 = arith.mulf %70, %70 : vector<304x128xf32>
    %cst_29 = arith.constant dense<0.000000e+00> : vector<304xf32>
    %72 = vector.multi_reduction <add>, %71, %cst_29 [1] : vector<304x128xf32> to vector<304xf32>
    %73 = vector.shape_cast %72 : vector<304xf32> to vector<304x1xf32>
    %cst_30 = arith.constant 3.125000e-02 : f32
    %74 = vector.broadcast %cst_30 : f32 to vector<304x1xf32>
    %75 = arith.mulf %73, %74 : vector<304x1xf32>
    %cst_31 = arith.constant 9.99999974E-6 : f32
    %76 = vector.broadcast %cst_31 : f32 to vector<304x1xf32>
    %77 = arith.addf %75, %76 : vector<304x1xf32>
    %78 = math.rsqrt %77 : vector<304x1xf32>
    %79 = vector.broadcast %78 : vector<304x1xf32> to vector<304x128xf32>
    %80 = arith.mulf %70, %79 : vector<304x128xf32>
    %81 = vector.extract_strided_slice %55 {offsets = [1, 0], sizes = [1, 128], strides = [1, 1]} : vector<3x128xf32> to vector<1x128xf32>
    %82 = vector.broadcast %81 : vector<1x128xf32> to vector<304x128xf32>
    %83 = arith.mulf %80, %82 : vector<304x128xf32>
    %84 = vector.extract_strided_slice %55 {offsets = [2, 0], sizes = [1, 128], strides = [1, 1]} : vector<3x128xf32> to vector<1x128xf32>
    %85 = vector.broadcast %84 : vector<1x128xf32> to vector<304x128xf32>
    %86 = arith.addf %83, %85 : vector<304x128xf32>
    %cst_32 = arith.constant 0.000000e+00 : f32
    %87 = vector.broadcast %cst_32 : f32 to vector<304x128xf32>
    %88 = arith.cmpf oge, %86, %87 : vector<304x128xf32>
    %cst_33 = arith.constant 0.00999999977 : f32
    %89 = vector.broadcast %cst_33 : f32 to vector<304x128xf32>
    %90 = arith.mulf %89, %86 : vector<304x128xf32>
    %91 = arith.select %88, %86, %90 : vector<304x128xi1>, vector<304x128xf32>
    %92 = arith.truncf %91 : vector<304x128xf32> to vector<304x128xbf16>
    %c0_34 = arith.constant 0 : index
    %c0_35 = arith.constant 0 : index
    %93 = vector.load %arg6[%c0_34, %c0_35] : memref<128x128xbf16, #tpu.memory_space<vmem>>, vector<128x128xbf16>
    %cst_36 = arith.constant dense<0.000000e+00> : vector<304x128xf32>
    %94 = tpu.matmul %92, %93, %cst_36 {dimension_numbers = #tpu.dot_dimension_numbers<[1], [0], [0], [1], [0, 0, 1, 1], [], []>} : vector<304x128xbf16>, vector<128x128xbf16>, vector<304x128xf32> -> vector<304x128xf32>
    %c0_37 = arith.constant 0 : index
    %c0_38 = arith.constant 0 : index
    %95 = vector.load %arg7[%c0_37, %c0_38] : memref<1x128xf32, #tpu.memory_space<vmem>>, vector<1x128xf32>
    %96 = vector.broadcast %95 : vector<1x128xf32> to vector<304x128xf32>
    %97 = arith.addf %94, %96 : vector<304x128xf32>
    %c0_39 = arith.constant 0 : index
    %c0_40 = arith.constant 0 : index
    %98 = vector.load %arg8[%c0_39, %c0_40] : memref<304x128xf32, #tpu.memory_space<vmem>>, vector<304x128xf32>
    tpu.vector_store %arg8[%c0_39, %c0_40], %97 {strides = array<i32>} : memref<304x128xf32, #tpu.memory_space<vmem>>, vector<304x128xf32>,
    return
  }
  func.func @transform_0(%arg0: i32) -> (i32, i32) {
    %c0_i32 = arith.constant 0 : i32
    %c0_i32_0 = arith.constant 0 : i32
    return %arg0, %c0_i32 : i32, i32
  }
  func.func @transform_1(%arg0: i32) -> (i32, i32) {
    %c0_i32 = arith.constant 0 : i32
    %c0_i32_0 = arith.constant 0 : i32
    %c0_i32_1 = arith.constant 0 : i32
    return %c0_i32, %c0_i32_0 : i32, i32
  }
  func.func @transform_2(%arg0: i32) -> (i32, i32) {
    %c0_i32 = arith.constant 0 : i32
    %c0_i32_0 = arith.constant 0 : i32
    %c0_i32_1 = arith.constant 0 : i32
    return %c0_i32, %c0_i32_0 : i32, i32
  }
  func.func @transform_3(%arg0: i32) -> (i32, i32, i32) {
    %c0_i32 = arith.constant 0 : i32
    %c0_i32_0 = arith.constant 0 : i32
    %c0_i32_1 = arith.constant 0 : i32
    %c0_i32_2 = arith.constant 0 : i32
    return %c0_i32, %c0_i32_0, %c0_i32_1 : i32, i32, i32
  }
  func.func @transform_4(%arg0: i32) -> (i32, i32, i32) {
    %c0_i32 = arith.constant 0 : i32
    %c0_i32_0 = arith.constant 0 : i32
    %c0_i32_1 = arith.constant 0 : i32
    %c0_i32_2 = arith.constant 0 : i32
    return %c0_i32, %c0_i32_0, %c0_i32_1 : i32, i32, i32
  }
  func.func @transform_5(%arg0: i32) -> (i32, i32) {
    %c0_i32 = arith.constant 0 : i32
    %c0_i32_0 = arith.constant 0 : i32
    %c0_i32_1 = arith.constant 0 : i32
    return %c0_i32, %c0_i32_0 : i32, i32
  }
  func.func @transform_6(%arg0: i32) -> (i32, i32) {
    %c0_i32 = arith.constant 0 : i32
    %c0_i32_0 = arith.constant 0 : i32
    %c0_i32_1 = arith.constant 0 : i32
    return %c0_i32, %c0_i32_0 : i32, i32
  }
  func.func @transform_7(%arg0: i32) -> (i32, i32) {
    %c0_i32 = arith.constant 0 : i32
    %c0_i32_0 = arith.constant 0 : i32
    return %arg0, %c0_i32 : i32, i32
  }
}

</mosaic_0001>

<bundles_post_ra>
// kernel: theta_forward.1
= control target key start
LH: loop header
LB: loop body
LE: loop exit
PB: predicated region body
PF: predicated region fallthrough
CT: control target
= control target key end

     0   :  { %vm231_vm0 = vcmask 1043456   ;;  %v3457_v0 = vmov 0.0   ;;  %vm3458_vm1 = vmmov 0   ;;  %vm173_vm2 = vcmask 64512   ;;  %s5131_s1 = inlined_call_operand.vmem [shape: bf16[8,128], index: 1, kind: input, shape index: {}]   ;;  %s5132_s0 = inlined_call_operand.vmem [shape: bf16[304,8], index: 0, kind: input, shape index: {}]   ;;  %s5133_s3 = inlined_call_operand.vmem [shape: bf16[2,128,128], index: 3, kind: input, shape index: {}]   ;;  %s5134_s2 = inlined_call_operand.vmem [shape: f32[1,128], index: 2, kind: input, shape index: {}]   ;;  %s5135_s4 = inlined_call_operand.vmem [shape: f32[2,3,128], index: 4, kind: input, shape index: {}]   ;;  %s5136_s5 = inlined_call_operand.vmem [shape: bf16[128,128], index: 5, kind: input, shape index: {}]   ;;  %s5137_s6 = inlined_call_operand.vmem [shape: f32[1,128], index: 6, kind: input, shape index: {}]   ;;  %s5138_s7 = inlined_call_operand.vmem [shape: f32[304,128], index: 7, kind: output, shape index: {}]  }
   0x1   :  { %2890 = vmatprep.subr.bf16.mxu0 %v3457_v0  ;;  %v70_v1 = vld [vmem:[%s5131_s1] sm:$0xf]  ;;  %2892 = vmatprep.mubr.msk.bf16.mxu0 %vm3458_vm1, %v3457_v0  ;;  %v3263_v4 = vld [vmem:[%s5132_s0 + $0x8] sm:$0xff]   ;;  %v3264_v5 = vld [vmem:[%s5132_s0 + $0x10] sm:$0xff]  }
   0x2   :  { %v233_v2 = vsel %vm231_vm0, %v70_v1, 0  ;;  %v3262_v3 = vld [vmem:[%s5132_s0] sm:$0xff]   ;;  %2968 = vmatprep.subr.bf16.mxu1 %v3457_v0  ;;  %2984 = vmatprep.mubr.msk.bf16.mxu1 %vm3458_vm1, %v3457_v0  ;;  %v3280_v7 = vld [vmem:[%s5133_s3 + $0x8] sm:$0xff]   ;;  %v3282_v8 = vld [vmem:[%s5133_s3 + $0x10] sm:$0xff]  }
   0x3   :  { %2891 = vmatpush3.bf16.msra.mxu0 %v233_v2  ;;  %v3279_v6 = vld [vmem:[%s5133_s3] sm:$0xff]   ;;  %v3265_v9 = vld [vmem:[%s5132_s0 + $0x18] sm:$0xff]   ;;  %v3286_v13 = vld [vmem:[%s5133_s3 + $0x28] sm:$0xff]  }
   0x4   :  { %3060 = vmatprep.subr.bf16.mxu0 %v3457_v0  ;;  %2969 = vmatpush3.bf16.msra.mxu1 %v3279_v6  ;;  %v3283_v10 = vld [vmem:[%s5133_s3 + $0x18] sm:$0xff]   ;;  %v3284_v11 = vld [vmem:[%s5133_s3 + $0x20] sm:$0xff]   ;;  %v3267_v14 = vld [vmem:[%s5132_s0 + $0x28] sm:$0xff]  }
   0x5   :  { %2970 = vmatprep.subr.bf16.mxu1 %v3457_v0  ;;  %v3266_v12 = vld [vmem:[%s5132_s0 + $0x20] sm:$0xff]   ;;  %v3268_v15 = vld [vmem:[%s5132_s0 + $0x30] sm:$0xff]   ;;  %v3269_v16 = vld [vmem:[%s5132_s0 + $0x38] sm:$0xff]  }
   0x6   :  { %2893 = vmatmul.mubr.msk.bf16.vlgmr.msra.gmra.mrb[0].mxu0 %vm173_vm2, %v3262_v3  ;;  %v3270_v17 = vld [vmem:[%s5132_s0 + $0x40] sm:$0xff]   ;;  %v3271_v18 = vld [vmem:[%s5132_s0 + $0x48] sm:$0xff]   ;;  %v3272_v19 = vld [vmem:[%s5132_s0 + $0x50] sm:$0xff]  }
   0x7   :  { %2896 = vmatprep.mubr.msk.bf16.mxu0 %vm3458_vm1, %v3457_v0  ;;  %v3273_v20 = vld [vmem:[%s5132_s0 + $0x58] sm:$0xff]   ;;  %v3287_v21 = vld [vmem:[%s5133_s3 + $0x30] sm:$0xff]   ;;  %v3274_v23 = vld [vmem:[%s5132_s0 + $0x60] sm:$0xff]  }
   0x8   :  { %2971 = vmatpush3.bf16.msra.mxu1 %v3280_v7  ;;  %v3288_v22 = vld [vmem:[%s5133_s3 + $0x38] sm:$0xff]   ;;  %v3275_v24 = vld [vmem:[%s5132_s0 + $0x68] sm:$0xff]   ;;  %v3276_v25 = vld [vmem:[%s5132_s0 + $0x70] sm:$0xff]  }
   0x9   :  { %2972 = vmatprep.subr.bf16.mxu1 %v3457_v0  ;;  %v3277_v26 = vld [vmem:[%s5132_s0 + $0x78] sm:$0xff]   ;;  %v3278_v27 = vld [vmem:[%s5132_s0 + $0x80] sm:$0xff]   ;;  %v3281_v28 = vld [vmem:[%s5132_s0 + $0x88] sm:$0xff]  }
   0xa   :  { %v3285_v29 = vld [vmem:[%s5132_s0 + $0x90] sm:$0xff]   ;;  %v3658_v30 = vld [vmem:[%s5134_s2] ss:$0 sm:$0xff] }
   0xc   :  { %2973 = vmatpush3.bf16.msra.mxu1 %v3282_v8 }
   0xd   :  { %2974 = vmatprep.subr.bf16.mxu1 %v3457_v0 }
   0xe   :  { %2897 = vmatmul.mubr.msk.bf16.gmra.mrb[4].mxu0 %vm173_vm2, %v3263_v4 }
   0xf   :  { %2900 = vmatprep.mubr.msk.bf16.mxu0 %vm3458_vm1, %v3457_v0 }
  0x10   :  { %2975 = vmatpush3.bf16.msra.mxu1 %v3283_v10 }
  0x11   :  { %2976 = vmatprep.subr.bf16.mxu1 %v3457_v0 }
  0x14   :  { %2977 = vmatpush3.bf16.msra.mxu1 %v3284_v11 }
  0x15   :  { %2978 = vmatprep.subr.bf16.mxu1 %v3457_v0 }
  0x16   :  { %2901 = vmatmul.mubr.msk.bf16.gmra.mrb[8].mxu0 %vm173_vm2, %v3264_v5 }
  0x17   :  { %2904 = vmatprep.mubr.msk.bf16.mxu0 %vm3458_vm1, %v3457_v0 }
  0x18   :  { %2979 = vmatpush3.bf16.msra.mxu1 %v3286_v13 }
  0x19   :  { %2980 = vmatprep.subr.bf16.mxu1 %v3457_v0 }
  0x1c   :  { %2981 = vmatpush3.bf16.msra.mxu1 %v3287_v21 }
  0x1d   :  { %2982 = vmatprep.subr.bf16.mxu1 %v3457_v0 }
  0x1e   :  { %2905 = vmatmul.mubr.msk.bf16.gmra.mrb[12].mxu0 %vm173_vm2, %v3265_v9 }
  0x1f   :  { %2908 = vmatprep.mubr.msk.bf16.mxu0 %vm3458_vm1, %v3457_v0 }
  0x20   :  { %2983 = vmatpush3.bf16.msra.mxu1 %v3288_v22 }
  0x21   :  { %3244 = vmatprep.subr.bf16.mxu1 %v3457_v0 }
  0x26   :  { %2909 = vmatmul.mubr.msk.bf16.gmra.mrb[16].mxu0 %vm173_vm2, %v3266_v12 }
  0x27   :  { %2912 = vmatprep.mubr.msk.bf16.mxu0 %vm3458_vm1, %v3457_v0 }
  0x2e   :  { %2913 = vmatmul.mubr.msk.bf16.gmra.mrb[20].mxu0 %vm173_vm2, %v3267_v14 }
  0x2f   :  { %2916 = vmatprep.mubr.msk.bf16.mxu0 %vm3458_vm1, %v3457_v0 }
  0x36   :  { %2917 = vmatmul.mubr.msk.bf16.gmra.mrb[24].mxu0 %vm173_vm2, %v3268_v15 }
  0x37   :  { %2920 = vmatprep.mubr.msk.bf16.mxu0 %vm3458_vm1, %v3457_v0 }
  0x3e   :  { %2921 = vmatmul.mubr.msk.bf16.gmra.mrb[28].mxu0 %vm173_vm2, %v3269_v16 }
  0x3f   :  { %2924 = vmatprep.mubr.msk.bf16.mxu0 %vm3458_vm1, %v3457_v0 }
  0x46   :  { %2925 = vmatmul.mubr.msk.bf16.gmra.mrb[32].mxu0 %vm173_vm2, %v3270_v17 }
  0x47   :  { %2928 = vmatprep.mubr.msk.bf16.mxu0 %vm3458_vm1, %v3457_v0 }
  0x4e   :  { %2929 = vmatmul.mubr.msk.bf16.gmra.mrb[36].mxu0 %vm173_vm2, %v3271_v18 }
  0x4f   :  { %2932 = vmatprep.mubr.msk.bf16.mxu0 %vm3458_vm1, %v3457_v0 }
  0x56   :  { %2933 = vmatmul.mubr.msk.bf16.gmra.mrb[40].mxu0 %vm173_vm2, %v3272_v19 }
  0x57   :  { %2936 = vmatprep.mubr.msk.bf16.mxu0 %vm3458_vm1, %v3457_v0 }
  0x5e   :  { %2937 = vmatmul.mubr.msk.bf16.gmra.mrb[44].mxu0 %vm173_vm2, %v3273_v20 }
  0x5f   :  { %2940 = vmatprep.mubr.msk.bf16.mxu0 %vm3458_vm1, %v3457_v0 }
  0x66   :  { %2941 = vmatmul.mubr.msk.bf16.gmra.mrb[48].mxu0 %vm173_vm2, %v3274_v23 }
  0x67   :  { %2944 = vmatprep.mubr.msk.bf16.mxu0 %vm3458_vm1, %v3457_v0 }
  0x6e   :  { %2945 = vmatmul.mubr.msk.bf16.gmra.mrb[52].mxu0 %vm173_vm2, %v3275_v24 }
  0x6f   :  { %2948 = vmatprep.mubr.msk.bf16.mxu0 %vm3458_vm1, %v3457_v0 }
  0x76   :  { %2949 = vmatmul.mubr.msk.bf16.gmra.mrb[56].mxu0 %vm173_vm2, %v3276_v25 }
  0x77   :  { %2952 = vmatprep.mubr.msk.bf16.mxu0 %vm3458_vm1, %v3457_v0 }
  0x7e   :  { %2953 = vmatmul.mubr.msk.bf16.gmra.mrb[60].mxu0 %vm173_vm2, %v3277_v26 }
  0x7f   :  { %2956 = vmatprep.mubr.msk.bf16.mxu0 %vm3458_vm1, %v3457_v0 }
  0x86   :  { %2957 = vmatmul.mubr.msk.bf16.gmra.mrb[64].mxu0 %vm173_vm2, %v3278_v27 }
  0x87   :  { %2960 = vmatprep.mubr.msk.bf16.mxu0 %vm3458_vm1, %v3457_v0 }
  0x8e   :  { %2961 = vmatmul.mubr.msk.bf16.gmra.mrb[68].mxu0 %vm173_vm2, %v3281_v28 }
  0x8f   :  { %2964 = vmatprep.mubr.msk.bf16.mxu0 %vm3458_vm1, %v3457_v0 }
  0x96   :  { %2965 = vmatmul.mubr.msk.bf16.gmra.mrb[72].mxu0 %vm173_vm2, %v3285_v29 }
  0x97   :  { %3076 = vmatprep.mubr.msk.bf16.mxu0 %vm3458_vm1, %v3457_v0 }
  0xd9   :  { %v269_v31 = vpop.f32.mrb[0].mxu0 }
  0xda   :  { %v270_v32 = vadd.f32 %v3658_v30, %v269_v31  ;;  %v2894_v33 = vpop.f32.mrb[1].mxu0 }
  0xdb   :  { %v272_v34 = vpop.f32.mrb[2].mxu0 }
  0xdc   :  { %v458_v35 = vmul.f32 0.01, %v270_v32  ;;  %v273_v36 = vadd.f32 %v3658_v30, %v272_v34  ;;  %v2895_v37 = vpop.f32.mrb[3].mxu0  ;;  %vm420_vm3 = vcmp.ge.f32.partialorder %v270_v32, 0.0 }
  0xde   :  { %vm421_vm4 = vcmp.ge.f32.partialorder %v273_v36, 0.0  ;;  %v459_v38 = vmul.f32 0.01, %v273_v36  ;;  %v496_v39 = vsel %vm420_vm3, %v270_v32, %v458_v35 }
  0xe0   :  { %v497_v40 = vsel %vm421_vm4, %v273_v36, %v459_v38 }
  0xe1   :  { %v277_v41 = vpop.f32.mrb[4].mxu0  ;;  %v535_v42 = vpack.c.bf16 %v497_v40, %v496_v39 }
  0xe2   :  { %v278_v43 = vadd.f32 %v3658_v30, %v277_v41  ;;  %v2898_v44 = vpop.f32.mrb[5].mxu0 }
  0xe3   :  { %v280_v45 = vpop.f32.mrb[6].mxu0  ;;  %2985 = vmatmul.mubr.bf16.vlgmr.msra.gmra.mrb[0].mxu1 %v535_v42 }
  0xe4   :  { %v460_v46 = vmul.f32 0.01, %v278_v43  ;;  %v281_v47 = vadd.f32 %v3658_v30, %v280_v45  ;;  %v2899_v48 = vpop.f32.mrb[7].mxu0  ;;  %2988 = vmatprep.mubr.msk.bf16.mxu1 %vm3458_vm1, %v3457_v0  ;;  %vm422_vm5 = vcmp.ge.f32.partialorder %v278_v43, 0.0 }
  0xe6   :  { %vm423_vm6 = vcmp.ge.f32.partialorder %v281_v47, 0.0  ;;  %v461_v49 = vmul.f32 0.01, %v281_v47  ;;  %v498_v50 = vsel %vm422_vm5, %v278_v43, %v460_v46 }
  0xe8   :  { %v499_v51 = vsel %vm423_vm6, %v281_v47, %v461_v49 }
  0xe9   :  { %v285_v52 = vpop.f32.mrb[8].mxu0  ;;  %v536_v53 = vpack.c.bf16 %v499_v51, %v498_v50 }
  0xea   :  { %v286_v54 = vadd.f32 %v3658_v30, %v285_v52  ;;  %v2902_v55 = vpop.f32.mrb[9].mxu0 }
  0xeb   :  { %v288_v56 = vpop.f32.mrb[10].mxu0  ;;  %2989 = vmatmul.mubr.bf16.gmra.mrb[4].mxu1 %v536_v53 }
  0xec   :  { %v462_v57 = vmul.f32 0.01, %v286_v54  ;;  %v289_v58 = vadd.f32 %v3658_v30, %v288_v56  ;;  %v2903_v59 = vpop.f32.mrb[11].mxu0  ;;  %2992 = vmatprep.mubr.msk.bf16.mxu1 %vm3458_vm1, %v3457_v0  ;;  %vm424_vm7 = vcmp.ge.f32.partialorder %v286_v54, 0.0 }
  0xee   :  { %vm425_vm8 = vcmp.ge.f32.partialorder %v289_v58, 0.0  ;;  %v463_v60 = vmul.f32 0.01, %v289_v58  ;;  %v500_v61 = vsel %vm424_vm7, %v286_v54, %v462_v57 }
  0xf0   :  { %v501_v62 = vsel %vm425_vm8, %v289_v58, %v463_v60 }
  0xf1   :  { %v293_v63 = vpop.f32.mrb[12].mxu0  ;;  %v537_v1 = vpack.c.bf16 %v501_v62, %v500_v61 }
  0xf2   :  { %v294_v2 = vadd.f32 %v3658_v30, %v293_v63  ;;  %v2906_v3 = vpop.f32.mrb[13].mxu0 }
  0xf3   :  { %v296_v4 = vpop.f32.mrb[14].mxu0  ;;  %2993 = vmatmul.mubr.bf16.gmra.mrb[8].mxu1 %v537_v1 }
  0xf4   :  { %v464_v5 = vmul.f32 0.01, %v294_v2  ;;  %v297_v6 = vadd.f32 %v3658_v30, %v296_v4  ;;  %v2907_v7 = vpop.f32.mrb[15].mxu0  ;;  %2996 = vmatprep.mubr.msk.bf16.mxu1 %vm3458_vm1, %v3457_v0  ;;  %vm426_vm9 = vcmp.ge.f32.partialorder %v294_v2, 0.0 }
  0xf6   :  { %vm427_vm10 = vcmp.ge.f32.partialorder %v297_v6, 0.0  ;;  %v465_v8 = vmul.f32 0.01, %v297_v6  ;;  %v502_v9 = vsel %vm426_vm9, %v294_v2, %v464_v5 }
  0xf8   :  { %v503_v10 = vsel %vm427_vm10, %v297_v6, %v465_v8 }
  0xf9   :  { %v301_v11 = vpop.f32.mrb[16].mxu0  ;;  %v538_v12 = vpack.c.bf16 %v503_v10, %v502_v9 }
  0xfa   :  { %v302_v13 = vadd.f32 %v3658_v30, %v301_v11  ;;  %v2910_v14 = vpop.f32.mrb[17].mxu0 }
  0xfb   :  { %v304_v15 = vpop.f32.mrb[18].mxu0  ;;  %2997 = vmatmul.mubr.bf16.gmra.mrb[12].mxu1 %v538_v12 }
  0xfc   :  { %v466_v16 = vmul.f32 0.01, %v302_v13  ;;  %v305_v17 = vadd.f32 %v3658_v30, %v304_v15  ;;  %v2911_v18 = vpop.f32.mrb[19].mxu0  ;;  %3000 = vmatprep.mubr.msk.bf16.mxu1 %vm3458_vm1, %v3457_v0  ;;  %vm428_vm11 = vcmp.ge.f32.partialorder %v302_v13, 0.0 }
  0xfe   :  { %vm429_vm12 = vcmp.ge.f32.partialorder %v305_v17, 0.0  ;;  %v467_v19 = vmul.f32 0.01, %v305_v17  ;;  %v504_v20 = vsel %vm428_vm11, %v302_v13, %v466_v16 }
 0x100   :  { %v505_v21 = vsel %vm429_vm12, %v305_v17, %v467_v19 }
 0x101   :  { %v309_v22 = vpop.f32.mrb[20].mxu0  ;;  %v539_v23 = vpack.c.bf16 %v505_v21, %v504_v20 }
 0x102   :  { %v310_v24 = vadd.f32 %v3658_v30, %v309_v22  ;;  %v2914_v25 = vpop.f32.mrb[21].mxu0 }
 0x103   :  { %v312_v26 = vpop.f32.mrb[22].mxu0  ;;  %3001 = vmatmul.mubr.bf16.gmra.mrb[16].mxu1 %v539_v23 }
 0x104   :  { %v468_v27 = vmul.f32 0.01, %v310_v24  ;;  %v313_v28 = vadd.f32 %v3658_v30, %v312_v26  ;;  %v2915_v29 = vpop.f32.mrb[23].mxu0  ;;  %3004 = vmatprep.mubr.msk.bf16.mxu1 %vm3458_vm1, %v3457_v0  ;;  %vm430_vm13 = vcmp.ge.f32.partialorder %v310_v24, 0.0 }
 0x106   :  { %vm431_vm14 = vcmp.ge.f32.partialorder %v313_v28, 0.0  ;;  %v469_v31 = vmul.f32 0.01, %v313_v28  ;;  %v506_v32 = vsel %vm430_vm13, %v310_v24, %v468_v27 }
 0x108   :  { %v507_v33 = vsel %vm431_vm14, %v313_v28, %v469_v31 }
 0x109   :  { %v317_v34 = vpop.f32.mrb[24].mxu0  ;;  %v540_v35 = vpack.c.bf16 %v507_v33, %v506_v32 }
 0x10a   :  { %v318_v36 = vadd.f32 %v3658_v30, %v317_v34  ;;  %v2918_v37 = vpop.f32.mrb[25].mxu0 }
 0x10b   :  { %v320_v38 = vpop.f32.mrb[26].mxu0  ;;  %3005 = vmatmul.mubr.bf16.gmra.mrb[20].mxu1 %v540_v35 }
 0x10c   :  { %v470_v39 = vmul.f32 0.01, %v318_v36  ;;  %v321_v40 = vadd.f32 %v3658_v30, %v320_v38  ;;  %v2919_v41 = vpop.f32.mrb[27].mxu0  ;;  %3008 = vmatprep.mubr.msk.bf16.mxu1 %vm3458_vm1, %v3457_v0  ;;  %vm432_vm15 = vcmp.ge.f32.partialorder %v318_v36, 0.0 }
 0x10e   :  { %vm433_vm0 = vcmp.ge.f32.partialorder %v321_v40, 0.0  ;;  %v471_v42 = vmul.f32 0.01, %v321_v40  ;;  %v508_v43 = vsel %vm432_vm15, %v318_v36, %v470_v39 }
 0x110   :  { %v509_v44 = vsel %vm433_vm0, %v321_v40, %v471_v42 }
 0x111   :  { %v325_v45 = vpop.f32.mrb[28].mxu0  ;;  %v541_v46 = vpack.c.bf16 %v509_v44, %v508_v43 }
 0x112   :  { %v326_v47 = vadd.f32 %v3658_v30, %v325_v45  ;;  %v2922_v48 = vpop.f32.mrb[29].mxu0 }
 0x113   :  { %v328_v49 = vpop.f32.mrb[30].mxu0  ;;  %3009 = vmatmul.mubr.bf16.gmra.mrb[24].mxu1 %v541_v46 }
 0x114   :  { %vm434_vm2 = vcmp.ge.f32.partialorder %v326_v47, 0.0  ;;  %v472_v50 = vmul.f32 0.01, %v326_v47  ;;  %v329_v51 = vadd.f32 %v3658_v30, %v328_v49  ;;  %v2923_v52 = vpop.f32.mrb[31].mxu0  ;;  %3012 = vmatprep.mubr.msk.bf16.mxu1 %vm3458_vm1, %v3457_v0 }
 0x116   :  { %vm435_vm3 = vcmp.ge.f32.partialorder %v329_v51, 0.0  ;;  %v473_v53 = vmul.f32 0.01, %v329_v51  ;;  %v510_v54 = vsel %vm434_vm2, %v326_v47, %v472_v50 }
 0x118   :  { %v511_v55 = vsel %vm435_vm3, %v329_v51, %v473_v53 }
 0x119   :  { %v333_v56 = vpop.f32.mrb[32].mxu0  ;;  %v542_v57 = vpack.c.bf16 %v511_v55, %v510_v54 }
 0x11a   :  { %v334_v58 = vadd.f32 %v3658_v30, %v333_v56  ;;  %v2926_v59 = vpop.f32.mrb[33].mxu0 }
 0x11b   :  { %v336_v60 = vpop.f32.mrb[34].mxu0  ;;  %3013 = vmatmul.mubr.bf16.gmra.mrb[28].mxu1 %v542_v57 }
 0x11c   :  { %vm436_vm4 = vcmp.ge.f32.partialorder %v334_v58, 0.0  ;;  %v474_v61 = vmul.f32 0.01, %v334_v58  ;;  %v337_v62 = vadd.f32 %v3658_v30, %v336_v60  ;;  %v2927_v63 = vpop.f32.mrb[35].mxu0  ;;  %3016 = vmatprep.mubr.msk.bf16.mxu1 %vm3458_vm1, %v3457_v0 }
 0x11e   :  { %vm437_vm5 = vcmp.ge.f32.partialorder %v337_v62, 0.0  ;;  %v475_v1 = vmul.f32 0.01, %v337_v62  ;;  %v512_v2 = vsel %vm436_vm4, %v334_v58, %v474_v61 }
 0x120   :  { %v513_v3 = vsel %vm437_vm5, %v337_v62, %v475_v1 }
 0x121   :  { %v341_v4 = vpop.f32.mrb[36].mxu0  ;;  %v543_v5 = vpack.c.bf16 %v513_v3, %v512_v2 }
 0x122   :  { %v342_v6 = vadd.f32 %v3658_v30, %v341_v4  ;;  %v2930_v7 = vpop.f32.mrb[37].mxu0 }
 0x123   :  { %v344_v8 = vpop.f32.mrb[38].mxu0  ;;  %3017 = vmatmul.mubr.bf16.gmra.mrb[32].mxu1 %v543_v5 }
 0x124   :  { %vm438_vm6 = vcmp.ge.f32.partialorder %v342_v6, 0.0  ;;  %v476_v9 = vmul.f32 0.01, %v342_v6  ;;  %v345_v10 = vadd.f32 %v3658_v30, %v344_v8  ;;  %v2931_v11 = vpop.f32.mrb[39].mxu0  ;;  %3020 = vmatprep.mubr.msk.bf16.mxu1 %vm3458_vm1, %v3457_v0 }
 0x126   :  { %vm439_vm7 = vcmp.ge.f32.partialorder %v345_v10, 0.0  ;;  %v477_v12 = vmul.f32 0.01, %v345_v10  ;;  %v514_v13 = vsel %vm438_vm6, %v342_v6, %v476_v9 }
 0x128   :  { %v515_v14 = vsel %vm439_vm7, %v345_v10, %v477_v12 }
 0x129   :  { %v349_v15 = vpop.f32.mrb[40].mxu0  ;;  %v544_v16 = vpack.c.bf16 %v515_v14, %v514_v13 }
 0x12a   :  { %v350_v17 = vadd.f32 %v3658_v30, %v349_v15  ;;  %v2934_v18 = vpop.f32.mrb[41].mxu0 }
 0x12b   :  { %v352_v19 = vpop.f32.mrb[42].mxu0  ;;  %3021 = vmatmul.mubr.bf16.gmra.mrb[36].mxu1 %v544_v16 }
 0x12c   :  { %vm440_vm8 = vcmp.ge.f32.partialorder %v350_v17, 0.0  ;;  %v478_v20 = vmul.f32 0.01, %v350_v17  ;;  %v353_v21 = vadd.f32 %v3658_v30, %v352_v19  ;;  %3024 = vmatprep.mubr.msk.bf16.mxu1 %vm3458_vm1, %v3457_v0  ;;  %v2935_v22 = vpop.f32.mrb[43].mxu0 }
 0x12e   :  { %vm441_vm9 = vcmp.ge.f32.partialorder %v353_v21, 0.0  ;;  %v479_v23 = vmul.f32 0.01, %v353_v21  ;;  %v516_v24 = vsel %vm440_vm8, %v350_v17, %v478_v20 }
 0x130   :  { %v517_v25 = vsel %vm441_vm9, %v353_v21, %v479_v23 }
 0x131   :  { %v545_v26 = vpack.c.bf16 %v517_v25, %v516_v24  ;;  %v357_v27 = vpop.f32.mrb[44].mxu0 }
 0x132   :  { %v358_v28 = vadd.f32 %v3658_v30, %v357_v27  ;;  %v2938_v29 = vpop.f32.mrb[45].mxu0 }
 0x133   :  { %3025 = vmatmul.mubr.bf16.gmra.mrb[40].mxu1 %v545_v26  ;;  %v360_v31 = vpop.f32.mrb[46].mxu0 }
 0x134   :  { %vm442_vm10 = vcmp.ge.f32.partialorder %v358_v28, 0.0  ;;  %v480_v32 = vmul.f32 0.01, %v358_v28  ;;  %v361_v33 = vadd.f32 %v3658_v30, %v360_v31  ;;  %v2939_v34 = vpop.f32.mrb[47].mxu0  ;;  %3028 = vmatprep.mubr.msk.bf16.mxu1 %vm3458_vm1, %v3457_v0 }
 0x136   :  { %vm443_vm11 = vcmp.ge.f32.partialorder %v361_v33, 0.0  ;;  %v481_v35 = vmul.f32 0.01, %v361_v33  ;;  %v518_v36 = vsel %vm442_vm10, %v358_v28, %v480_v32 }
 0x138   :  { %v519_v37 = vsel %vm443_vm11, %v361_v33, %v481_v35 }
 0x139   :  { %v365_v38 = vpop.f32.mrb[48].mxu0  ;;  %v546_v39 = vpack.c.bf16 %v519_v37, %v518_v36 }
 0x13a   :  { %v366_v40 = vadd.f32 %v3658_v30, %v365_v38  ;;  %v2942_v41 = vpop.f32.mrb[49].mxu0 }
 0x13b   :  { %v368_v42 = vpop.f32.mrb[50].mxu0  ;;  %3029 = vmatmul.mubr.bf16.gmra.mrb[44].mxu1 %v546_v39 }
 0x13c   :  { %vm444_vm12 = vcmp.ge.f32.partialorder %v366_v40, 0.0  ;;  %v482_v43 = vmul.f32 0.01, %v366_v40  ;;  %v369_v44 = vadd.f32 %v3658_v30, %v368_v42  ;;  %v2943_v45 = vpop.f32.mrb[51].mxu0  ;;  %3032 = vmatprep.mubr.msk.bf16.mxu1 %vm3458_vm1, %v3457_v0 }
 0x13e   :  { %vm445_vm13 = vcmp.ge.f32.partialorder %v369_v44, 0.0  ;;  %v483_v46 = vmul.f32 0.01, %v369_v44  ;;  %v520_v47 = vsel %vm444_vm12, %v366_v40, %v482_v43 }
 0x140   :  { %v521_v48 = vsel %vm445_vm13, %v369_v44, %v483_v46 }
 0x141   :  { %v373_v49 = vpop.f32.mrb[52].mxu0  ;;  %v547_v50 = vpack.c.bf16 %v521_v48, %v520_v47 }
 0x142   :  { %v374_v51 = vadd.f32 %v3658_v30, %v373_v49  ;;  %v2946_v52 = vpop.f32.mrb[53].mxu0 }
 0x143   :  { %v376_v53 = vpop.f32.mrb[54].mxu0  ;;  %3033 = vmatmul.mubr.bf16.gmra.mrb[48].mxu1 %v547_v50 }
 0x144   :  { %vm446_vm14 = vcmp.ge.f32.partialorder %v374_v51, 0.0  ;;  %v484_v54 = vmul.f32 0.01, %v374_v51  ;;  %v377_v55 = vadd.f32 %v3658_v30, %v376_v53  ;;  %v2947_v56 = vpop.f32.mrb[55].mxu0  ;;  %3036 = vmatprep.mubr.msk.bf16.mxu1 %vm3458_vm1, %v3457_v0 }
 0x146   :  { %vm447_vm15 = vcmp.ge.f32.partialorder %v377_v55, 0.0  ;;  %v485_v57 = vmul.f32 0.01, %v377_v55  ;;  %v522_v58 = vsel %vm446_vm14, %v374_v51, %v484_v54  ;;  %v27_v54 = vlaneseq }
 0x148   :  { %v523_v59 = vsel %vm447_vm15, %v377_v55, %v485_v57  ;;  %v3737_v55 = vshrl.u32 %v27_v54, 7 }
 0x149   :  { %v381_v60 = vpop.f32.mrb[56].mxu0  ;;  %v548_v61 = vpack.c.bf16 %v523_v59, %v522_v58 }
 0x14a   :  { %v382_v62 = vadd.f32 %v3658_v30, %v381_v60  ;;  %v2950_v63 = vpop.f32.mrb[57].mxu0  ;;  %v572_v56 = vsub.s32 0, %v3737_v55 }
 0x14b   :  { %v384_v1 = vpop.f32.mrb[58].mxu0  ;;  %3037 = vmatmul.mubr.bf16.gmra.mrb[52].mxu1 %v548_v61 }
 0x14c   :  { %vm448_vm0 = vcmp.ge.f32.partialorder %v382_v62, 0.0  ;;  %v486_v2 = vmul.f32 0.01, %v382_v62  ;;  %v385_v3 = vadd.f32 %v3658_v30, %v384_v1  ;;  %v2951_v4 = vpop.f32.mrb[59].mxu0  ;;  %3040 = vmatprep.mubr.msk.bf16.mxu1 %vm3458_vm1, %v3457_v0 }
 0x14e   :  { %vm449_vm2 = vcmp.ge.f32.partialorder %v385_v3, 0.0  ;;  %v487_v5 = vmul.f32 0.01, %v385_v3  ;;  %v524_v6 = vsel %vm448_vm0, %v382_v62, %v486_v2 }
 0x150   :  { %v525_v7 = vsel %vm449_vm2, %v385_v3, %v487_v5 }
 0x151   :  { %v389_v8 = vpop.f32.mrb[60].mxu0  ;;  %v549_v9 = vpack.c.bf16 %v525_v7, %v524_v6 }
 0x152   :  { %v390_v10 = vadd.f32 %v3658_v30, %v389_v8  ;;  %v2954_v11 = vpop.f32.mrb[61].mxu0 }
 0x153   :  { %v392_v12 = vpop.f32.mrb[62].mxu0  ;;  %3041 = vmatmul.mubr.bf16.gmra.mrb[56].mxu1 %v549_v9 }
 0x154   :  { %vm450_vm3 = vcmp.ge.f32.partialorder %v390_v10, 0.0  ;;  %v488_v13 = vmul.f32 0.01, %v390_v10  ;;  %v393_v14 = vadd.f32 %v3658_v30, %v392_v12  ;;  %v2955_v15 = vpop.f32.mrb[63].mxu0  ;;  %3044 = vmatprep.mubr.msk.bf16.mxu1 %vm3458_vm1, %v3457_v0 }
 0x156   :  { %vm451_vm4 = vcmp.ge.f32.partialorder %v393_v14, 0.0  ;;  %v489_v16 = vmul.f32 0.01, %v393_v14  ;;  %v526_v17 = vsel %vm450_vm3, %v390_v10, %v488_v13 }
 0x158   :  { %v527_v18 = vsel %vm451_vm4, %v393_v14, %v489_v16 }
 0x159   :  { %v397_v19 = vpop.f32.mrb[64].mxu0  ;;  %v550_v20 = vpack.c.bf16 %v527_v18, %v526_v17 }
 0x15a   :  { %v398_v21 = vadd.f32 %v3658_v30, %v397_v19  ;;  %v2958_v22 = vpop.f32.mrb[65].mxu0 }
 0x15b   :  { %v400_v23 = vpop.f32.mrb[66].mxu0  ;;  %3045 = vmatmul.mubr.bf16.gmra.mrb[60].mxu1 %v550_v20 }
 0x15c   :  { %vm452_vm5 = vcmp.ge.f32.partialorder %v398_v21, 0.0  ;;  %v490_v24 = vmul.f32 0.01, %v398_v21  ;;  %v401_v25 = vadd.f32 %v3658_v30, %v400_v23  ;;  %v2959_v26 = vpop.f32.mrb[67].mxu0  ;;  %3048 = vmatprep.mubr.msk.bf16.mxu1 %vm3458_vm1, %v3457_v0 }
 0x15e   :  { %vm453_vm6 = vcmp.ge.f32.partialorder %v401_v25, 0.0  ;;  %v491_v27 = vmul.f32 0.01, %v401_v25  ;;  %v528_v28 = vsel %vm452_vm5, %v398_v21, %v490_v24 }
 0x160   :  { %v529_v29 = vsel %vm453_vm6, %v401_v25, %v491_v27 }
 0x161   :  { %v405_v31 = vpop.f32.mrb[68].mxu0  ;;  %v551_v32 = vpack.c.bf16 %v529_v29, %v528_v28 }
 0x162   :  { %v406_v33 = vadd.f32 %v3658_v30, %v405_v31  ;;  %v2962_v34 = vpop.f32.mrb[69].mxu0 }
 0x163   :  { %v408_v35 = vpop.f32.mrb[70].mxu0  ;;  %3049 = vmatmul.mubr.bf16.gmra.mrb[64].mxu1 %v551_v32 }
 0x164   :  { %vm454_vm7 = vcmp.ge.f32.partialorder %v406_v33, 0.0  ;;  %v492_v36 = vmul.f32 0.01, %v406_v33  ;;  %v409_v37 = vadd.f32 %v3658_v30, %v408_v35  ;;  %v2963_v38 = vpop.f32.mrb[71].mxu0  ;;  %3052 = vmatprep.mubr.msk.bf16.mxu1 %vm3458_vm1, %v3457_v0 }
 0x165   :  { %v3289_v38 = vld [vmem:[%s5133_s3 + $0x40] sm:$0xff]  }
 0x166   :  { %vm455_vm8 = vcmp.ge.f32.partialorder %v409_v37, 0.0  ;;  %v493_v39 = vmul.f32 0.01, %v409_v37  ;;  %v530_v40 = vsel %vm454_vm7, %v406_v33, %v492_v36  ;;  %3061 = vmatpush3.bf16.msra.mxu0 %v3289_v38 }
 0x167   :  { %3062 = vmatprep.subr.bf16.mxu0 %v3457_v0 }
 0x168   :  { %v531_v41 = vsel %vm455_vm8, %v409_v37, %v493_v39 }
 0x169   :  { %v552_v42 = vpack.c.bf16 %v531_v41, %v530_v40  ;;  %v413_v43 = vpop.f32.mrb[72].mxu0 }
 0x16a   :  { %v414_v44 = vadd.f32 %v3658_v30, %v413_v43  ;;  %v2966_v45 = vpop.f32.mrb[73].mxu0 }
 0x16b   :  { %3053 = vmatmul.mubr.bf16.gmra.mrb[68].mxu1 %v552_v42  ;;  %v416_v46 = vpop.f32.mrb[74].mxu0 }
 0x16c   :  { %vm456_vm9 = vcmp.ge.f32.partialorder %v414_v44, 0.0  ;;  %v494_v47 = vmul.f32 0.01, %v414_v44  ;;  %v417_v48 = vadd.f32 %v3658_v30, %v416_v46  ;;  %3056 = vmatprep.mubr.msk.bf16.mxu1 %vm3458_vm1, %v3457_v0  ;;  %v2967_v49 = vpop.f32.mrb[75].mxu0  ;;  %v3743_v30 = vld [vmem:[%s5135_s4] sm:$0x7] }
 0x16d   :  { %v3748_v57 = vrot.slane %v3743_v30, %v572_v56 }
 0x16e   :  { %vm457_vm10 = vcmp.ge.f32.partialorder %v417_v48, 0.0  ;;  %v495_v50 = vmul.f32 0.01, %v417_v48  ;;  %v532_v51 = vsel %vm456_vm9, %v414_v44, %v494_v47 }
 0x170   :  { %v533_v52 = vsel %vm457_vm10, %v417_v48, %v495_v50 }
 0x171   :  { %v553_v53 = vpack.c.bf16 %v533_v52, %v532_v51  ;;  %v3290_v51 = vld [vmem:[%s5133_s3 + $0x48] sm:$0xff]  }
 0x172   :  { %3063 = vmatpush3.bf16.msra.mxu0 %v3290_v51 }
 0x173   :  { %3057 = vmatmul.mubr.bf16.gmra.mrb[72].mxu1 %v553_v53  ;;  %3064 = vmatprep.subr.bf16.mxu0 %v3457_v0 }
 0x174   :  { %3172 = vmatprep.mubr.msk.bf16.mxu1 %vm3458_vm1, %v3457_v0 }
 0x1b6   :  { %v656_v58 = vpop.f32.mrb[0].mxu1 }
 0x1b7   :  { %v3751_v59 = vadd.f32 %v656_v58, %v3748_v57  ;;  %v2986_v60 = vpop.f32.mrb[1].mxu1 }
 0x1b8   :  { %v659_v61 = vpop.f32.mrb[2].mxu1 }
 0x1b9   :  { %807 = vadd.xlane.f32.xlu0 %v3751_v59  ;;  %v2987_v62 = vpop.f32.mrb[3].mxu1  ;;  %v3755_v63 = vadd.f32 %v659_v61, %v3748_v57 }
 0x1bd   :  { %809 = vadd.xlane.f32.xlu0 %v3755_v63 }
 0x1be   :  { %v664_v1 = vpop.f32.mrb[4].mxu1 }
 0x1bf   :  { %v3759_v2 = vadd.f32 %v664_v1, %v3748_v57  ;;  %v2990_v3 = vpop.f32.mrb[5].mxu1 }
 0x1c0   :  { %v667_v4 = vpop.f32.mrb[6].mxu1 }
 0x1c1   :  { %811 = vadd.xlane.f32.xlu1 %v3759_v2  ;;  %v2991_v5 = vpop.f32.mrb[7].mxu1  ;;  %v3763_v6 = vadd.f32 %v667_v4, %v3748_v57 }
 0x1c5   :  { %813 = vadd.xlane.f32.xlu1 %v3763_v6 }
 0x1c6   :  { %v672_v7 = vpop.f32.mrb[8].mxu1 }
 0x1c7   :  { %v3767_v8 = vadd.f32 %v672_v7, %v3748_v57  ;;  %v2994_v9 = vpop.f32.mrb[9].mxu1 }
 0x1c8   :  { %v675_v10 = vpop.f32.mrb[10].mxu1 }
 0x1c9   :  { %v3770_v11 = vadd.f32 %v675_v10, %v3748_v57  ;;  %815 = vadd.xlane.f32.xlu0 %v3767_v8  ;;  %v2995_v12 = vpop.f32.mrb[11].mxu1 }
 0x1cb   :  { %817 = vadd.xlane.f32.xlu1 %v3770_v11 }
 0x1ce   :  { %v680_v13 = vpop.f32.mrb[12].mxu1 }
 0x1cf   :  { %v3775_v14 = vadd.f32 %v680_v13, %v3748_v57  ;;  %v2998_v15 = vpop.f32.mrb[13].mxu1 }
 0x1d0   :  { %v683_v16 = vpop.f32.mrb[14].mxu1 }
 0x1d1   :  { %v3778_v17 = vadd.f32 %v683_v16, %v3748_v57  ;;  %819 = vadd.xlane.f32.xlu0 %v3775_v14  ;;  %v2999_v18 = vpop.f32.mrb[15].mxu1  ;;  %v3291_v16 = vld [vmem:[%s5133_s3 + $0x50] sm:$0xff]  }
 0x1d2   :  { %3065 = vmatpush3.bf16.msra.mxu0 %v3291_v16 }
 0x1d3   :  { %821 = vadd.xlane.f32.xlu1 %v3778_v17  ;;  %3066 = vmatprep.subr.bf16.mxu0 %v3457_v0 }
 0x1d6   :  { %v688_v19 = vpop.f32.mrb[16].mxu1 }
 0x1d7   :  { %v3783_v20 = vadd.f32 %v688_v19, %v3748_v57  ;;  %v3002_v21 = vpop.f32.mrb[17].mxu1 }
 0x1d8   :  { %v691_v22 = vpop.f32.mrb[18].mxu1 }
 0x1d9   :  { %v3786_v23 = vadd.f32 %v691_v22, %v3748_v57  ;;  %823 = vadd.xlane.f32.xlu0 %v3783_v20  ;;  %v3003_v24 = vpop.f32.mrb[19].mxu1 }
 0x1db   :  { %825 = vadd.xlane.f32.xlu1 %v3786_v23 }
 0x1de   :  { %v696_v25 = vpop.f32.mrb[20].mxu1 }
 0x1df   :  { %v3791_v26 = vadd.f32 %v696_v25, %v3748_v57  ;;  %v3006_v27 = vpop.f32.mrb[21].mxu1 }
 0x1e0   :  { %v699_v28 = vpop.f32.mrb[22].mxu1 }
 0x1e1   :  { %v3794_v29 = vadd.f32 %v699_v28, %v3748_v57  ;;  %827 = vadd.xlane.f32.xlu0 %v3791_v26  ;;  %v3007_v31 = vpop.f32.mrb[23].mxu1 }
 0x1e2   :  { %v3292_v31 = vld [vmem:[%s5133_s3 + $0x58] sm:$0xff]  }
 0x1e3   :  { %829 = vadd.xlane.f32.xlu1 %v3794_v29  ;;  %3067 = vmatpush3.bf16.msra.mxu0 %v3292_v31 }
 0x1e4   :  { %3068 = vmatprep.subr.bf16.mxu0 %v3457_v0 }
 0x1e6   :  { %v704_v32 = vpop.f32.mrb[24].mxu1 }
 0x1e7   :  { %v3799_v33 = vadd.f32 %v704_v32, %v3748_v57  ;;  %v3010_v34 = vpop.f32.mrb[25].mxu1  ;;  %v3293_v32 = vld [vmem:[%s5133_s3 + $0x60] sm:$0xff]  }
 0x1e8   :  { %v707_v35 = vpop.f32.mrb[26].mxu1  ;;  %3069 = vmatpush3.bf16.msra.mxu0 %v3293_v32 }
 0x1e9   :  { %v3802_v36 = vadd.f32 %v707_v35, %v3748_v57  ;;  %831 = vadd.xlane.f32.xlu0 %v3799_v33  ;;  %v3011_v37 = vpop.f32.mrb[27].mxu1  ;;  %3070 = vmatprep.subr.bf16.mxu0 %v3457_v0 }
 0x1ea   :  { %v3294_v37 = vld [vmem:[%s5133_s3 + $0x68] sm:$0xff]  }
 0x1eb   :  { %833 = vadd.xlane.f32.xlu1 %v3802_v36 }
 0x1ec   :  { %3071 = vmatpush3.bf16.msra.mxu0 %v3294_v37 }
 0x1ed   :  { %3072 = vmatprep.subr.bf16.mxu0 %v3457_v0 }
 0x1ee   :  { %v712_v39 = vpop.f32.mrb[28].mxu1 }
 0x1ef   :  { %v3811_v40 = vadd.f32 %v712_v39, %v3748_v57  ;;  %v3014_v41 = vpop.f32.mrb[29].mxu1 }
 0x1f0   :  { %v715_v42 = vpop.f32.mrb[30].mxu1 }
 0x1f1   :  { %v3814_v43 = vadd.f32 %v715_v42, %v3748_v57  ;;  %835 = vadd.xlane.f32.xlu0 %v3811_v40  ;;  %v3015_v44 = vpop.f32.mrb[31].mxu1 }
 0x1f3   :  { %837 = vadd.xlane.f32.xlu1 %v3814_v43 }
 0x1f6   :  { %v720_v45 = vpop.f32.mrb[32].mxu1 }
 0x1f7   :  { %v3819_v46 = vadd.f32 %v720_v45, %v3748_v57  ;;  %v3018_v47 = vpop.f32.mrb[33].mxu1 }
 0x1f8   :  { %v723_v48 = vpop.f32.mrb[34].mxu1 }
 0x1f9   :  { %v3822_v49 = vadd.f32 %v723_v48, %v3748_v57  ;;  %839 = vadd.xlane.f32.xlu0 %v3819_v46  ;;  %v3019_v50 = vpop.f32.mrb[35].mxu1 }
 0x1fb   :  { %841 = vadd.xlane.f32.xlu1 %v3822_v49 }
 0x1fe   :  { %v728_v52 = vpop.f32.mrb[36].mxu1 }
 0x1ff   :  { %v3831_v53 = vadd.f32 %v728_v52, %v3748_v57  ;;  %v3022_v58 = vpop.f32.mrb[37].mxu1 }
 0x200   :  { %v731_v60 = vpop.f32.mrb[38].mxu1 }
 0x201   :  { %v3834_v61 = vadd.f32 %v731_v60, %v3748_v57  ;;  %843 = vadd.xlane.f32.xlu0 %v3831_v53  ;;  %v3023_v62 = vpop.f32.mrb[39].mxu1 }
 0x202   :  { %v28_v62 = vand.u32 127, %v27_v54 }
 0x203   :  { %845 = vadd.xlane.f32.xlu1 %v3834_v61 }
 0x204   :  { %vm29_vm11 = vcmp.lt.s32.totalorder %v28_v62, 32 }
 0x206   :  { %v736_v1 = vpop.f32.mrb[40].mxu1 }
 0x207   :  { %v3839_v3 = vadd.f32 %v736_v1, %v3748_v57  ;;  %v3026_v4 = vpop.f32.mrb[41].mxu1 }
 0x208   :  { %v739_v5 = vpop.f32.mrb[42].mxu1 }
 0x209   :  { %v3842_v7 = vadd.f32 %v739_v5, %v3748_v57  ;;  %847 = vadd.xlane.f32.xlu0 %v3839_v3  ;;  %v3027_v9 = vpop.f32.mrb[43].mxu1 }
 0x20b   :  { %849 = vadd.xlane.f32.xlu1 %v3842_v7 }
 0x20e   :  { %v744_v10 = vpop.f32.mrb[44].mxu1 }
 0x20f   :  { %v3030_v12 = vpop.f32.mrb[45].mxu1 }
 0x210   :  { %v3846_v13 = vpop.f32.mrb[46].mxu1 }
 0x211   :  { %v3031_v15 = vpop.f32.mrb[47].mxu1 }
 0x212   :  { %v3892_v15 = vsel %vm29_vm11, 1.0, %v3457_v0 }
 0x216   :  { %v3851_v18 = vpop.f32.mrb[48].mxu1 }
 0x217   :  { %v3034_v19 = vpop.f32.mrb[49].mxu1 }
 0x218   :  { %v3854_v21 = vpop.f32.mrb[50].mxu1 }
 0x219   :  { %v3035_v22 = vpop.f32.mrb[51].mxu1 }
 0x21e   :  { %v3856_v24 = vpop.f32.mrb[52].mxu1 }
 0x21f   :  { %v3038_v25 = vpop.f32.mrb[53].mxu1 }
 0x220   :  { %v3858_v27 = vpop.f32.mrb[54].mxu1 }
 0x221   :  { %v3039_v28 = vpop.f32.mrb[55].mxu1 }
 0x226   :  { %v3867_v34 = vpop.f32.mrb[56].mxu1 }
 0x227   :  { %v3042_v35 = vpop.f32.mrb[57].mxu1 }
 0x228   :  { %v3872_v38 = vpop.f32.mrb[58].mxu1 }
 0x229   :  { %v3043_v39 = vpop.f32.mrb[59].mxu1 }
 0x22e   :  { %v3876_v41 = vpop.f32.mrb[60].mxu1 }
 0x22f   :  { %v3046_v42 = vpop.f32.mrb[61].mxu1 }
 0x230   :  { %v3878_v44 = vpop.f32.mrb[62].mxu1  ;;  %v3907_v42 = vadd.f32 %v744_v10, %v3748_v57 }
 0x231   :  { %v3047_v45 = vpop.f32.mrb[63].mxu1 }
 0x236   :  { %v3880_v47 = vpop.f32.mrb[64].mxu1 }
 0x237   :  { %v3050_v48 = vpop.f32.mrb[65].mxu1 }
 0x238   :  { %v3882_v50 = vpop.f32.mrb[66].mxu1 }
 0x239   :  { %v3051_v51 = vpop.f32.mrb[67].mxu1 }
 0x23e   :  { %v3884_v52 = vpop.f32.mrb[68].mxu1 }
 0x23f   :  { %v3054_v58 = vpop.f32.mrb[69].mxu1 }
 0x240   :  { %v3886_v60 = vpop.f32.mrb[70].mxu1  ;;  %v3918_v58 = vadd.f32 %v3846_v13, %v3748_v57 }
 0x241   :  { %v3055_v1 = vpop.f32.mrb[71].mxu1 }
 0x246   :  { %v808_v4 = vpop.xlane.xlu0 %807  ;;  %v3889_v5 = vpop.f32.mrb[72].mxu1 }
 0x247   :  { %v883_v9 = vmul.f32 0.03125, %v808_v4  ;;  %v3058_v12 = vpop.f32.mrb[73].mxu1 }
 0x248   :  { %v3894_v16 = vpop.f32.mrb[74].mxu1  ;;  %v3929_v12 = vadd.f32 %v3851_v18, %v3748_v57 }
 0x249   :  { %v921_v19 = vsub.f32 %v3751_v59, %v883_v9  ;;  %v3059_v22 = vpop.f32.mrb[75].mxu1 }
 0x24a   :  { %v810_v25 = vpop.xlane.xlu0 %809 }
 0x24b   :  { %v884_v28 = vmul.f32 0.03125, %v810_v25  ;;  %v3898_v31 = vmul.f32 %v3892_v15, %v921_v19 }
 0x24d   :  { %v922_v54 = vsub.f32 %v3755_v63, %v884_v28  ;;  %v997_v32 = vmul.f32 %v3898_v31, %v3898_v31  ;;  %v3941_v28 = vadd.f32 %v3854_v21, %v3748_v57 }
 0x24e   :  { %v812_v35 = vpop.xlane.xlu1 %811 }
 0x24f   :  { %v885_v37 = vmul.f32 0.03125, %v812_v35  ;;  %1035 = vadd.xlane.f32.xlu0 %v997_v32  ;;  %v3904_v39 = vmul.f32 %v3892_v15, %v922_v54  ;;  %v3951_v35 = vadd.f32 %v3856_v24, %v3748_v57 }
 0x251   :  { %v923_v59 = vsub.f32 %v3759_v2, %v885_v37  ;;  %v998_v45 = vmul.f32 %v3904_v39, %v3904_v39 }
 0x252   :  { %v814_v48 = vpop.xlane.xlu1 %813 }
 0x253   :  { %v886_v51 = vmul.f32 0.03125, %v814_v48  ;;  %1037 = vadd.xlane.f32.xlu1 %v998_v45  ;;  %851 = vadd.xlane.f32.xlu0 %v3907_v42  ;;  %v3914_v63 = vmul.f32 %v3892_v15, %v923_v59 }
 0x255   :  { %v924_v10 = vsub.f32 %v3763_v6, %v886_v51  ;;  %v999_v2 = vmul.f32 %v3914_v63, %v3914_v63  ;;  %v3963_v51 = vadd.f32 %v3858_v27, %v3748_v57 }
 0x256   :  { %v816_v62 = vpop.xlane.xlu0 %815 }
 0x257   :  { %v887_v1 = vmul.f32 0.03125, %v816_v62  ;;  %1039 = vadd.xlane.f32.xlu0 %v999_v2  ;;  %853 = vadd.xlane.f32.xlu1 %v3918_v58  ;;  %v3925_v4 = vmul.f32 %v3892_v15, %v924_v10  ;;  %v3973_v62 = vadd.f32 %v3867_v34, %v3748_v57 }
 0x258   :  { %v818_v9 = vpop.xlane.xlu1 %817 }
 0x259   :  { %v925_v13 = vsub.f32 %v3767_v8, %v887_v1  ;;  %v888_v19 = vmul.f32 0.03125, %v818_v9  ;;  %v1000_v6 = vmul.f32 %v3925_v4, %v3925_v4 }
 0x25b   :  { %v926_v22 = vsub.f32 %v3770_v11, %v888_v19  ;;  %1041 = vadd.xlane.f32.xlu1 %v1000_v6  ;;  %855 = vadd.xlane.f32.xlu0 %v3929_v12  ;;  %v3937_v25 = vmul.f32 %v3892_v15, %v925_v13  ;;  %v3985_v6 = vadd.f32 %v3872_v38, %v3748_v57 }
 0x25c   :  { %v3998_v38 = vadd.f32 %v3876_v41, %v3748_v57 }
 0x25d   :  { %v1001_v18 = vmul.f32 %v3937_v25, %v3937_v25  ;;  %v3946_v8 = vmul.f32 %v3892_v15, %v926_v22 }
 0x25e   :  { %v820_v54 = vpop.xlane.xlu0 %819 }
 0x25f   :  { %v889_v32 = vmul.f32 0.03125, %v820_v54  ;;  %1043 = vadd.xlane.f32.xlu0 %v1001_v18  ;;  %857 = vadd.xlane.f32.xlu1 %v3941_v28  ;;  %v1002_v59 = vmul.f32 %v3946_v8, %v3946_v8 }
 0x260   :  { %v822_v11 = vpop.xlane.xlu1 %821 }
 0x261   :  { %v927_v37 = vsub.f32 %v3775_v14, %v889_v32  ;;  %v890_v21 = vmul.f32 0.03125, %v822_v11 }
 0x263   :  { %v928_v45 = vsub.f32 %v3778_v17, %v890_v21  ;;  %1045 = vadd.xlane.f32.xlu1 %v1002_v59  ;;  %859 = vadd.xlane.f32.xlu0 %v3951_v35  ;;  %v3959_v48 = vmul.f32 %v3892_v15, %v927_v37  ;;  %v3296_v21 = vld [vmem:[%s5133_s3 + $0x78] sm:$0xff]  }
 0x265   :  { %v1003_v24 = vmul.f32 %v3959_v48, %v3959_v48  ;;  %v3968_v14 = vmul.f32 %v3892_v15, %v928_v45 }
 0x266   :  { %v824_v10 = vpop.xlane.xlu0 %823 }
 0x267   :  { %v891_v2 = vmul.f32 0.03125, %v824_v10  ;;  %1047 = vadd.xlane.f32.xlu0 %v1003_v24  ;;  %861 = vadd.xlane.f32.xlu1 %v3963_v51  ;;  %v1004_v9 = vmul.f32 %v3968_v14, %v3968_v14 }
 0x268   :  { %v826_v17 = vpop.xlane.xlu1 %825 }
 0x269   :  { %v929_v1 = vsub.f32 %v3783_v20, %v891_v2  ;;  %v892_v27 = vmul.f32 0.03125, %v826_v17  ;;  %v4025_v17 = vadd.f32 %v3880_v47, %v3748_v57 }
 0x26b   :  { %v930_v13 = vsub.f32 %v3786_v23, %v892_v27  ;;  %1049 = vadd.xlane.f32.xlu1 %v1004_v9  ;;  %863 = vadd.xlane.f32.xlu0 %v3973_v62  ;;  %v3981_v19 = vmul.f32 %v3892_v15, %v929_v1  ;;  %v3295_v23 = vld [vmem:[%s5133_s3 + $0x70] sm:$0xff]  }
 0x26c   :  { %3073 = vmatpush3.bf16.msra.mxu0 %v3295_v23 }
 0x26d   :  { %v1005_v34 = vmul.f32 %v3981_v19, %v3981_v19  ;;  %v3990_v20 = vmul.f32 %v3892_v15, %v930_v13  ;;  %3074 = vmatprep.subr.bf16.mxu0 %v3457_v0 }
 0x26e   :  { %v828_v22 = vpop.xlane.xlu0 %827 }
 0x26f   :  { %v893_v18 = vmul.f32 0.03125, %v828_v22  ;;  %1051 = vadd.xlane.f32.xlu0 %v1005_v34  ;;  %865 = vadd.xlane.f32.xlu1 %v3985_v6  ;;  %v1006_v37 = vmul.f32 %v3990_v20, %v3990_v20  ;;  %v4037_v34 = vadd.f32 %v3882_v50, %v3748_v57 }
 0x270   :  { %v830_v54 = vpop.xlane.xlu1 %829  ;;  %3075 = vmatpush3.bf16.msra.mxu0 %v3296_v21  ;;  %v4059_v21 = vadd.f32 %v3886_v60, %v3748_v57 }
 0x271   :  { %v931_v32 = vsub.f32 %v3791_v26, %v893_v18  ;;  %v894_v11 = vmul.f32 0.03125, %v830_v54  ;;  %v4014_v26 = vadd.f32 %v3878_v44, %v3748_v57  ;;  %3152 = vmatprep.subr.bf16.mxu0 %v3457_v0  ;;  %v4047_v18 = vadd.f32 %v3884_v52, %v3748_v57 }
 0x273   :  { %v932_v59 = vsub.f32 %v3794_v29, %v894_v11  ;;  %1053 = vadd.xlane.f32.xlu1 %v1006_v37  ;;  %867 = vadd.xlane.f32.xlu0 %v3998_v38  ;;  %v4010_v41 = vmul.f32 %v3892_v15, %v931_v32 }
 0x275   :  { %v1007_v45 = vmul.f32 %v4010_v41, %v4010_v41  ;;  %v4019_v24 = vmul.f32 %v3892_v15, %v932_v59 }
 0x276   :  { %v832_v29 = vpop.xlane.xlu0 %831 }
 0x277   :  { %v895_v10 = vmul.f32 0.03125, %v832_v29  ;;  %1055 = vadd.xlane.f32.xlu0 %v1007_v45  ;;  %869 = vadd.xlane.f32.xlu1 %v4014_v26  ;;  %v1008_v27 = vmul.f32 %v4019_v24, %v4019_v24 }
 0x278   :  { %v834_v2 = vpop.xlane.xlu1 %833 }
 0x279   :  { %v933_v44 = vsub.f32 %v3799_v33, %v895_v10  ;;  %v896_v1 = vmul.f32 0.03125, %v834_v2 }
 0x27b   :  { %v934_v9 = vsub.f32 %v3802_v36, %v896_v1  ;;  %1057 = vadd.xlane.f32.xlu1 %v1008_v27  ;;  %871 = vadd.xlane.f32.xlu0 %v4025_v17  ;;  %v4033_v13 = vmul.f32 %v3892_v15, %v933_v44  ;;  %v4078_v1 = vadd.f32 %v3894_v16, %v3748_v57 }
 0x27d   :  { %v1009_v47 = vmul.f32 %v4033_v13, %v4033_v13  ;;  %v4042_v33 = vmul.f32 %v3892_v15, %v934_v9 }
 0x27e   :  { %v836_v22 = vpop.xlane.xlu0 %835 }
 0x27f   :  { %v897_v23 = vmul.f32 0.03125, %v836_v22  ;;  %1059 = vadd.xlane.f32.xlu0 %v1009_v47  ;;  %873 = vadd.xlane.f32.xlu1 %v4037_v34  ;;  %v1010_v32 = vmul.f32 %v4042_v33, %v4042_v33 }
 0x280   :  { %v838_v36 = vpop.xlane.xlu1 %837 }
 0x281   :  { %v935_v54 = vsub.f32 %v3811_v40, %v897_v23  ;;  %v898_v50 = vmul.f32 0.03125, %v838_v36 }
 0x283   :  { %v936_v11 = vsub.f32 %v3814_v43, %v898_v50  ;;  %1061 = vadd.xlane.f32.xlu1 %v1010_v32  ;;  %875 = vadd.xlane.f32.xlu0 %v4047_v18  ;;  %v4055_v37 = vmul.f32 %v3892_v15, %v935_v54  ;;  %v4069_v43 = vadd.f32 %v3889_v5, %v3748_v57 }
 0x285   :  { %v1011_v52 = vmul.f32 %v4055_v37, %v4055_v37  ;;  %v4064_v40 = vmul.f32 %v3892_v15, %v936_v11 }
 0x286   :  { %v840_v59 = vpop.xlane.xlu0 %839 }
 0x287   :  { %v899_v45 = vmul.f32 0.03125, %v840_v59  ;;  %1063 = vadd.xlane.f32.xlu0 %v1011_v52  ;;  %877 = vadd.xlane.f32.xlu1 %v4059_v21  ;;  %v1012_v2 = vmul.f32 %v4064_v40, %v4064_v40 }
 0x288   :  { %v842_v29 = vpop.xlane.xlu1 %841 }
 0x289   :  { %v937_v10 = vsub.f32 %v3819_v46, %v899_v45  ;;  %v900_v60 = vmul.f32 0.03125, %v842_v29 }
 0x28b   :  { %v938_v44 = vsub.f32 %v3822_v49, %v900_v60  ;;  %1065 = vadd.xlane.f32.xlu1 %v1012_v2  ;;  %879 = vadd.xlane.f32.xlu0 %v4069_v43  ;;  %v4081_v27 = vmul.f32 %v3892_v15, %v937_v10 }
 0x28d   :  { %v1013_v5 = vmul.f32 %v4081_v27, %v4081_v27  ;;  %v4086_v46 = vmul.f32 %v3892_v15, %v938_v44 }
 0x28e   :  { %v844_v9 = vpop.xlane.xlu0 %843 }
 0x28f   :  { %v901_v47 = vmul.f32 0.03125, %v844_v9  ;;  %1067 = vadd.xlane.f32.xlu0 %v1013_v5  ;;  %881 = vadd.xlane.f32.xlu1 %v4078_v1  ;;  %v1014_v57 = vmul.f32 %v4086_v46, %v4086_v46 }
 0x290   :  { %v846_v49 = vpop.xlane.xlu1 %845 }
 0x291   :  { %v939_v22 = vsub.f32 %v3831_v53, %v901_v47  ;;  %v902_v23 = vmul.f32 0.03125, %v846_v49 }
 0x293   :  { %v940_v16 = vsub.f32 %v3834_v61, %v902_v23  ;;  %1069 = vadd.xlane.f32.xlu1 %v1014_v57  ;;  %v4094_v36 = vmul.f32 %v3892_v15, %v939_v22 }
 0x295   :  { %v1015_v54 = vmul.f32 %v4094_v36, %v4094_v36  ;;  %v4099_v50 = vmul.f32 %v3892_v15, %v940_v16 }
 0x296   :  { %v848_v32 = vpop.xlane.xlu0 %847 }
 0x297   :  { %v903_v11 = vmul.f32 0.03125, %v848_v32  ;;  %1071 = vadd.xlane.f32.xlu0 %v1015_v54  ;;  %v1016_v53 = vmul.f32 %v4099_v50, %v4099_v50 }
 0x298   :  { %v850_v52 = vpop.xlane.xlu1 %849 }
 0x299   :  { %v941_v59 = vsub.f32 %v3839_v3, %v903_v11  ;;  %v904_v61 = vmul.f32 0.03125, %v850_v52  ;;  %1073 = vadd.xlane.f32.xlu1 %v1016_v53  ;;  %v1265_v53 = vsub.s32 1, %v3737_v55 }
 0x29b   :  { %v942_v45 = vsub.f32 %v3842_v7, %v904_v61  ;;  %v4106_v29 = vmul.f32 %v3892_v15, %v941_v59 }
 0x29d   :  { %v1017_v10 = vmul.f32 %v4106_v29, %v4106_v29  ;;  %v4111_v60 = vmul.f32 %v3892_v15, %v942_v45  ;;  %v5139_v45 = vsub.s32 2, %v3737_v55 }
 0x29f   :  { %1075 = vadd.xlane.f32.xlu0 %v1017_v10  ;;  %v1018_v2 = vmul.f32 %v4111_v60, %v4111_v60 }
 0x2a1   :  { %1077 = vadd.xlane.f32.xlu1 %v1018_v2 }
 0x2dc   :  { %v1036_v44 = vpop.xlane.xlu0 %1035 }
 0x2dd   :  { %v1111_v3 = vmul.f32 0.03125, %v1036_v44 }
 0x2df   :  { %v1149_v5 = vadd.f32 1e-05, %v1111_v3 }
 0x2e0   :  { %v1038_v9 = vpop.xlane.xlu1 %1037  ;;  %v852_v47 = vpop.xlane.xlu0 %851 }
 0x2e1   :  { %3305 = vrsqrt.f32 %v1149_v5  ;;  %v1112_v7 = vmul.f32 0.03125, %v1038_v9  ;;  %v905_v49 = vmul.f32 0.03125, %v852_v47  ;;  %v4130_v5 = vrot.slane %v3743_v30, %v1265_v53 }
 0x2e3   :  { %v1150_v22 = vadd.f32 1e-05, %v1112_v7  ;;  %v943_v23 = vsub.f32 %v3907_v42, %v905_v49  ;;  %v4138_v49 = vrot.slane %v3743_v30, %v5139_v45 }
 0x2e4   :  { %v1040_v57 = vpop.xlane.xlu0 %1039  ;;  %v854_v16 = vpop.xlane.xlu1 %853 }
 0x2e5   :  { %3307 = vrsqrt.f32 %v1150_v22  ;;  %v1113_v54 = vmul.f32 0.03125, %v1040_v57  ;;  %v906_v32 = vmul.f32 0.03125, %v854_v16  ;;  %v4117_v11 = vmul.f32 %v3892_v15, %v943_v23 }
 0x2e7   :  { %v1151_v52 = vadd.f32 1e-05, %v1113_v54  ;;  %v944_v59 = vsub.f32 %v3918_v58, %v906_v32  ;;  %v1019_v61 = vmul.f32 %v4117_v11, %v4117_v11 }
 0x2e8   :  { %v1042_v10 = vpop.xlane.xlu1 %1041  ;;  %v856_v42 = vpop.xlane.xlu0 %855 }
 0x2e9   :  { %3309 = vrsqrt.f32 %v1151_v52  ;;  %v1114_v2 = vmul.f32 0.03125, %v1042_v10  ;;  %v907_v44 = vmul.f32 0.03125, %v856_v42  ;;  %1079 = vadd.xlane.f32.xlu0 %v1019_v61  ;;  %v4125_v3 = vmul.f32 %v3892_v15, %v944_v59 }
 0x2eb   :  { %v3306_v58 = vpop.eup %3305  ;;  %v1152_v9 = vadd.f32 1e-05, %v1114_v2  ;;  %v945_v47 = vsub.f32 %v3929_v12, %v907_v44  ;;  %v1020_v7 = vmul.f32 %v4125_v3, %v4125_v3 }
 0x2ec   :  { %v1225_v22 = vmul.f32 %v3306_v58, %v3898_v31  ;;  %v1044_v23 = vpop.xlane.xlu0 %1043  ;;  %v858_v57 = vpop.xlane.xlu1 %857 }
 0x2ed   :  { %3311 = vrsqrt.f32 %v1152_v9  ;;  %v1115_v16 = vmul.f32 0.03125, %v1044_v23  ;;  %v908_v54 = vmul.f32 0.03125, %v858_v57  ;;  %1081 = vadd.xlane.f32.xlu1 %v1020_v7  ;;  %v4142_v32 = vmul.f32 %v3892_v15, %v945_v47 }
 0x2ee   :  { %v1267_v12 = vmul.f32 %v4130_v5, %v1225_v22 }
 0x2ef   :  { %v3308_v52 = vpop.eup %3307  ;;  %v1153_v59 = vadd.f32 1e-05, %v1115_v16  ;;  %v946_v61 = vsub.f32 %v3941_v28, %v908_v54  ;;  %v1021_v30 = vmul.f32 %v4142_v32, %v4142_v32 }
 0x2f0   :  { %v1226_v31 = vmul.f32 %v3308_v52, %v3904_v39  ;;  %v1046_v10 = vpop.xlane.xlu1 %1045  ;;  %v860_v42 = vpop.xlane.xlu0 %859  ;;  %v1309_v2 = vadd.f32 %v4138_v49, %v1267_v12 }
 0x2f1   :  { %3313 = vrsqrt.f32 %v1153_v59  ;;  %v1116_v44 = vmul.f32 0.03125, %v1046_v10  ;;  %v909_v58 = vmul.f32 0.03125, %v860_v42  ;;  %1083 = vadd.xlane.f32.xlu0 %v1021_v30  ;;  %v4151_v9 = vmul.f32 %v3892_v15, %v946_v61 }
 0x2f2   :  { %v1268_v47 = vmul.f32 %v4130_v5, %v1226_v31  ;;  %vm1347_vm12 = vcmp.ge.f32.partialorder %v1309_v2, 0.0  ;;  %v1385_v54 = vmul.f32 0.01, %v1309_v2 }
 0x2f3   :  { %v3310_v7 = vpop.eup %3309  ;;  %v1154_v28 = vadd.f32 1e-05, %v1116_v44  ;;  %v947_v22 = vsub.f32 %v3951_v35, %v909_v58  ;;  %v1022_v39 = vmul.f32 %v4151_v9, %v4151_v9 }
 0x2f4   :  { %v1048_v23 = vpop.xlane.xlu0 %1047  ;;  %v862_v57 = vpop.xlane.xlu1 %861  ;;  %v1310_v16 = vadd.f32 %v4138_v49, %v1268_v47  ;;  %v1227_v12 = vmul.f32 %v3310_v7, %v3914_v63  ;;  %v1423_v47 = vsel %vm1347_vm12, %v1309_v2, %v1385_v54 }
 0x2f5   :  { %3315 = vrsqrt.f32 %v1154_v28  ;;  %v1117_v52 = vmul.f32 0.03125, %v1048_v23  ;;  %v910_v59 = vmul.f32 0.03125, %v862_v57  ;;  %1085 = vadd.xlane.f32.xlu1 %v1022_v39  ;;  %v4160_v61 = vmul.f32 %v3892_v15, %v947_v22 }
 0x2f6   :  { %vm1348_vm13 = vcmp.ge.f32.partialorder %v1310_v16, 0.0  ;;  %v1386_v35 = vmul.f32 0.01, %v1310_v16  ;;  %v1269_v30 = vmul.f32 %v4130_v5, %v1227_v12 }
 0x2f7   :  { %v3312_v31 = vpop.eup %3311  ;;  %v1155_v10 = vadd.f32 1e-05, %v1117_v52  ;;  %v948_v42 = vsub.f32 %v3963_v51, %v910_v59  ;;  %v1023_v44 = vmul.f32 %v4160_v61, %v4160_v61 }
 0x2f8   :  { %v1050_v58 = vpop.xlane.xlu1 %1049  ;;  %v864_v63 = vpop.xlane.xlu0 %863  ;;  %v1424_v7 = vsel %vm1348_vm13, %v1310_v16, %v1386_v35  ;;  %v1228_v28 = vmul.f32 %v3312_v31, %v3925_v4  ;;  %v1311_v22 = vadd.f32 %v4138_v49, %v1269_v30 }
 0x2f9   :  { %3317 = vrsqrt.f32 %v1155_v10  ;;  %v1118_v39 = vmul.f32 0.03125, %v1050_v58  ;;  %v911_v23 = vmul.f32 0.03125, %v864_v63  ;;  %1087 = vadd.xlane.f32.xlu0 %v1023_v44  ;;  %v1463_v57 = vpack.c.bf16 %v1424_v7, %v1423_v47 }
 0x2fa   :  { %v4170_v12 = vmul.f32 %v3892_v15, %v948_v42  ;;  %v1270_v51 = vmul.f32 %v4130_v5, %v1228_v28  ;;  %vm1349_vm14 = vcmp.ge.f32.partialorder %v1311_v22, 0.0  ;;  %v1387_v35 = vmul.f32 0.01, %v1311_v22 }
 0x2fb   :  { %v3314_v52 = vpop.eup %3313  ;;  %v1156_v59 = vadd.f32 1e-05, %v1118_v39  ;;  %v949_v45 = vsub.f32 %v3973_v62, %v911_v23  ;;  %3077 = vmatmul.mubr.bf16.vlgmr.msra.gmra.mrb[76].mxu0 %v1463_v57 }
 0x2fc   :  { %v1052_v2 = vpop.xlane.xlu0 %1051  ;;  %v866_v4 = vpop.xlane.xlu1 %865  ;;  %v1024_v16 = vmul.f32 %v4170_v12, %v4170_v12  ;;  %3080 = vmatprep.mubr.msk.bf16.mxu0 %vm3458_vm1, %v3457_v0  ;;  %v1312_v54 = vadd.f32 %v4138_v49, %v1270_v51  ;;  %v1229_v30 = vmul.f32 %v3314_v52, %v3937_v25  ;;  %v1425_v39 = vsel %vm1349_vm14, %v1311_v22, %v1387_v35 }
 0x2fd   :  { %3319 = vrsqrt.f32 %v1156_v59  ;;  %v1119_v31 = vmul.f32 0.03125, %v1052_v2  ;;  %v912_v10 = vmul.f32 0.03125, %v866_v4  ;;  %v4181_v62 = vmul.f32 %v3892_v15, %v949_v45 }
 0x2fe   :  { %1089 = vadd.xlane.f32.xlu1 %v1024_v16  ;;  %vm1350_vm15 = vcmp.ge.f32.partialorder %v1312_v54, 0.0  ;;  %v1388_v42 = vmul.f32 0.01, %v1312_v54  ;;  %v1271_v44 = vmul.f32 %v4130_v5, %v1229_v30 }
 0x2ff   :  { %v3316_v58 = vpop.eup %3315  ;;  %v1157_v63 = vadd.f32 1e-05, %v1119_v31  ;;  %v950_v47 = vsub.f32 %v3985_v6, %v912_v10  ;;  %v1025_v7 = vmul.f32 %v4181_v62, %v4181_v62 }
 0x300   :  { %v1054_v28 = vpop.xlane.xlu1 %1053  ;;  %v868_v25 = vpop.xlane.xlu0 %867  ;;  %v1426_v23 = vsel %vm1350_vm15, %v1312_v54, %v1388_v42  ;;  %v1230_v45 = vmul.f32 %v3316_v58, %v3946_v8  ;;  %v1313_v57 = vadd.f32 %v4138_v49, %v1271_v44 }
 0x301   :  { %3321 = vrsqrt.f32 %v1157_v63  ;;  %v1120_v51 = vmul.f32 0.03125, %v1054_v28  ;;  %v913_v52 = vmul.f32 0.03125, %v868_v25  ;;  %1091 = vadd.xlane.f32.xlu0 %v1025_v7  ;;  %v1464_v59 = vpack.c.bf16 %v1426_v23, %v1425_v39 }
 0x302   :  { %v4191_v2 = vmul.f32 %v3892_v15, %v950_v47  ;;  %v1272_v6 = vmul.f32 %v4130_v5, %v1230_v45  ;;  %vm1351_vm0 = vcmp.ge.f32.partialorder %v1313_v57, 0.0  ;;  %v1389_v31 = vmul.f32 0.01, %v1313_v57 }
 0x303   :  { %v3318_v4 = vpop.eup %3317  ;;  %v1158_v16 = vadd.f32 1e-05, %v1120_v51  ;;  %v951_v30 = vsub.f32 %v3998_v38, %v913_v52  ;;  %3081 = vmatmul.mubr.bf16.gmra.mrb[80].mxu0 %v1464_v59 }
 0x304   :  { %v1056_v22 = vpop.xlane.xlu0 %1055  ;;  %v870_v8 = vpop.xlane.xlu1 %869  ;;  %v1026_v54 = vmul.f32 %v4191_v2, %v4191_v2  ;;  %3084 = vmatprep.mubr.msk.bf16.mxu0 %vm3458_vm1, %v3457_v0  ;;  %v1314_v35 = vadd.f32 %v4138_v49, %v1272_v6  ;;  %v1231_v10 = vmul.f32 %v3318_v4, %v3959_v48  ;;  %v1427_v23 = vsel %vm1351_vm0, %v1313_v57, %v1389_v31 }
 0x305   :  { %3323 = vrsqrt.f32 %v1158_v16  ;;  %v1121_v42 = vmul.f32 0.03125, %v1056_v22  ;;  %v914_v44 = vmul.f32 0.03125, %v870_v8  ;;  %v4202_v38 = vmul.f32 %v3892_v15, %v951_v30 }
 0x306   :  { %1093 = vadd.xlane.f32.xlu1 %v1026_v54  ;;  %vm1352_vm2 = vcmp.ge.f32.partialorder %v1314_v35, 0.0  ;;  %v1390_v58 = vmul.f32 0.01, %v1314_v35  ;;  %v1273_v63 = vmul.f32 %v4130_v5, %v1231_v10 }
 0x307   :  { %v3320_v47 = vpop.eup %3319  ;;  %v1159_v7 = vadd.f32 1e-05, %v1121_v42  ;;  %v952_v28 = vsub.f32 %v4014_v26, %v914_v44  ;;  %v1027_v25 = vmul.f32 %v4202_v38, %v4202_v38 }
 0x308   :  { %v1058_v39 = vpop.xlane.xlu1 %1057  ;;  %v872_v48 = vpop.xlane.xlu0 %871  ;;  %v1428_v45 = vsel %vm1352_vm2, %v1314_v35, %v1390_v58  ;;  %v1232_v51 = vmul.f32 %v3320_v47, %v3968_v14  ;;  %v1315_v52 = vadd.f32 %v4138_v49, %v1273_v63 }
 0x309   :  { %3325 = vrsqrt.f32 %v1159_v7  ;;  %v1122_v59 = vmul.f32 0.03125, %v1058_v39  ;;  %v915_v6 = vmul.f32 0.03125, %v872_v48  ;;  %1095 = vadd.xlane.f32.xlu0 %v1027_v25  ;;  %v1465_v4 = vpack.c.bf16 %v1428_v45, %v1427_v23 }
 0x30a   :  { %v4212_v16 = vmul.f32 %v3892_v15, %v952_v28  ;;  %v1274_v26 = vmul.f32 %v4130_v5, %v1232_v51  ;;  %vm1353_vm3 = vcmp.ge.f32.partialorder %v1315_v52, 0.0  ;;  %v1391_v31 = vmul.f32 0.01, %v1315_v52 }
 0x30b   :  { %v3322_v30 = vpop.eup %3321  ;;  %v1160_v22 = vadd.f32 1e-05, %v1122_v59  ;;  %v953_v8 = vsub.f32 %v4025_v17, %v915_v6  ;;  %3085 = vmatmul.mubr.bf16.gmra.mrb[84].mxu0 %v1465_v4 }
 0x30c   :  { %v1060_v57 = vpop.xlane.xlu0 %1059  ;;  %v874_v14 = vpop.xlane.xlu1 %873  ;;  %v1028_v54 = vmul.f32 %v4212_v16, %v4212_v16  ;;  %3088 = vmatprep.mubr.msk.bf16.mxu0 %vm3458_vm1, %v3457_v0  ;;  %v1316_v35 = vadd.f32 %v4138_v49, %v1274_v26  ;;  %v1233_v10 = vmul.f32 %v3322_v30, %v3981_v19  ;;  %v1429_v48 = vsel %vm1353_vm3, %v1315_v52, %v1391_v31 }
 0x30d   :  { %3327 = vrsqrt.f32 %v1160_v22  ;;  %v1123_v42 = vmul.f32 0.03125, %v1060_v57  ;;  %v916_v44 = vmul.f32 0.03125, %v874_v14  ;;  %v4223_v17 = vmul.f32 %v3892_v15, %v953_v8 }
 0x30e   :  { %1097 = vadd.xlane.f32.xlu1 %v1028_v54  ;;  %vm1354_vm4 = vcmp.ge.f32.partialorder %v1316_v35, 0.0  ;;  %v1392_v58 = vmul.f32 0.01, %v1316_v35  ;;  %v1275_v63 = vmul.f32 %v4130_v5, %v1233_v10 }
 0x30f   :  { %v3324_v47 = vpop.eup %3323  ;;  %v1161_v7 = vadd.f32 1e-05, %v1123_v42  ;;  %v954_v28 = vsub.f32 %v4037_v34, %v916_v44  ;;  %v1029_v25 = vmul.f32 %v4223_v17, %v4223_v17 }
 0x310   :  { %v1062_v39 = vpop.xlane.xlu1 %1061  ;;  %v876_v19 = vpop.xlane.xlu0 %875  ;;  %v1430_v23 = vsel %vm1354_vm4, %v1316_v35, %v1392_v58  ;;  %v1234_v45 = vmul.f32 %v3324_v47, %v3990_v20  ;;  %v1317_v51 = vadd.f32 %v4138_v49, %v1275_v63 }
 0x311   :  { %3329 = vrsqrt.f32 %v1161_v7  ;;  %v1124_v59 = vmul.f32 0.03125, %v1062_v39  ;;  %v917_v6 = vmul.f32 0.03125, %v876_v19  ;;  %1099 = vadd.xlane.f32.xlu0 %v1029_v25  ;;  %v1466_v4 = vpack.c.bf16 %v1430_v23, %v1429_v48 }
 0x312   :  { %v4233_v26 = vmul.f32 %v3892_v15, %v954_v28  ;;  %v1276_v34 = vmul.f32 %v4130_v5, %v1234_v45  ;;  %vm1355_vm5 = vcmp.ge.f32.partialorder %v1317_v51, 0.0  ;;  %v1393_v54 = vmul.f32 0.01, %v1317_v51 }
 0x313   :  { %v3326_v30 = vpop.eup %3325  ;;  %v1162_v22 = vadd.f32 1e-05, %v1124_v59  ;;  %v955_v8 = vsub.f32 %v4047_v18, %v917_v6  ;;  %3089 = vmatmul.mubr.bf16.gmra.mrb[88].mxu0 %v1466_v4 }
 0x314   :  { %v1064_v52 = vpop.xlane.xlu0 %1063  ;;  %v878_v20 = vpop.xlane.xlu1 %877  ;;  %v1030_v57 = vmul.f32 %v4233_v26, %v4233_v26  ;;  %3092 = vmatprep.mubr.msk.bf16.mxu0 %vm3458_vm1, %v3457_v0  ;;  %v1318_v14 = vadd.f32 %v4138_v49, %v1276_v34  ;;  %v1235_v35 = vmul.f32 %v3326_v30, %v4010_v41  ;;  %v1431_v25 = vsel %vm1355_vm5, %v1317_v51, %v1393_v54 }
 0x315   :  { %3331 = vrsqrt.f32 %v1162_v22  ;;  %v1125_v31 = vmul.f32 0.03125, %v1064_v52  ;;  %v918_v10 = vmul.f32 0.03125, %v878_v20  ;;  %v4244_v18 = vmul.f32 %v3892_v15, %v955_v8 }
 0x316   :  { %1101 = vadd.xlane.f32.xlu1 %v1030_v57  ;;  %vm1356_vm6 = vcmp.ge.f32.partialorder %v1318_v14, 0.0  ;;  %v1394_v42 = vmul.f32 0.01, %v1318_v14  ;;  %v1277_v44 = vmul.f32 %v4130_v5, %v1235_v35 }
 0x317   :  { %v3328_v58 = vpop.eup %3327  ;;  %v1163_v63 = vadd.f32 1e-05, %v1125_v31  ;;  %v956_v47 = vsub.f32 %v4059_v21, %v918_v10  ;;  %v1031_v7 = vmul.f32 %v4244_v18, %v4244_v18 }
 0x318   :  { %v1066_v28 = vpop.xlane.xlu1 %1065  ;;  %v880_v41 = vpop.xlane.xlu0 %879  ;;  %v1432_v39 = vsel %vm1356_vm6, %v1318_v14, %v1394_v42  ;;  %v1236_v19 = vmul.f32 %v3328_v58, %v4019_v24  ;;  %v1319_v48 = vadd.f32 %v4138_v49, %v1277_v44 }
 0x319   :  { %3333 = vrsqrt.f32 %v1163_v63  ;;  %v1126_v23 = vmul.f32 0.03125, %v1066_v28  ;;  %v919_v45 = vmul.f32 0.03125, %v880_v41  ;;  %1103 = vadd.xlane.f32.xlu0 %v1031_v7  ;;  %v1467_v59 = vpack.c.bf16 %v1432_v39, %v1431_v25 }
 0x31a   :  { %v4254_v6 = vmul.f32 %v3892_v15, %v956_v47  ;;  %v1278_v21 = vmul.f32 %v4130_v5, %v1236_v19  ;;  %vm1357_vm7 = vcmp.ge.f32.partialorder %v1319_v48, 0.0  ;;  %v1395_v52 = vmul.f32 0.01, %v1319_v48 }
 0x31b   :  { %v3330_v4 = vpop.eup %3329  ;;  %v1164_v34 = vadd.f32 1e-05, %v1126_v23  ;;  %v957_v30 = vsub.f32 %v4069_v43, %v919_v45  ;;  %3093 = vmatmul.mubr.bf16.gmra.mrb[92].mxu0 %v1467_v59 }
 0x31c   :  { %v1068_v51 = vpop.xlane.xlu0 %1067  ;;  %v882_v24 = vpop.xlane.xlu1 %881  ;;  %v1032_v22 = vmul.f32 %v4254_v6, %v4254_v6  ;;  %3096 = vmatprep.mubr.msk.bf16.mxu0 %vm3458_vm1, %v3457_v0  ;;  %v1320_v8 = vadd.f32 %v4138_v49, %v1278_v21  ;;  %v1237_v20 = vmul.f32 %v3330_v4, %v4033_v13  ;;  %v1433_v13 = vsel %vm1357_vm7, %v1319_v48, %v1395_v52 }
 0x31d   :  { %3335 = vrsqrt.f32 %v1164_v34  ;;  %v1127_v57 = vmul.f32 0.03125, %v1068_v51  ;;  %v920_v14 = vmul.f32 0.03125, %v882_v24  ;;  %v4265_v43 = vmul.f32 %v3892_v15, %v957_v30 }
 0x31e   :  { %1105 = vadd.xlane.f32.xlu1 %v1032_v22  ;;  %vm1358_vm8 = vcmp.ge.f32.partialorder %v1320_v8, 0.0  ;;  %v1396_v54 = vmul.f32 0.01, %v1320_v8  ;;  %v1279_v35 = vmul.f32 %v4130_v5, %v1237_v20 }
 0x31f   :  { %v3332_v31 = vpop.eup %3331  ;;  %v1165_v10 = vadd.f32 1e-05, %v1127_v57  ;;  %v958_v42 = vsub.f32 %v4078_v1, %v920_v14  ;;  %v1033_v44 = vmul.f32 %v4265_v43, %v4265_v43 }
 0x320   :  { %v1070_v58 = vpop.xlane.xlu1 %1069  ;;  %v1434_v63 = vsel %vm1358_vm8, %v1320_v8, %v1396_v54  ;;  %v1238_v47 = vmul.f32 %v3332_v31, %v4042_v33  ;;  %v1321_v7 = vadd.f32 %v4138_v49, %v1279_v35 }
 0x321   :  { %3337 = vrsqrt.f32 %v1165_v10  ;;  %v1128_v28 = vmul.f32 0.03125, %v1070_v58  ;;  %1107 = vadd.xlane.f32.xlu0 %v1033_v44  ;;  %v1468_v41 = vpack.c.bf16 %v1434_v63, %v1433_v13  ;;  %v4275_v25 = vmul.f32 %v3892_v15, %v958_v42 }
 0x322   :  { %v1280_v1 = vmul.f32 %v4130_v5, %v1238_v47  ;;  %v1397_v45 = vmul.f32 0.01, %v1321_v7  ;;  %vm1359_vm9 = vcmp.ge.f32.partialorder %v1321_v7, 0.0 }
 0x323   :  { %v3334_v39 = vpop.eup %3333  ;;  %v1166_v19 = vadd.f32 1e-05, %v1128_v28  ;;  %3097 = vmatmul.mubr.bf16.gmra.mrb[96].mxu0 %v1468_v41  ;;  %v1034_v48 = vmul.f32 %v4275_v25, %v4275_v25 }
 0x324   :  { %v1072_v23 = vpop.xlane.xlu0 %1071  ;;  %3100 = vmatprep.mubr.msk.bf16.mxu0 %vm3458_vm1, %v3457_v0  ;;  %v1322_v33 = vadd.f32 %v4138_v49, %v1280_v1  ;;  %v1239_v59 = vmul.f32 %v3334_v39, %v4055_v37  ;;  %v1435_v8 = vsel %vm1359_vm9, %v1321_v7, %v1397_v45 }
 0x325   :  { %3339 = vrsqrt.f32 %v1166_v19  ;;  %v1129_v21 = vmul.f32 0.03125, %v1072_v23  ;;  %1109 = vadd.xlane.f32.xlu1 %v1034_v48 }
 0x326   :  { %v1074_v4 = vpop.xlane.xlu1 %1073  ;;  %vm1360_vm10 = vcmp.ge.f32.partialorder %v1322_v33, 0.0  ;;  %v1398_v34 = vmul.f32 0.01, %v1322_v33  ;;  %v1281_v30 = vmul.f32 %v4130_v5, %v1239_v59 }
 0x327   :  { %v3336_v51 = vpop.eup %3335  ;;  %v1167_v24 = vadd.f32 1e-05, %v1129_v21  ;;  %v1130_v22 = vmul.f32 0.03125, %v1074_v4 }
 0x328   :  { %v1436_v52 = vsel %vm1360_vm10, %v1322_v33, %v1398_v34  ;;  %v1240_v20 = vmul.f32 %v3336_v51, %v4064_v40  ;;  %v1323_v57 = vadd.f32 %v4138_v49, %v1281_v30 }
 0x329   :  { %3341 = vrsqrt.f32 %v1167_v24  ;;  %v1168_v37 = vadd.f32 1e-05, %v1130_v22  ;;  %v1469_v14 = vpack.c.bf16 %v1436_v52, %v1435_v8 }
 0x32a   :  { %v1282_v54 = vmul.f32 %v4130_v5, %v1240_v20  ;;  %v1399_v44 = vmul.f32 0.01, %v1323_v57  ;;  %vm1361_vm11 = vcmp.ge.f32.partialorder %v1323_v57, 0.0 }
 0x32b   :  { %v3338_v35 = vpop.eup %3337  ;;  %3343 = vrsqrt.f32 %v1168_v37  ;;  %3101 = vmatmul.mubr.bf16.gmra.mrb[100].mxu0 %v1469_v14 }
 0x32c   :  { %v1241_v31 = vmul.f32 %v3338_v35, %v4081_v27  ;;  %v1076_v10 = vpop.xlane.xlu0 %1075  ;;  %3104 = vmatprep.mubr.msk.bf16.mxu0 %vm3458_vm1, %v3457_v0  ;;  %v1324_v42 = vadd.f32 %v4138_v49, %v1282_v54  ;;  %v1437_v27 = vsel %vm1361_vm11, %v1323_v57, %v1399_v44 }
 0x32d   :  { %v1131_v40 = vmul.f32 0.03125, %v1076_v10 }
 0x32e   :  { %v1078_v58 = vpop.xlane.xlu1 %1077  ;;  %vm1362_vm12 = vcmp.ge.f32.partialorder %v1324_v42, 0.0  ;;  %v1400_v13 = vmul.f32 0.01, %v1324_v42  ;;  %v1283_v63 = vmul.f32 %v4130_v5, %v1241_v31 }
 0x32f   :  { %v3340_v47 = vpop.eup %3339  ;;  %v1169_v7 = vadd.f32 1e-05, %v1131_v40  ;;  %v1132_v28 = vmul.f32 0.03125, %v1078_v58 }
 0x330   :  { %v1242_v41 = vmul.f32 %v3340_v47, %v4086_v46  ;;  %v1438_v1 = vsel %vm1362_vm12, %v1324_v42, %v1400_v13  ;;  %v1325_v39 = vadd.f32 %v4138_v49, %v1283_v63 }
 0x331   :  { %3345 = vrsqrt.f32 %v1169_v7  ;;  %v1170_v19 = vadd.f32 1e-05, %v1132_v28  ;;  %v1470_v48 = vpack.c.bf16 %v1438_v1, %v1437_v27 }
 0x332   :  { %v1284_v23 = vmul.f32 %v4130_v5, %v1242_v41  ;;  %v1401_v46 = vmul.f32 0.01, %v1325_v39  ;;  %vm1363_vm13 = vcmp.ge.f32.partialorder %v1325_v39, 0.0 }
 0x333   :  { %v3342_v33 = vpop.eup %3341  ;;  %3347 = vrsqrt.f32 %v1170_v19  ;;  %3105 = vmatmul.mubr.bf16.gmra.mrb[104].mxu0 %v1470_v48 }
 0x334   :  { %v1243_v45 = vmul.f32 %v3342_v33, %v4094_v36  ;;  %3108 = vmatprep.mubr.msk.bf16.mxu0 %vm3458_vm1, %v3457_v0  ;;  %v1326_v59 = vadd.f32 %v4138_v49, %v1284_v23  ;;  %v1439_v51 = vsel %vm1363_vm13, %v1325_v39, %v1401_v46 }
 0x335   :  { %v3344_v21 = vpop.eup %3343 }
 0x336   :  { %v1244_v4 = vmul.f32 %v3344_v21, %v4099_v50  ;;  %vm1364_vm14 = vcmp.ge.f32.partialorder %v1326_v59, 0.0  ;;  %v1402_v34 = vmul.f32 0.01, %v1326_v59  ;;  %v1285_v30 = vmul.f32 %v4130_v5, %v1243_v45 }
 0x338   :  { %v1440_v24 = vsel %vm1364_vm14, %v1326_v59, %v1402_v34  ;;  %v1286_v22 = vmul.f32 %v4130_v5, %v1244_v4  ;;  %v1327_v36 = vadd.f32 %v4138_v49, %v1285_v30 }
 0x339   :  { %v1471_v8 = vpack.c.bf16 %v1440_v24, %v1439_v51 }
 0x33a   :  { %v1328_v52 = vadd.f32 %v4138_v49, %v1286_v22  ;;  %v1403_v50 = vmul.f32 0.01, %v1327_v36  ;;  %vm1365_vm0 = vcmp.ge.f32.partialorder %v1327_v36, 0.0 }
 0x33b   :  { %v3346_v20 = vpop.eup %3345  ;;  %3109 = vmatmul.mubr.bf16.gmra.mrb[108].mxu0 %v1471_v8 }
 0x33c   :  { %v1245_v57 = vmul.f32 %v3346_v20, %v4106_v29  ;;  %3112 = vmatprep.mubr.msk.bf16.mxu0 %vm3458_vm1, %v3457_v0  ;;  %vm1366_vm15 = vcmp.ge.f32.partialorder %v1328_v52, 0.0  ;;  %v1404_v37 = vmul.f32 0.01, %v1328_v52  ;;  %v1441_v10 = vsel %vm1365_vm0, %v1327_v36, %v1403_v50 }
 0x33d   :  { %v3348_v14 = vpop.eup %3347 }
 0x33e   :  { %v1246_v54 = vmul.f32 %v3348_v14, %v4111_v60  ;;  %v1442_v35 = vsel %vm1366_vm15, %v1328_v52, %v1404_v37  ;;  %v1287_v31 = vmul.f32 %v4130_v5, %v1245_v57 }
 0x33f   :  { %v1472_v40 = vpack.c.bf16 %v1442_v35, %v1441_v10 }
 0x340   :  { %v1288_v42 = vmul.f32 %v4130_v5, %v1246_v54  ;;  %v1329_v44 = vadd.f32 %v4138_v49, %v1287_v31 }
 0x342   :  { %v1330_v29 = vadd.f32 %v4138_v49, %v1288_v42  ;;  %v1405_v58 = vmul.f32 0.01, %v1329_v44  ;;  %vm1367_vm3 = vcmp.ge.f32.partialorder %v1329_v44, 0.0 }
 0x343   :  { %3113 = vmatmul.mubr.bf16.gmra.mrb[112].mxu0 %v1472_v40 }
 0x344   :  { %3116 = vmatprep.mubr.msk.bf16.mxu0 %vm3458_vm1, %v3457_v0  ;;  %vm1368_vm2 = vcmp.ge.f32.partialorder %v1330_v29, 0.0  ;;  %v1406_v13 = vmul.f32 0.01, %v1330_v29  ;;  %v1443_v63 = vsel %vm1367_vm3, %v1329_v44, %v1405_v58 }
 0x346   :  { %v1444_v60 = vsel %vm1368_vm2, %v1330_v29, %v1406_v13 }
 0x347   :  { %v1473_v47 = vpack.c.bf16 %v1444_v60, %v1443_v63 }
 0x34b   :  { %3117 = vmatmul.mubr.bf16.gmra.mrb[116].mxu0 %v1473_v47 }
 0x34c   :  { %3120 = vmatprep.mubr.msk.bf16.mxu0 %vm3458_vm1, %v3457_v0 }
 0x376   :  { %v1080_v7 = vpop.xlane.xlu0 %1079 }
 0x377   :  { %v1133_v28 = vmul.f32 0.03125, %v1080_v7 }
 0x379   :  { %v1171_v41 = vadd.f32 1e-05, %v1133_v28 }
 0x37a   :  { %v1082_v27 = vpop.xlane.xlu1 %1081 }
 0x37b   :  { %3349 = vrsqrt.f32 %v1171_v41  ;;  %v1134_v1 = vmul.f32 0.03125, %v1082_v27 }
 0x37d   :  { %v1172_v39 = vadd.f32 1e-05, %v1134_v1 }
 0x37e   :  { %v1084_v19 = vpop.xlane.xlu0 %1083 }
 0x37f   :  { %3351 = vrsqrt.f32 %v1172_v39  ;;  %v1135_v48 = vmul.f32 0.03125, %v1084_v19 }
 0x381   :  { %v1173_v23 = vadd.f32 1e-05, %v1135_v48 }
 0x382   :  { %v1086_v33 = vpop.xlane.xlu1 %1085 }
 0x383   :  { %3353 = vrsqrt.f32 %v1173_v23  ;;  %v1136_v45 = vmul.f32 0.03125, %v1086_v33 }
 0x385   :  { %v3350_v59 = vpop.eup %3349  ;;  %v1174_v46 = vadd.f32 1e-05, %v1136_v45 }
 0x386   :  { %v1247_v21 = vmul.f32 %v3350_v59, %v4117_v11  ;;  %v1088_v4 = vpop.xlane.xlu0 %1087 }
 0x387   :  { %3355 = vrsqrt.f32 %v1174_v46  ;;  %v1137_v34 = vmul.f32 0.03125, %v1088_v4 }
 0x388   :  { %v1289_v30 = vmul.f32 %v4130_v5, %v1247_v21 }
 0x389   :  { %v3352_v51 = vpop.eup %3351  ;;  %v1175_v24 = vadd.f32 1e-05, %v1137_v34 }
 0x38a   :  { %v1248_v22 = vmul.f32 %v3352_v51, %v4125_v3  ;;  %v1331_v36 = vadd.f32 %v4138_v49, %v1289_v30 }
 0x38b   :  { %3357 = vrsqrt.f32 %v1175_v24  ;;  %v1090_v8 = vpop.xlane.xlu1 %1089 }
 0x38c   :  { %v1138_v52 = vmul.f32 0.03125, %v1090_v8  ;;  %v1290_v20 = vmul.f32 %v4130_v5, %v1248_v22  ;;  %v1407_v54 = vmul.f32 0.01, %v1331_v36  ;;  %vm1369_vm4 = vcmp.ge.f32.partialorder %v1331_v36, 0.0 }
 0x38d   :  { %v3354_v57 = vpop.eup %3353 }
 0x38e   :  { %v1249_v50 = vmul.f32 %v3354_v57, %v4142_v32  ;;  %v1176_v11 = vadd.f32 1e-05, %v1138_v52  ;;  %v1092_v37 = vpop.xlane.xlu0 %1091  ;;  %v1332_v14 = vadd.f32 %v4138_v49, %v1290_v20  ;;  %v1445_v40 = vsel %vm1369_vm4, %v1331_v36, %v1407_v54 }
 0x38f   :  { %v1139_v35 = vmul.f32 0.03125, %v1092_v37 }
 0x390   :  { %3359 = vrsqrt.f32 %v1176_v11  ;;  %vm1370_vm5 = vcmp.ge.f32.partialorder %v1332_v14, 0.0  ;;  %v1408_v3 = vmul.f32 0.01, %v1332_v14  ;;  %v1291_v31 = vmul.f32 %v4130_v5, %v1249_v50 }
 0x391   :  { %v3356_v10 = vpop.eup %3355  ;;  %v1177_v42 = vadd.f32 1e-05, %v1139_v35 }
 0x392   :  { %v1250_v44 = vmul.f32 %v3356_v10, %v4151_v9  ;;  %v1446_v29 = vsel %vm1370_vm5, %v1332_v14, %v1408_v3  ;;  %v1333_v32 = vadd.f32 %v4138_v49, %v1291_v31 }
 0x393   :  { %3361 = vrsqrt.f32 %v1177_v42  ;;  %v1094_v58 = vpop.xlane.xlu1 %1093  ;;  %v1474_v13 = vpack.c.bf16 %v1446_v29, %v1445_v40 }
 0x394   :  { %v1140_v60 = vmul.f32 0.03125, %v1094_v58  ;;  %v1292_v63 = vmul.f32 %v4130_v5, %v1250_v44  ;;  %v1409_v27 = vmul.f32 0.01, %v1333_v32  ;;  %vm1371_vm6 = vcmp.ge.f32.partialorder %v1333_v32, 0.0 }
 0x395   :  { %v3358_v47 = vpop.eup %3357  ;;  %3121 = vmatmul.mubr.bf16.gmra.mrb[120].mxu0 %v1474_v13 }
 0x396   :  { %v1251_v7 = vmul.f32 %v3358_v47, %v4160_v61  ;;  %v1178_v28 = vadd.f32 1e-05, %v1140_v60  ;;  %v1096_v41 = vpop.xlane.xlu0 %1095  ;;  %3124 = vmatprep.mubr.msk.bf16.mxu0 %vm3458_vm1, %v3457_v0  ;;  %v1334_v9 = vadd.f32 %v4138_v49, %v1292_v63  ;;  %v1447_v33 = vsel %vm1371_vm6, %v1333_v32, %v1409_v27 }
 0x397   :  { %v1141_v1 = vmul.f32 0.03125, %v1096_v41 }
 0x398   :  { %3363 = vrsqrt.f32 %v1178_v28  ;;  %vm1372_vm7 = vcmp.ge.f32.partialorder %v1334_v9, 0.0  ;;  %v1410_v39 = vmul.f32 0.01, %v1334_v9  ;;  %v1293_v19 = vmul.f32 %v4130_v5, %v1251_v7 }
 0x399   :  { %v1179_v48 = vadd.f32 1e-05, %v1141_v1 }
 0x39a   :  { %v3360_v23 = vpop.eup %3359  ;;  %v1448_v45 = vsel %vm1372_vm7, %v1334_v9, %v1410_v39  ;;  %v1335_v61 = vadd.f32 %v4138_v49, %v1293_v19 }
 0x39b   :  { %v1252_v59 = vmul.f32 %v3360_v23, %v4170_v12  ;;  %3365 = vrsqrt.f32 %v1179_v48  ;;  %v1098_v46 = vpop.xlane.xlu1 %1097  ;;  %v1475_v21 = vpack.c.bf16 %v1448_v45, %v1447_v33 }
 0x39c   :  { %v1142_v4 = vmul.f32 0.03125, %v1098_v46  ;;  %v1411_v36 = vmul.f32 0.01, %v1335_v61  ;;  %vm1373_vm8 = vcmp.ge.f32.partialorder %v1335_v61, 0.0 }
 0x39d   :  { %v3362_v34 = vpop.eup %3361  ;;  %3125 = vmatmul.mubr.bf16.gmra.mrb[124].mxu0 %v1475_v21  ;;  %v1294_v30 = vmul.f32 %v4130_v5, %v1252_v59 }
 0x39e   :  { %v1253_v51 = vmul.f32 %v3362_v34, %v4181_v62  ;;  %v1180_v24 = vadd.f32 1e-05, %v1142_v4  ;;  %v1100_v22 = vpop.xlane.xlu0 %1099  ;;  %3128 = vmatprep.mubr.msk.bf16.mxu0 %vm3458_vm1, %v3457_v0  ;;  %v1449_v11 = vsel %vm1373_vm8, %v1335_v61, %v1411_v36 }
 0x39f   :  { %v1143_v8 = vmul.f32 0.03125, %v1100_v22  ;;  %v1336_v52 = vadd.f32 %v4138_v49, %v1294_v30 }
 0x3a0   :  { %3367 = vrsqrt.f32 %v1180_v24  ;;  %v1295_v12 = vmul.f32 %v4130_v5, %v1253_v51 }
 0x3a1   :  { %v1181_v20 = vadd.f32 1e-05, %v1143_v8  ;;  %vm1374_vm9 = vcmp.ge.f32.partialorder %v1336_v52, 0.0  ;;  %v1412_v57 = vmul.f32 0.01, %v1336_v52 }
 0x3a2   :  { %v3364_v50 = vpop.eup %3363  ;;  %v1337_v54 = vadd.f32 %v4138_v49, %v1295_v12 }
 0x3a3   :  { %v1254_v62 = vmul.f32 %v3364_v50, %v4191_v2  ;;  %3369 = vrsqrt.f32 %v1181_v20  ;;  %v1102_v37 = vpop.xlane.xlu1 %1101  ;;  %v1450_v14 = vsel %vm1374_vm9, %v1336_v52, %v1412_v57 }
 0x3a4   :  { %v1144_v35 = vmul.f32 0.03125, %v1102_v37  ;;  %v1476_v3 = vpack.c.bf16 %v1450_v14, %v1449_v11  ;;  %v1413_v32 = vmul.f32 0.01, %v1337_v54  ;;  %vm1375_vm10 = vcmp.ge.f32.partialorder %v1337_v54, 0.0 }
 0x3a5   :  { %v3366_v31 = vpop.eup %3365  ;;  %v1296_v10 = vmul.f32 %v4130_v5, %v1254_v62 }
 0x3a6   :  { %v1255_v42 = vmul.f32 %v3366_v31, %v4202_v38  ;;  %v1182_v44 = vadd.f32 1e-05, %v1144_v35  ;;  %3129 = vmatmul.mubr.bf16.gmra.mrb[128].mxu0 %v1476_v3  ;;  %v1104_v40 = vpop.xlane.xlu0 %1103  ;;  %v1451_v28 = vsel %vm1375_vm10, %v1337_v54, %v1413_v32 }
 0x3a7   :  { %v1145_v29 = vmul.f32 0.03125, %v1104_v40  ;;  %3132 = vmatprep.mubr.msk.bf16.mxu0 %vm3458_vm1, %v3457_v0  ;;  %v1338_v2 = vadd.f32 %v4138_v49, %v1296_v10 }
 0x3a8   :  { %3371 = vrsqrt.f32 %v1182_v44  ;;  %v1297_v58 = vmul.f32 %v4130_v5, %v1255_v42 }
 0x3a9   :  { %v1183_v13 = vadd.f32 1e-05, %v1145_v29  ;;  %vm1376_vm11 = vcmp.ge.f32.partialorder %v1338_v2, 0.0  ;;  %v1414_v60 = vmul.f32 0.01, %v1338_v2 }
 0x3aa   :  { %v3368_v63 = vpop.eup %3367  ;;  %v1339_v38 = vadd.f32 %v4138_v49, %v1297_v58 }
 0x3ab   :  { %v1256_v47 = vmul.f32 %v3368_v63, %v4212_v16  ;;  %3373 = vrsqrt.f32 %v1183_v13  ;;  %v1106_v7 = vpop.xlane.xlu1 %1105  ;;  %v1452_v41 = vsel %vm1376_vm11, %v1338_v2, %v1414_v60 }
 0x3ac   :  { %v1146_v9 = vmul.f32 0.03125, %v1106_v7  ;;  %v1477_v27 = vpack.c.bf16 %v1452_v41, %v1451_v28  ;;  %v1415_v33 = vmul.f32 0.01, %v1339_v38  ;;  %vm1377_vm12 = vcmp.ge.f32.partialorder %v1339_v38, 0.0 }
 0x3ad   :  { %v3370_v1 = vpop.eup %3369  ;;  %v1298_v39 = vmul.f32 %v4130_v5, %v1256_v47 }
 0x3ae   :  { %v1257_v19 = vmul.f32 %v3370_v1, %v4223_v17  ;;  %v1184_v48 = vadd.f32 1e-05, %v1146_v9  ;;  %3133 = vmatmul.mubr.bf16.gmra.mrb[132].mxu0 %v1477_v27  ;;  %v1108_v23 = vpop.xlane.xlu0 %1107  ;;  %v1453_v17 = vsel %vm1377_vm12, %v1339_v38, %v1415_v33  ;;  %v4388_v9 = vld [vmem:[%s5135_s4 + $0x4] sm:$0x7] }
 0x3af   :  { %v1147_v45 = vmul.f32 0.03125, %v1108_v23  ;;  %3136 = vmatprep.mubr.msk.bf16.mxu0 %vm3458_vm1, %v3457_v0  ;;  %v1340_v16 = vadd.f32 %v4138_v49, %v1298_v39  ;;  %v4393_v27 = vrot.slane %v4388_v9, %v572_v56 }
 0x3b0   :  { %3375 = vrsqrt.f32 %v1184_v48  ;;  %v1299_v61 = vmul.f32 %v4130_v5, %v1257_v19 }
 0x3b1   :  { %v1185_v59 = vadd.f32 1e-05, %v1147_v45  ;;  %vm1378_vm13 = vcmp.ge.f32.partialorder %v1340_v16, 0.0  ;;  %v1416_v46 = vmul.f32 0.01, %v1340_v16 }
 0x3b2   :  { %v3372_v21 = vpop.eup %3371  ;;  %v1110_v4 = vpop.xlane.xlu1 %1109  ;;  %v1341_v34 = vadd.f32 %v4138_v49, %v1299_v61 }
 0x3b3   :  { %v1258_v30 = vmul.f32 %v3372_v21, %v4233_v26  ;;  %3377 = vrsqrt.f32 %v1185_v59  ;;  %v1148_v51 = vmul.f32 0.03125, %v1110_v4  ;;  %v1454_v24 = vsel %vm1378_vm13, %v1340_v16, %v1416_v46 }
 0x3b4   :  { %v1478_v22 = vpack.c.bf16 %v1454_v24, %v1453_v17  ;;  %v1417_v57 = vmul.f32 0.01, %v1341_v34  ;;  %vm1379_vm14 = vcmp.ge.f32.partialorder %v1341_v34, 0.0 }
 0x3b5   :  { %v3374_v36 = vpop.eup %3373  ;;  %v1186_v8 = vadd.f32 1e-05, %v1148_v51  ;;  %v1300_v52 = vmul.f32 %v4130_v5, %v1258_v30 }
 0x3b6   :  { %v1259_v12 = vmul.f32 %v3374_v36, %v4244_v18  ;;  %3137 = vmatmul.mubr.bf16.gmra.mrb[136].mxu0 %v1478_v22  ;;  %v1455_v37 = vsel %vm1379_vm14, %v1341_v34, %v1417_v57 }
 0x3b7   :  { %3379 = vrsqrt.f32 %v1186_v8  ;;  %3140 = vmatprep.mubr.msk.bf16.mxu0 %vm3458_vm1, %v3457_v0  ;;  %v1342_v20 = vadd.f32 %v4138_v49, %v1300_v52 }
 0x3b8   :  { %v1301_v26 = vmul.f32 %v4130_v5, %v1259_v12 }
 0x3b9   :  { %vm1380_vm15 = vcmp.ge.f32.partialorder %v1342_v20, 0.0  ;;  %v1418_v50 = vmul.f32 0.01, %v1342_v20 }
 0x3ba   :  { %v3376_v11 = vpop.eup %3375  ;;  %v1343_v18 = vadd.f32 %v4138_v49, %v1301_v26 }
 0x3bb   :  { %v1260_v62 = vmul.f32 %v3376_v11, %v4254_v6  ;;  %v1456_v14 = vsel %vm1380_vm15, %v1342_v20, %v1418_v50 }
 0x3bc   :  { %v1479_v54 = vpack.c.bf16 %v1456_v14, %v1455_v37  ;;  %v1419_v42 = vmul.f32 0.01, %v1343_v18  ;;  %vm1381_vm0 = vcmp.ge.f32.partialorder %v1343_v18, 0.0 }
 0x3bd   :  { %v3378_v35 = vpop.eup %3377  ;;  %v1302_v3 = vmul.f32 %v4130_v5, %v1260_v62 }
 0x3be   :  { %v1261_v31 = vmul.f32 %v3378_v35, %v4265_v43  ;;  %3141 = vmatmul.mubr.bf16.gmra.mrb[140].mxu0 %v1479_v54  ;;  %v1457_v32 = vsel %vm1381_vm0, %v1343_v18, %v1419_v42 }
 0x3bf   :  { %3144 = vmatprep.mubr.msk.bf16.mxu0 %vm3458_vm1, %v3457_v0  ;;  %v1344_v10 = vadd.f32 %v4138_v49, %v1302_v3 }
 0x3c0   :  { %v1303_v6 = vmul.f32 %v4130_v5, %v1261_v31 }
 0x3c1   :  { %v3380_v44 = vpop.eup %3379  ;;  %vm1382_vm2 = vcmp.ge.f32.partialorder %v1344_v10, 0.0  ;;  %v1420_v40 = vmul.f32 0.01, %v1344_v10 }
 0x3c2   :  { %v1262_v29 = vmul.f32 %v3380_v44, %v4275_v25  ;;  %v1345_v2 = vadd.f32 %v4138_v49, %v1303_v6 }
 0x3c3   :  { %v1458_v58 = vsel %vm1382_vm2, %v1344_v10, %v1420_v40 }
 0x3c4   :  { %v1480_v43 = vpack.c.bf16 %v1458_v58, %v1457_v32  ;;  %v1304_v13 = vmul.f32 %v4130_v5, %v1262_v29  ;;  %v1421_v63 = vmul.f32 0.01, %v1345_v2  ;;  %vm1383_vm3 = vcmp.ge.f32.partialorder %v1345_v2, 0.0 }
 0x3c6   :  { %3145 = vmatmul.mubr.bf16.gmra.mrb[144].mxu0 %v1480_v43  ;;  %v1346_v60 = vadd.f32 %v4138_v49, %v1304_v13  ;;  %v1459_v47 = vsel %vm1383_vm3, %v1345_v2, %v1421_v63 }
 0x3c7   :  { %3148 = vmatprep.mubr.msk.bf16.mxu0 %vm3458_vm1, %v3457_v0 }
 0x3c8   :  { %vm1384_vm4 = vcmp.ge.f32.partialorder %v1346_v60, 0.0  ;;  %v1422_v38 = vmul.f32 0.01, %v1346_v60 }
 0x3ca   :  { %v1460_v7 = vsel %vm1384_vm4, %v1346_v60, %v1422_v38 }
 0x3cb   :  { %v1481_v25 = vpack.c.bf16 %v1460_v7, %v1459_v47 }
 0x3ce   :  { %3149 = vmatmul.mubr.bf16.gmra.mrb[148].mxu0 %v1481_v25  ;;  %v4379_v28 = vpop.f32.mrb[76].mxu0 }
 0x3cf   :  { %v3078_v41 = vpop.f32.mrb[77].mxu0  ;;  %3168 = vmatprep.mubr.msk.bf16.mxu0 %vm3458_vm1, %v3457_v0 }
 0x3d0   :  { %v4383_v5 = vpop.f32.mrb[78].mxu0 }
 0x3d1   :  { %v3079_v49 = vpop.f32.mrb[79].mxu0 }
 0x3d6   :  { %v1593_v1 = vpop.f32.mrb[80].mxu0 }
 0x3d7   :  { %v4396_v39 = vadd.f32 %v1593_v1, %v4393_v27  ;;  %v3082_v19 = vpop.f32.mrb[81].mxu0 }
 0x3d8   :  { %v1596_v48 = vpop.f32.mrb[82].mxu0 }
 0x3d9   :  { %v4399_v23 = vadd.f32 %v1596_v48, %v4393_v27  ;;  %1740 = vadd.xlane.f32.xlu0 %v4396_v39  ;;  %v3083_v33 = vpop.f32.mrb[83].mxu0 }
 0x3db   :  { %1742 = vadd.xlane.f32.xlu1 %v4399_v23 }
 0x3de   :  { %v1601_v45 = vpop.f32.mrb[84].mxu0 }
 0x3df   :  { %v4404_v16 = vadd.f32 %v1601_v45, %v4393_v27  ;;  %v3086_v56 = vpop.f32.mrb[85].mxu0  ;;  %v3297_v45 = vld [vmem:[%s5136_s5] sm:$0xff]  }
 0x3e0   :  { %v1604_v61 = vpop.f32.mrb[86].mxu0  ;;  %3252 = vmatpush3.bf16.msra.mxu1 %v3297_v45  ;;  %v3298_v56 = vld [vmem:[%s5136_s5 + $0x8] sm:$0xff]   ;;  %3153 = vmatpush3.bf16.msra.mxu0 %v3297_v45 }
 0x3e1   :  { %v4407_v59 = vadd.f32 %v1604_v61, %v4393_v27  ;;  %1744 = vadd.xlane.f32.xlu0 %v4404_v16  ;;  %v3087_v46 = vpop.f32.mrb[87].mxu0  ;;  %3245 = vmatprep.subr.bf16.mxu1 %v3457_v0  ;;  %v3299_v61 = vld [vmem:[%s5136_s5 + $0x10] sm:$0xff]  }
 0x3e2   :  { %3154 = vmatprep.subr.bf16.mxu0 %v3457_v0 }
 0x3e3   :  { %1746 = vadd.xlane.f32.xlu1 %v4407_v59 }
 0x3e4   :  { %3253 = vmatpush3.bf16.msra.mxu1 %v3298_v56  ;;  %3155 = vmatpush3.bf16.msra.mxu0 %v3298_v56 }
 0x3e5   :  { %3246 = vmatprep.subr.bf16.mxu1 %v3457_v0  ;;  %3156 = vmatprep.subr.bf16.mxu0 %v3457_v0 }
 0x3e6   :  { %v1609_v21 = vpop.f32.mrb[88].mxu0 }
 0x3e7   :  { %v4412_v4 = vadd.f32 %v1609_v21, %v4393_v27  ;;  %v3090_v17 = vpop.f32.mrb[89].mxu0 }
 0x3e8   :  { %v1612_v34 = vpop.f32.mrb[90].mxu0  ;;  %3254 = vmatpush3.bf16.msra.mxu1 %v3299_v61  ;;  %3157 = vmatpush3.bf16.msra.mxu0 %v3299_v61 }
 0x3e9   :  { %v4415_v30 = vadd.f32 %v1612_v34, %v4393_v27  ;;  %1748 = vadd.xlane.f32.xlu0 %v4412_v4  ;;  %v3091_v51 = vpop.f32.mrb[91].mxu0  ;;  %3247 = vmatprep.subr.bf16.mxu1 %v3457_v0 }
 0x3ea   :  { %3158 = vmatprep.subr.bf16.mxu0 %v3457_v0 }
 0x3eb   :  { %1750 = vadd.xlane.f32.xlu1 %v4415_v30 }
 0x3ee   :  { %v1617_v24 = vpop.f32.mrb[92].mxu0 }
 0x3ef   :  { %v4420_v22 = vadd.f32 %v1617_v24, %v4393_v27  ;;  %v3094_v36 = vpop.f32.mrb[93].mxu0 }
 0x3f0   :  { %v1620_v8 = vpop.f32.mrb[94].mxu0 }
 0x3f1   :  { %v4423_v52 = vadd.f32 %v1620_v8, %v4393_v27  ;;  %1752 = vadd.xlane.f32.xlu0 %v4420_v22  ;;  %v3095_v12 = vpop.f32.mrb[95].mxu0 }
 0x3f3   :  { %1754 = vadd.xlane.f32.xlu1 %v4423_v52 }
 0x3f6   :  { %v1625_v20 = vpop.f32.mrb[96].mxu0 }
 0x3f7   :  { %v4428_v57 = vadd.f32 %v1625_v20, %v4393_v27  ;;  %v3098_v26 = vpop.f32.mrb[97].mxu0 }
 0x3f8   :  { %v1628_v50 = vpop.f32.mrb[98].mxu0 }
 0x3f9   :  { %v4431_v11 = vadd.f32 %v1628_v50, %v4393_v27  ;;  %1756 = vadd.xlane.f32.xlu0 %v4428_v57  ;;  %v3099_v62 = vpop.f32.mrb[99].mxu0 }
 0x3fb   :  { %1758 = vadd.xlane.f32.xlu1 %v4431_v11 }
 0x3fe   :  { %v1633_v37 = vpop.f32.mrb[100].mxu0 }
 0x3ff   :  { %v4436_v14 = vadd.f32 %v1633_v37, %v4393_v27  ;;  %v3102_v18 = vpop.f32.mrb[101].mxu0 }
 0x400   :  { %v1636_v54 = vpop.f32.mrb[102].mxu0 }
 0x401   :  { %v4439_v35 = vadd.f32 %v1636_v54, %v4393_v27  ;;  %1760 = vadd.xlane.f32.xlu0 %v4436_v14  ;;  %v3103_v3 = vpop.f32.mrb[103].mxu0 }
 0x403   :  { %1762 = vadd.xlane.f32.xlu1 %v4439_v35 }
 0x406   :  { %v1641_v31 = vpop.f32.mrb[104].mxu0 }
 0x407   :  { %v4444_v10 = vadd.f32 %v1641_v31, %v4393_v27  ;;  %v3106_v42 = vpop.f32.mrb[105].mxu0 }
 0x408   :  { %v1644_v6 = vpop.f32.mrb[106].mxu0 }
 0x409   :  { %v4447_v44 = vadd.f32 %v1644_v6, %v4393_v27  ;;  %1764 = vadd.xlane.f32.xlu0 %v4444_v10  ;;  %v3107_v40 = vpop.f32.mrb[107].mxu0 }
 0x40b   :  { %1766 = vadd.xlane.f32.xlu1 %v4447_v44 }
 0x40e   :  { %v1649_v29 = vpop.f32.mrb[108].mxu0 }
 0x40f   :  { %v4452_v2 = vadd.f32 %v1649_v29, %v4393_v27  ;;  %v3110_v32 = vpop.f32.mrb[109].mxu0 }
 0x410   :  { %v1652_v58 = vpop.f32.mrb[110].mxu0 }
 0x411   :  { %v4455_v43 = vadd.f32 %v1652_v58, %v4393_v27  ;;  %1768 = vadd.xlane.f32.xlu0 %v4452_v2  ;;  %v3111_v13 = vpop.f32.mrb[111].mxu0 }
 0x413   :  { %1770 = vadd.xlane.f32.xlu1 %v4455_v43 }
 0x416   :  { %v1657_v60 = vpop.f32.mrb[112].mxu0 }
 0x417   :  { %v4460_v63 = vadd.f32 %v1657_v60, %v4393_v27  ;;  %v3114_v38 = vpop.f32.mrb[113].mxu0 }
 0x418   :  { %v1660_v47 = vpop.f32.mrb[114].mxu0 }
 0x419   :  { %v4463_v7 = vadd.f32 %v1660_v47, %v4393_v27  ;;  %1772 = vadd.xlane.f32.xlu0 %v4460_v63  ;;  %v3115_v25 = vpop.f32.mrb[115].mxu0 }
 0x41b   :  { %1774 = vadd.xlane.f32.xlu1 %v4463_v7 }
 0x41e   :  { %v1665_v41 = vpop.f32.mrb[116].mxu0 }
 0x41f   :  { %v4468_v49 = vadd.f32 %v1665_v41, %v4393_v27  ;;  %v3118_v1 = vpop.f32.mrb[117].mxu0 }
 0x420   :  { %v1668_v19 = vpop.f32.mrb[118].mxu0 }
 0x421   :  { %v4471_v48 = vadd.f32 %v1668_v19, %v4393_v27  ;;  %1776 = vadd.xlane.f32.xlu0 %v4468_v49  ;;  %v3119_v33 = vpop.f32.mrb[119].mxu0 }
 0x423   :  { %1778 = vadd.xlane.f32.xlu1 %v4471_v48 }
 0x466   :  { %v1741_v46 = vpop.xlane.xlu0 %1740 }
 0x467   :  { %v1814_v34 = vmul.f32 0.03125, %v1741_v46 }
 0x468   :  { %v1743_v21 = vpop.xlane.xlu1 %1742  ;;  %v1673_v17 = vpop.f32.mrb[120].mxu0 }
 0x469   :  { %v4491_v51 = vadd.f32 %v1673_v17, %v4393_v27  ;;  %v3122_v24 = vpop.f32.mrb[121].mxu0  ;;  %v1815_v8 = vmul.f32 0.03125, %v1743_v21  ;;  %v1852_v26 = vsub.f32 %v4396_v39, %v1814_v34 }
 0x46a   :  { %v1676_v36 = vpop.f32.mrb[122].mxu0 }
 0x46b   :  { %v4494_v12 = vadd.f32 %v1676_v36, %v4393_v27  ;;  %1780 = vadd.xlane.f32.xlu0 %v4491_v51  ;;  %v3123_v20 = vpop.f32.mrb[123].mxu0  ;;  %v1853_v50 = vsub.f32 %v4399_v23, %v1815_v8  ;;  %v4501_v18 = vmul.f32 %v3892_v15, %v1852_v26 }
 0x46d   :  { %1782 = vadd.xlane.f32.xlu1 %v4494_v12  ;;  %v4507_v40 = vmul.f32 %v3892_v15, %v1853_v50  ;;  %v1928_v32 = vmul.f32 %v4501_v18, %v4501_v18 }
 0x46e   :  { %v1745_v62 = vpop.xlane.xlu0 %1744 }
 0x46f   :  { %v1816_v42 = vmul.f32 0.03125, %v1745_v62  ;;  %v1929_v60 = vmul.f32 %v4507_v40, %v4507_v40 }
 0x470   :  { %v1681_v37 = vpop.f32.mrb[124].mxu0  ;;  %v1747_v54 = vpop.xlane.xlu1 %1746 }
 0x471   :  { %v4504_v3 = vadd.f32 %v1681_v37, %v4393_v27  ;;  %v3126_v31 = vpop.f32.mrb[125].mxu0  ;;  %v1817_v29 = vmul.f32 0.03125, %v1747_v54  ;;  %v1854_v58 = vsub.f32 %v4404_v16, %v1816_v42 }
 0x472   :  { %v1684_v6 = vpop.f32.mrb[126].mxu0 }
 0x473   :  { %v4510_v39 = vadd.f32 %v1684_v6, %v4393_v27  ;;  %1784 = vadd.xlane.f32.xlu0 %v4504_v3  ;;  %v3127_v23 = vpop.f32.mrb[127].mxu0  ;;  %v1855_v38 = vsub.f32 %v4407_v59, %v1817_v29  ;;  %v4521_v41 = vmul.f32 %v3892_v15, %v1854_v58  ;;  %v3300_v29 = vld [vmem:[%s5136_s5 + $0x18] sm:$0xff]  }
 0x474   :  { %3255 = vmatpush3.bf16.msra.mxu1 %v3300_v29  ;;  %3159 = vmatpush3.bf16.msra.mxu0 %v3300_v29 }
 0x475   :  { %1786 = vadd.xlane.f32.xlu1 %v4510_v39  ;;  %v4527_v16 = vmul.f32 %v3892_v15, %v1855_v38  ;;  %v1930_v21 = vmul.f32 %v4521_v41, %v4521_v41  ;;  %3248 = vmatprep.subr.bf16.mxu1 %v3457_v0 }
 0x476   :  { %v1749_v13 = vpop.xlane.xlu0 %1748  ;;  %3160 = vmatprep.subr.bf16.mxu0 %v3457_v0 }
 0x477   :  { %1968 = vadd.xlane.f32.xlu0 %v1928_v32  ;;  %v1818_v1 = vmul.f32 0.03125, %v1749_v13  ;;  %v1931_v24 = vmul.f32 %v4527_v16, %v4527_v16 }
 0x478   :  { %v1751_v47 = vpop.xlane.xlu1 %1750 }
 0x479   :  { %v1689_v25 = vpop.f32.mrb[128].mxu0  ;;  %1970 = vadd.xlane.f32.xlu1 %v1929_v60  ;;  %v1819_v56 = vmul.f32 0.03125, %v1751_v47  ;;  %v1856_v46 = vsub.f32 %v4412_v4, %v1818_v1 }
 0x47a   :  { %v4524_v19 = vadd.f32 %v1689_v25, %v4393_v27  ;;  %v3130_v33 = vpop.f32.mrb[129].mxu0 }
 0x47b   :  { %v1692_v45 = vpop.f32.mrb[130].mxu0  ;;  %v1857_v34 = vsub.f32 %v4415_v30, %v1819_v56  ;;  %v4541_v20 = vmul.f32 %v3892_v15, %v1856_v46 }
 0x47c   :  { %v4530_v61 = vadd.f32 %v1692_v45, %v4393_v27  ;;  %1788 = vadd.xlane.f32.xlu0 %v4524_v19  ;;  %v3131_v59 = vpop.f32.mrb[131].mxu0 }
 0x47d   :  { %v4547_v37 = vmul.f32 %v3892_v15, %v1857_v34  ;;  %v1932_v6 = vmul.f32 %v4541_v20, %v4541_v20 }
 0x47e   :  { %1790 = vadd.xlane.f32.xlu1 %v4530_v61  ;;  %v1753_v17 = vpop.xlane.xlu0 %1752 }
 0x47f   :  { %v1820_v26 = vmul.f32 0.03125, %v1753_v17  ;;  %v1933_v58 = vmul.f32 %v4547_v37, %v4547_v37 }
 0x480   :  { %1972 = vadd.xlane.f32.xlu0 %v1930_v21  ;;  %v1755_v36 = vpop.xlane.xlu1 %1754 }
 0x481   :  { %v1697_v8 = vpop.f32.mrb[132].mxu0  ;;  %v1821_v30 = vmul.f32 0.03125, %v1755_v36  ;;  %v1858_v42 = vsub.f32 %v4420_v22, %v1820_v26 }
 0x482   :  { %v4544_v4 = vadd.f32 %v1697_v8, %v4393_v27  ;;  %1974 = vadd.xlane.f32.xlu1 %v1931_v24  ;;  %v3134_v50 = vpop.f32.mrb[133].mxu0  ;;  %v3301_v8 = vld [vmem:[%s5136_s5 + $0x20] sm:$0xff]  }
 0x483   :  { %v1700_v62 = vpop.f32.mrb[134].mxu0  ;;  %v1859_v32 = vsub.f32 %v4423_v52, %v1821_v30  ;;  %v4564_v22 = vmul.f32 %v3892_v15, %v1858_v42  ;;  %3256 = vmatpush3.bf16.msra.mxu1 %v3301_v8  ;;  %3161 = vmatpush3.bf16.msra.mxu0 %v3301_v8  ;;  %v3304_v8 = vld [vmem:[%s5136_s5 + $0x38] sm:$0xff]  }
 0x484   :  { %v4550_v54 = vadd.f32 %v1700_v62, %v4393_v27  ;;  %1792 = vadd.xlane.f32.xlu0 %v4544_v4  ;;  %v3135_v31 = vpop.f32.mrb[135].mxu0  ;;  %3249 = vmatprep.subr.bf16.mxu1 %v3457_v0 }
 0x485   :  { %v4572_v1 = vmul.f32 %v3892_v15, %v1859_v32  ;;  %v1934_v46 = vmul.f32 %v4564_v22, %v4564_v22  ;;  %3162 = vmatprep.subr.bf16.mxu0 %v3457_v0  ;;  %v3302_v32 = vld [vmem:[%s5136_s5 + $0x28] sm:$0xff]  }
 0x486   :  { %1794 = vadd.xlane.f32.xlu1 %v4550_v54  ;;  %v1757_v23 = vpop.xlane.xlu0 %1756 }
 0x487   :  { %v1822_v38 = vmul.f32 0.03125, %v1757_v23  ;;  %v1935_v34 = vmul.f32 %v4572_v1, %v4572_v1  ;;  %3257 = vmatpush3.bf16.msra.mxu1 %v3302_v32  ;;  %3163 = vmatpush3.bf16.msra.mxu0 %v3302_v32 }
 0x488   :  { %1976 = vadd.xlane.f32.xlu0 %v1932_v6  ;;  %v1759_v13 = vpop.xlane.xlu1 %1758  ;;  %3250 = vmatprep.subr.bf16.mxu1 %v3457_v0 }
 0x489   :  { %v1705_v60 = vpop.f32.mrb[136].mxu0  ;;  %v1823_v33 = vmul.f32 0.03125, %v1759_v13  ;;  %v1860_v59 = vsub.f32 %v4428_v57, %v1822_v38  ;;  %3164 = vmatprep.subr.bf16.mxu0 %v3457_v0 }
 0x48a   :  { %v4567_v47 = vadd.f32 %v1705_v60, %v4393_v27  ;;  %1978 = vadd.xlane.f32.xlu1 %v1933_v58  ;;  %v3138_v25 = vpop.f32.mrb[137].mxu0 }
 0x48b   :  { %v1708_v52 = vpop.f32.mrb[138].mxu0  ;;  %v1861_v17 = vsub.f32 %v4431_v11, %v1823_v33  ;;  %v4589_v57 = vmul.f32 %v3892_v15, %v1860_v59 }
 0x48c   :  { %v4575_v45 = vadd.f32 %v1708_v52, %v4393_v27  ;;  %1796 = vadd.xlane.f32.xlu0 %v4567_v47  ;;  %v3139_v56 = vpop.f32.mrb[139].mxu0 }
 0x48d   :  { %v4595_v30 = vmul.f32 %v3892_v15, %v1861_v17  ;;  %v1936_v29 = vmul.f32 %v4589_v57, %v4589_v57 }
 0x48e   :  { %1798 = vadd.xlane.f32.xlu1 %v4575_v45  ;;  %v1761_v21 = vpop.xlane.xlu0 %1760 }
 0x48f   :  { %v1824_v26 = vmul.f32 0.03125, %v1761_v21  ;;  %v1937_v60 = vmul.f32 %v4595_v30, %v4595_v30 }
 0x490   :  { %1980 = vadd.xlane.f32.xlu0 %v1934_v46  ;;  %v1763_v24 = vpop.xlane.xlu1 %1762 }
 0x491   :  { %v1713_v36 = vpop.f32.mrb[140].mxu0  ;;  %v1825_v31 = vmul.f32 0.03125, %v1763_v24  ;;  %v1862_v23 = vsub.f32 %v4436_v14, %v1824_v26 }
 0x492   :  { %v4592_v50 = vadd.f32 %v1713_v36, %v4393_v27  ;;  %1982 = vadd.xlane.f32.xlu1 %v1935_v34  ;;  %v3142_v62 = vpop.f32.mrb[141].mxu0 }
 0x493   :  { %v1716_v11 = vpop.f32.mrb[142].mxu0  ;;  %v1863_v13 = vsub.f32 %v4439_v35, %v1825_v31  ;;  %v4615_v14 = vmul.f32 %v3892_v15, %v1862_v23  ;;  %v3303_v35 = vld [vmem:[%s5136_s5 + $0x30] sm:$0xff]  }
 0x494   :  { %v4598_v42 = vadd.f32 %v1716_v11, %v4393_v27  ;;  %1800 = vadd.xlane.f32.xlu0 %v4592_v50  ;;  %v3143_v6 = vpop.f32.mrb[143].mxu0  ;;  %3258 = vmatpush3.bf16.msra.mxu1 %v3303_v35 }
 0x495   :  { %v4625_v46 = vmul.f32 %v3892_v15, %v1863_v13  ;;  %3251 = vmatprep.subr.bf16.mxu1 %v3457_v0  ;;  %3165 = vmatpush3.bf16.msra.mxu0 %v3303_v35  ;;  %v1938_v36 = vmul.f32 %v4615_v14, %v4615_v14  ;;  %v4645_v6 = vadd.f32 %v4379_v28, %v4393_v27 }
 0x496   :  { %1802 = vadd.xlane.f32.xlu1 %v4598_v42  ;;  %v1765_v58 = vpop.xlane.xlu0 %1764  ;;  %3166 = vmatprep.subr.bf16.mxu0 %v3457_v0 }
 0x497   :  { %v1826_v52 = vmul.f32 0.03125, %v1765_v58  ;;  %v1939_v11 = vmul.f32 %v4625_v46, %v4625_v46 }
 0x498   :  { %1984 = vadd.xlane.f32.xlu0 %v1936_v29  ;;  %v1767_v38 = vpop.xlane.xlu1 %1766  ;;  %3259 = vmatpush3.bf16.msra.mxu1 %v3304_v8 }
 0x499   :  { %v1721_v25 = vpop.f32.mrb[144].mxu0  ;;  %v1827_v21 = vmul.f32 0.03125, %v1767_v38  ;;  %v1864_v24 = vsub.f32 %v4444_v10, %v1826_v52  ;;  %3167 = vmatpush3.bf16.msra.mxu0 %v3304_v8 }
 0x49a   :  { %v4618_v33 = vadd.f32 %v1721_v25, %v4393_v27  ;;  %1986 = vadd.xlane.f32.xlu1 %v1937_v60  ;;  %v3146_v56 = vpop.f32.mrb[145].mxu0 }
 0x49b   :  { %v1724_v59 = vpop.f32.mrb[146].mxu0  ;;  %v1865_v62 = vsub.f32 %v4447_v44, %v1827_v21  ;;  %v4648_v23 = vmul.f32 %v3892_v15, %v1864_v24  ;;  %v4652_v44 = vadd.f32 %v4383_v5, %v4393_v27 }
 0x49c   :  { %v4628_v17 = vadd.f32 %v1724_v59, %v4393_v27  ;;  %1804 = vadd.xlane.f32.xlu0 %v4618_v33  ;;  %v3147_v34 = vpop.f32.mrb[147].mxu0 }
 0x49d   :  { %v4655_v13 = vmul.f32 %v3892_v15, %v1865_v62  ;;  %v1940_v52 = vmul.f32 %v4648_v23, %v4648_v23 }
 0x49e   :  { %1806 = vadd.xlane.f32.xlu1 %v4628_v17  ;;  %v1769_v26 = vpop.xlane.xlu0 %1768 }
 0x49f   :  { %v1828_v29 = vmul.f32 0.03125, %v1769_v26  ;;  %v1941_v59 = vmul.f32 %v4655_v13, %v4655_v13 }
 0x4a0   :  { %1988 = vadd.xlane.f32.xlu0 %v1938_v36  ;;  %v1771_v10 = vpop.xlane.xlu1 %1770 }
 0x4a1   :  { %v1729_v31 = vpop.f32.mrb[148].mxu0  ;;  %v1829_v60 = vmul.f32 0.03125, %v1771_v10  ;;  %v1866_v28 = vsub.f32 %v4452_v2, %v1828_v29 }
 0x4a2   :  { %1990 = vadd.xlane.f32.xlu1 %v1939_v11  ;;  %v3150_v32 = vpop.f32.mrb[149].mxu0  ;;  %v4669_v2 = vadd.f32 %v1729_v31, %v4393_v27 }
 0x4a3   :  { %v1732_v58 = vpop.f32.mrb[150].mxu0  ;;  %v1867_v35 = vsub.f32 %v4455_v43, %v1829_v60  ;;  %v4666_v34 = vmul.f32 %v3892_v15, %v1866_v28 }
 0x4a4   :  { %1736 = vadd.xlane.f32.xlu0 %v4645_v6  ;;  %v3151_v38 = vpop.f32.mrb[151].mxu0  ;;  %v4676_v43 = vadd.f32 %v1732_v58, %v4393_v27 }
 0x4a5   :  { %v4673_v36 = vmul.f32 %v3892_v15, %v1867_v35 }
 0x4a6   :  { %1738 = vadd.xlane.f32.xlu1 %v4652_v44  ;;  %v1773_v25 = vpop.xlane.xlu0 %1772 }
 0x4a7   :  { %v1830_v56 = vmul.f32 0.03125, %v1773_v25 }
 0x4a8   :  { %1992 = vadd.xlane.f32.xlu0 %v1940_v52  ;;  %v1775_v5 = vpop.xlane.xlu1 %1774 }
 0x4a9   :  { %v1831_v21 = vmul.f32 0.03125, %v1775_v5  ;;  %v1868_v24 = vsub.f32 %v4460_v63, %v1830_v56  ;;  %v1942_v63 = vmul.f32 %v4666_v34, %v4666_v34 }
 0x4aa   :  { %1994 = vadd.xlane.f32.xlu1 %v1941_v59 }
 0x4ab   :  { %v1869_v8 = vsub.f32 %v4463_v7, %v1831_v21  ;;  %v4681_v26 = vmul.f32 %v3892_v15, %v1868_v24  ;;  %v1943_v7 = vmul.f32 %v4673_v36, %v4673_v36 }
 0x4ac   :  { %1808 = vadd.xlane.f32.xlu0 %v4669_v2 }
 0x4ad   :  { %v4687_v10 = vmul.f32 %v3892_v15, %v1869_v8  ;;  %v1944_v32 = vmul.f32 %v4681_v26, %v4681_v26 }
 0x4ae   :  { %1810 = vadd.xlane.f32.xlu1 %v4676_v43  ;;  %v1777_v62 = vpop.xlane.xlu0 %1776 }
 0x4af   :  { %v1832_v11 = vmul.f32 0.03125, %v1777_v62  ;;  %v1945_v38 = vmul.f32 %v4687_v10, %v4687_v10 }
 0x4b0   :  { %1996 = vadd.xlane.f32.xlu0 %v1942_v63  ;;  %v1779_v27 = vpop.xlane.xlu1 %1778 }
 0x4b1   :  { %v1870_v31 = vsub.f32 %v4468_v49, %v1832_v11  ;;  %v1833_v29 = vmul.f32 0.03125, %v1779_v27 }
 0x4b2   :  { %1998 = vadd.xlane.f32.xlu1 %v1943_v7 }
 0x4b3   :  { %v4695_v58 = vmul.f32 %v3892_v15, %v1870_v31  ;;  %v1871_v60 = vsub.f32 %v4471_v48, %v1833_v29 }
 0x4b4   :  { %2000 = vadd.xlane.f32.xlu0 %v1944_v32 }
 0x4b5   :  { %v4701_v28 = vmul.f32 %v3892_v15, %v1871_v60  ;;  %v1946_v49 = vmul.f32 %v4695_v58, %v4695_v58 }
 0x4b6   :  { %2002 = vadd.xlane.f32.xlu1 %v1945_v38 }
 0x4b7   :  { %v1947_v25 = vmul.f32 %v4701_v28, %v4701_v28 }
 0x4b8   :  { %2004 = vadd.xlane.f32.xlu0 %v1946_v49 }
 0x4ba   :  { %2006 = vadd.xlane.f32.xlu1 %v1947_v25 }
 0x4f8   :  { %v1781_v52 = vpop.xlane.xlu0 %1780 }
 0x4f9   :  { %v1834_v56 = vmul.f32 0.03125, %v1781_v52 }
 0x4fa   :  { %v1783_v35 = vpop.xlane.xlu1 %1782 }
 0x4fb   :  { %v1872_v48 = vsub.f32 %v4491_v51, %v1834_v56  ;;  %v1835_v5 = vmul.f32 0.03125, %v1783_v35 }
 0x4fd   :  { %v4709_v59 = vmul.f32 %v3892_v15, %v1872_v48  ;;  %v1873_v21 = vsub.f32 %v4494_v12, %v1835_v5 }
 0x4ff   :  { %v4713_v24 = vmul.f32 %v3892_v15, %v1873_v21  ;;  %v1948_v8 = vmul.f32 %v4709_v59, %v4709_v59 }
 0x500   :  { %v1785_v62 = vpop.xlane.xlu0 %1784 }
 0x501   :  { %v1836_v63 = vmul.f32 0.03125, %v1785_v62  ;;  %2008 = vadd.xlane.f32.xlu0 %v1948_v8  ;;  %v1949_v11 = vmul.f32 %v4713_v24, %v4713_v24 }
 0x502   :  { %v1787_v27 = vpop.xlane.xlu1 %1786 }
 0x503   :  { %v1874_v51 = vsub.f32 %v4504_v3, %v1836_v63  ;;  %v1837_v7 = vmul.f32 0.03125, %v1787_v27  ;;  %2010 = vadd.xlane.f32.xlu1 %v1949_v11 }
 0x504   :  { %v1969_v31 = vpop.xlane.xlu0 %1968 }
 0x505   :  { %v4721_v12 = vmul.f32 %v3892_v15, %v1874_v51  ;;  %v1875_v29 = vsub.f32 %v4510_v39, %v1837_v7  ;;  %v2042_v32 = vmul.f32 0.03125, %v1969_v31 }
 0x506   :  { %v1971_v60 = vpop.xlane.xlu1 %1970 }
 0x507   :  { %v4725_v38 = vmul.f32 %v3892_v15, %v1875_v29  ;;  %v2080_v49 = vadd.f32 1e-05, %v2042_v32  ;;  %v2043_v25 = vmul.f32 0.03125, %v1971_v60  ;;  %v1950_v52 = vmul.f32 %v4721_v12, %v4721_v12 }
 0x509   :  { %3381 = vrsqrt.f32 %v2080_v49  ;;  %v2081_v3 = vadd.f32 1e-05, %v2043_v25  ;;  %v1789_v56 = vpop.xlane.xlu0 %1788  ;;  %2012 = vadd.xlane.f32.xlu0 %v1950_v52  ;;  %v1951_v35 = vmul.f32 %v4725_v38, %v4725_v38  ;;  %v5140_v52 = vsub.s32 2, %v3737_v55 }
 0x50a   :  { %v1838_v48 = vmul.f32 0.03125, %v1789_v56 }
 0x50b   :  { %3383 = vrsqrt.f32 %v2081_v3  ;;  %v1791_v39 = vpop.xlane.xlu1 %1790  ;;  %2014 = vadd.xlane.f32.xlu1 %v1951_v35  ;;  %v4751_v3 = vrot.slane %v4388_v9, %v5140_v52 }
 0x50c   :  { %v1876_v5 = vsub.f32 %v4524_v19, %v1838_v48  ;;  %v1839_v21 = vmul.f32 0.03125, %v1791_v39  ;;  %v4744_v19 = vrot.slane %v4388_v9, %v1265_v53 }
 0x50d   :  { %v1973_v8 = vpop.xlane.xlu0 %1972 }
 0x50e   :  { %v4733_v62 = vmul.f32 %v3892_v15, %v1876_v5  ;;  %v1877_v63 = vsub.f32 %v4530_v61, %v1839_v21  ;;  %v2044_v11 = vmul.f32 0.03125, %v1973_v8 }
 0x50f   :  { %v1975_v27 = vpop.xlane.xlu1 %1974 }
 0x510   :  { %v4737_v51 = vmul.f32 %v3892_v15, %v1877_v63  ;;  %v2082_v7 = vadd.f32 1e-05, %v2044_v11  ;;  %v2045_v31 = vmul.f32 0.03125, %v1975_v27  ;;  %v1952_v29 = vmul.f32 %v4733_v62, %v4733_v62 }
 0x511   :  { %v1793_v32 = vpop.xlane.xlu0 %1792 }
 0x512   :  { %3385 = vrsqrt.f32 %v2082_v7  ;;  %v2083_v60 = vadd.f32 1e-05, %v2045_v31  ;;  %v1840_v49 = vmul.f32 0.03125, %v1793_v32  ;;  %2016 = vadd.xlane.f32.xlu0 %v1952_v29  ;;  %v1953_v61 = vmul.f32 %v4737_v51, %v4737_v51 }
 0x513   :  { %v3382_v25 = vpop.eup %3381  ;;  %v1795_v56 = vpop.xlane.xlu1 %1794 }
 0x514   :  { %v2156_v35 = vmul.f32 %v3382_v25, %v4501_v18  ;;  %3387 = vrsqrt.f32 %v2083_v60  ;;  %v1878_v53 = vsub.f32 %v4544_v4, %v1840_v49  ;;  %v1841_v48 = vmul.f32 0.03125, %v1795_v56  ;;  %2018 = vadd.xlane.f32.xlu1 %v1953_v61 }
 0x515   :  { %v3384_v39 = vpop.eup %3383  ;;  %v1977_v5 = vpop.xlane.xlu0 %1976 }
 0x516   :  { %v2198_v21 = vmul.f32 %v4744_v19, %v2156_v35  ;;  %v2157_v8 = vmul.f32 %v3384_v39, %v4507_v40  ;;  %v4758_v63 = vmul.f32 %v3892_v15, %v1878_v53  ;;  %v1879_v55 = vsub.f32 %v4550_v54, %v1841_v48 }
 0x517   :  { %v2046_v9 = vmul.f32 0.03125, %v1977_v5  ;;  %v1979_v11 = vpop.xlane.xlu1 %1978 }
 0x518   :  { %v2240_v18 = vadd.f32 %v4751_v3, %v2198_v21  ;;  %v2199_v27 = vmul.f32 %v4744_v19, %v2157_v8  ;;  %v4764_v4 = vmul.f32 %v3892_v15, %v1879_v55  ;;  %v2047_v7 = vmul.f32 0.03125, %v1979_v11 }
 0x519   :  { %v2084_v31 = vadd.f32 1e-05, %v2046_v9  ;;  %v1797_v29 = vpop.xlane.xlu0 %1796  ;;  %v1954_v40 = vmul.f32 %v4758_v63, %v4758_v63 }
 0x51a   :  { %v2241_v32 = vadd.f32 %v4751_v3, %v2199_v27  ;;  %v2085_v60 = vadd.f32 1e-05, %v2047_v7  ;;  %v1842_v49 = vmul.f32 0.03125, %v1797_v29  ;;  %v1955_v54 = vmul.f32 %v4764_v4, %v4764_v4 }
 0x51b   :  { %3389 = vrsqrt.f32 %v2084_v31  ;;  %2020 = vadd.xlane.f32.xlu0 %v1954_v40  ;;  %v1799_v61 = vpop.xlane.xlu1 %1798  ;;  %vm2278_vm5 = vcmp.ge.f32.partialorder %v2240_v18, 0.0  ;;  %v2316_v25 = vmul.f32 0.01, %v2240_v18 }
 0x51c   :  { %v3386_v52 = vpop.eup %3385  ;;  %3391 = vrsqrt.f32 %v2085_v60  ;;  %v1880_v56 = vsub.f32 %v4567_v47, %v1842_v49  ;;  %v1843_v35 = vmul.f32 0.03125, %v1799_v61  ;;  %2022 = vadd.xlane.f32.xlu1 %v1955_v54  ;;  %vm2279_vm6 = vcmp.ge.f32.partialorder %v2241_v32, 0.0 }
 0x51d   :  { %v2158_v53 = vmul.f32 %v3386_v52, %v4521_v41  ;;  %v1981_v48 = vpop.xlane.xlu0 %1980  ;;  %v2317_v39 = vmul.f32 0.01, %v2241_v32  ;;  %v2354_v27 = vsel %vm2278_vm5, %v2240_v18, %v2316_v25 }
 0x51e   :  { %v3388_v5 = vpop.eup %3387  ;;  %v4774_v21 = vmul.f32 %v3892_v15, %v1880_v56  ;;  %v1881_v8 = vsub.f32 %v4575_v45, %v1843_v35  ;;  %v2048_v55 = vmul.f32 0.03125, %v1981_v48 }
 0x51f   :  { %v2159_v9 = vmul.f32 %v3388_v5, %v4527_v16  ;;  %v1983_v11 = vpop.xlane.xlu1 %1982  ;;  %v2355_v47 = vsel %vm2279_vm6, %v2241_v32, %v2317_v39  ;;  %v2200_v7 = vmul.f32 %v4744_v19, %v2158_v53 }
 0x520   :  { %v4781_v31 = vmul.f32 %v3892_v15, %v1881_v8  ;;  %v2086_v41 = vadd.f32 1e-05, %v2048_v55  ;;  %v2049_v29 = vmul.f32 0.03125, %v1983_v11  ;;  %v2391_v40 = vpack.c.bf16 %v2355_v47, %v2354_v27 }
 0x521   :  { %v1801_v60 = vpop.xlane.xlu0 %1800  ;;  %v1956_v49 = vmul.f32 %v4774_v21, %v4774_v21  ;;  %v2201_v45 = vmul.f32 %v4744_v19, %v2159_v9  ;;  %v2242_v16 = vadd.f32 %v4751_v3, %v2200_v7 }
 0x522   :  { %3393 = vrsqrt.f32 %v2086_v41  ;;  %v2087_v54 = vadd.f32 1e-05, %v2049_v29  ;;  %v1844_v18 = vmul.f32 0.03125, %v1801_v60  ;;  %3173 = vmatmul.mubr.bf16.vlgmr.msra.gmra.mrb[76].mxu1 %v2391_v40  ;;  %v1957_v32 = vmul.f32 %v4781_v31, %v4781_v31 }
 0x523   :  { %2024 = vadd.xlane.f32.xlu0 %v1956_v49  ;;  %v1803_v61 = vpop.xlane.xlu1 %1802  ;;  %3176 = vmatprep.mubr.msk.bf16.mxu1 %vm3458_vm1, %v3457_v0  ;;  %v2243_v25 = vadd.f32 %v4751_v3, %v2201_v45  ;;  %v2318_v52 = vmul.f32 0.01, %v2242_v16  ;;  %vm2280_vm7 = vcmp.ge.f32.partialorder %v2242_v16, 0.0 }
 0x524   :  { %3395 = vrsqrt.f32 %v2087_v54  ;;  %v1882_v56 = vsub.f32 %v4592_v50, %v1844_v18  ;;  %v1845_v35 = vmul.f32 0.03125, %v1803_v61  ;;  %2026 = vadd.xlane.f32.xlu1 %v1957_v32 }
 0x525   :  { %v3390_v53 = vpop.eup %3389  ;;  %v1985_v48 = vpop.xlane.xlu0 %1984  ;;  %vm2281_vm8 = vcmp.ge.f32.partialorder %v2243_v25, 0.0  ;;  %v2319_v39 = vmul.f32 0.01, %v2243_v25  ;;  %v2356_v50 = vsel %vm2280_vm7, %v2242_v16, %v2318_v52 }
 0x526   :  { %v3392_v5 = vpop.eup %3391  ;;  %v2160_v8 = vmul.f32 %v3390_v53, %v4541_v20  ;;  %v4795_v55 = vmul.f32 %v3892_v15, %v1882_v56  ;;  %v1883_v9 = vsub.f32 %v4598_v42, %v1845_v35  ;;  %v2050_v11 = vmul.f32 0.03125, %v1985_v48 }
 0x527   :  { %v2161_v27 = vmul.f32 %v3392_v5, %v4547_v37  ;;  %v1987_v47 = vpop.xlane.xlu1 %1986  ;;  %v2357_v7 = vsel %vm2281_vm8, %v2243_v25, %v2319_v39 }
 0x528   :  { %v4800_v41 = vmul.f32 %v3892_v15, %v1883_v9  ;;  %v2088_v29 = vadd.f32 1e-05, %v2050_v11  ;;  %v2051_v40 = vmul.f32 0.03125, %v1987_v47  ;;  %v2392_v60 = vpack.c.bf16 %v2357_v7, %v2356_v50 }
 0x529   :  { %v1805_v49 = vpop.xlane.xlu0 %1804  ;;  %v1958_v20 = vmul.f32 %v4795_v55, %v4795_v55  ;;  %v2202_v45 = vmul.f32 %v4744_v19, %v2160_v8  ;;  %v2203_v42 = vmul.f32 %v4744_v19, %v2161_v27 }
 0x52a   :  { %3397 = vrsqrt.f32 %v2088_v29  ;;  %v2089_v54 = vadd.f32 1e-05, %v2051_v40  ;;  %v1846_v37 = vmul.f32 0.03125, %v1805_v49  ;;  %3177 = vmatmul.mubr.bf16.gmra.mrb[80].mxu1 %v2392_v60  ;;  %v1959_v16 = vmul.f32 %v4800_v41, %v4800_v41 }
 0x52b   :  { %2028 = vadd.xlane.f32.xlu0 %v1958_v20  ;;  %v1807_v18 = vpop.xlane.xlu1 %1806  ;;  %3180 = vmatprep.mubr.msk.bf16.mxu1 %vm3458_vm1, %v3457_v0  ;;  %v2244_v32 = vadd.f32 %v4751_v3, %v2202_v45  ;;  %v2245_v61 = vadd.f32 %v4751_v3, %v2203_v42 }
 0x52c   :  { %v3394_v25 = vpop.eup %3393  ;;  %3399 = vrsqrt.f32 %v2089_v54  ;;  %v1884_v52 = vsub.f32 %v4618_v33, %v1846_v37  ;;  %v1847_v56 = vmul.f32 0.03125, %v1807_v18  ;;  %2030 = vadd.xlane.f32.xlu1 %v1959_v16 }
 0x52d   :  { %v2162_v35 = vmul.f32 %v3394_v25, %v4564_v22  ;;  %v1989_v53 = vpop.xlane.xlu0 %1988  ;;  %vm2282_vm9 = vcmp.ge.f32.partialorder %v2244_v32, 0.0  ;;  %vm2283_vm10 = vcmp.ge.f32.partialorder %v2245_v61, 0.0  ;;  %v2320_v48 = vmul.f32 0.01, %v2244_v32 }
 0x52e   :  { %v3396_v39 = vpop.eup %3395  ;;  %v4815_v5 = vmul.f32 %v3892_v15, %v1884_v52  ;;  %v1885_v8 = vsub.f32 %v4628_v17, %v1847_v56  ;;  %v2052_v9 = vmul.f32 0.03125, %v1989_v53  ;;  %v2321_v11 = vmul.f32 0.01, %v2245_v61 }
 0x52f   :  { %v2163_v27 = vmul.f32 %v3396_v39, %v4572_v1  ;;  %v1991_v47 = vpop.xlane.xlu1 %1990  ;;  %v2358_v33 = vsel %vm2282_vm9, %v2244_v32, %v2320_v48  ;;  %v2204_v50 = vmul.f32 %v4744_v19, %v2162_v35 }
 0x530   :  { %v4821_v22 = vmul.f32 %v3892_v15, %v1885_v8  ;;  %v2090_v7 = vadd.f32 1e-05, %v2052_v9  ;;  %v2053_v29 = vmul.f32 0.03125, %v1991_v47  ;;  %v2359_v40 = vsel %vm2283_vm10, %v2245_v61, %v2321_v11 }
 0x531   :  { %v1737_v60 = vpop.xlane.xlu0 %1736  ;;  %v2393_v49 = vpack.c.bf16 %v2359_v40, %v2358_v33  ;;  %v1960_v20 = vmul.f32 %v4815_v5, %v4815_v5  ;;  %v2205_v17 = vmul.f32 %v4744_v19, %v2163_v27  ;;  %v2246_v45 = vadd.f32 %v4751_v3, %v2204_v50 }
 0x532   :  { %3401 = vrsqrt.f32 %v2090_v7  ;;  %v2091_v1 = vadd.f32 1e-05, %v2053_v29  ;;  %v1812_v42 = vmul.f32 0.03125, %v1737_v60  ;;  %v1961_v54 = vmul.f32 %v4821_v22, %v4821_v22 }
 0x533   :  { %3181 = vmatmul.mubr.bf16.gmra.mrb[84].mxu1 %v2393_v49  ;;  %2032 = vadd.xlane.f32.xlu0 %v1960_v20  ;;  %v1739_v37 = vpop.xlane.xlu1 %1738  ;;  %v2247_v16 = vadd.f32 %v4751_v3, %v2205_v17  ;;  %v2322_v18 = vmul.f32 0.01, %v2246_v45  ;;  %vm2284_vm11 = vcmp.ge.f32.partialorder %v2246_v45, 0.0 }
 0x534   :  { %v3398_v32 = vpop.eup %3397  ;;  %3403 = vrsqrt.f32 %v2091_v1  ;;  %v1850_v61 = vsub.f32 %v4645_v6, %v1812_v42  ;;  %v1813_v25 = vmul.f32 0.03125, %v1739_v37  ;;  %2034 = vadd.xlane.f32.xlu1 %v1961_v54  ;;  %3184 = vmatprep.mubr.msk.bf16.mxu1 %vm3458_vm1, %v3457_v0 }
 0x535   :  { %v2164_v52 = vmul.f32 %v3398_v32, %v4589_v57  ;;  %v1993_v56 = vpop.xlane.xlu0 %1992  ;;  %vm2285_vm12 = vcmp.ge.f32.partialorder %v2247_v16, 0.0  ;;  %v2323_v35 = vmul.f32 0.01, %v2247_v16  ;;  %v2360_v11 = vsel %vm2284_vm11, %v2246_v45, %v2322_v18 }
 0x536   :  { %v3400_v53 = vpop.eup %3399  ;;  %v4835_v48 = vmul.f32 %v3892_v15, %v1850_v61  ;;  %v1851_v39 = vsub.f32 %v4652_v44, %v1813_v25  ;;  %v2054_v8 = vmul.f32 0.03125, %v1993_v56 }
 0x537   :  { %v2165_v6 = vmul.f32 %v3400_v53, %v4595_v30  ;;  %v1995_v9 = vpop.xlane.xlu1 %1994  ;;  %v2361_v27 = vsel %vm2285_vm12, %v2247_v16, %v2323_v35  ;;  %v2206_v47 = vmul.f32 %v4744_v19, %v2164_v52 }
 0x538   :  { %v4841_v33 = vmul.f32 %v3892_v15, %v1851_v39  ;;  %v2092_v57 = vadd.f32 1e-05, %v2054_v8  ;;  %v2055_v50 = vmul.f32 0.03125, %v1995_v9  ;;  %v2394_v7 = vpack.c.bf16 %v2361_v27, %v2360_v11 }
 0x539   :  { %v1809_v29 = vpop.xlane.xlu0 %1808  ;;  %v1926_v40 = vmul.f32 %v4835_v48, %v4835_v48  ;;  %v2207_v44 = vmul.f32 %v4744_v19, %v2165_v6  ;;  %v2248_v60 = vadd.f32 %v4751_v3, %v2206_v47 }
 0x53a   :  { %3405 = vrsqrt.f32 %v2092_v57  ;;  %v2093_v30 = vadd.f32 1e-05, %v2055_v50  ;;  %v1848_v49 = vmul.f32 0.03125, %v1809_v29  ;;  %v1927_v20 = vmul.f32 %v4841_v33, %v4841_v33 }
 0x53b   :  { %3185 = vmatmul.mubr.bf16.gmra.mrb[88].mxu1 %v2394_v7  ;;  %1964 = vadd.xlane.f32.xlu0 %v1926_v40  ;;  %v1811_v17 = vpop.xlane.xlu1 %1810  ;;  %v2249_v45 = vadd.f32 %v4751_v3, %v2207_v44  ;;  %v2324_v1 = vmul.f32 0.01, %v2248_v60  ;;  %vm2286_vm13 = vcmp.ge.f32.partialorder %v2248_v60, 0.0 }
 0x53c   :  { %v3402_v42 = vpop.eup %3401  ;;  %3407 = vrsqrt.f32 %v2093_v30  ;;  %v1886_v54 = vsub.f32 %v4669_v2, %v1848_v49  ;;  %v1849_v37 = vmul.f32 0.03125, %v1811_v17  ;;  %1966 = vadd.xlane.f32.xlu1 %v1927_v20  ;;  %3188 = vmatprep.mubr.msk.bf16.mxu1 %vm3458_vm1, %v3457_v0 }
 0x53d   :  { %v2166_v16 = vmul.f32 %v3402_v42, %v4615_v14  ;;  %v1997_v18 = vpop.xlane.xlu0 %1996  ;;  %vm2287_vm14 = vcmp.ge.f32.partialorder %v2249_v45, 0.0  ;;  %v2325_v32 = vmul.f32 0.01, %v2249_v45  ;;  %v2362_v53 = vsel %vm2286_vm13, %v2248_v60, %v2324_v1 }
 0x53e   :  { %v3404_v61 = vpop.eup %3403  ;;  %v4855_v25 = vmul.f32 %v3892_v15, %v1886_v54  ;;  %v1887_v52 = vsub.f32 %v4676_v43, %v1849_v37  ;;  %v2056_v56 = vmul.f32 0.03125, %v1997_v18 }
 0x53f   :  { %v2167_v2 = vmul.f32 %v3404_v61, %v4625_v46  ;;  %v1999_v35 = vpop.xlane.xlu1 %1998  ;;  %v2363_v39 = vsel %vm2287_vm14, %v2249_v45, %v2325_v32  ;;  %v2208_v8 = vmul.f32 %v4744_v19, %v2166_v16 }
 0x540   :  { %v4861_v6 = vmul.f32 %v3892_v15, %v1887_v52  ;;  %v2094_v14 = vadd.f32 1e-05, %v2056_v56  ;;  %v2057_v9 = vmul.f32 0.03125, %v1999_v35  ;;  %v2395_v11 = vpack.c.bf16 %v2363_v39, %v2362_v53 }
 0x541   :  { %v2001_v27 = vpop.xlane.xlu0 %2000  ;;  %v1962_v47 = vmul.f32 %v4855_v25, %v4855_v25  ;;  %v2209_v43 = vmul.f32 %v4744_v19, %v2167_v2  ;;  %v2250_v57 = vadd.f32 %v4751_v3, %v2208_v8 }
 0x542   :  { %3409 = vrsqrt.f32 %v2094_v14  ;;  %v2095_v46 = vadd.f32 1e-05, %v2057_v9  ;;  %v2058_v50 = vmul.f32 0.03125, %v2001_v27  ;;  %v1963_v7 = vmul.f32 %v4861_v6, %v4861_v6 }
 0x543   :  { %3189 = vmatmul.mubr.bf16.gmra.mrb[92].mxu1 %v2395_v11  ;;  %2036 = vadd.xlane.f32.xlu0 %v1962_v47  ;;  %v2003_v15 = vpop.xlane.xlu1 %2002  ;;  %v2251_v29 = vadd.f32 %v4751_v3, %v2209_v43  ;;  %v2326_v40 = vmul.f32 0.01, %v2250_v57  ;;  %vm2288_vm15 = vcmp.ge.f32.partialorder %v2250_v57, 0.0 }
 0x544   :  { %v3406_v44 = vpop.eup %3405  ;;  %3411 = vrsqrt.f32 %v2095_v46  ;;  %v2096_v60 = vadd.f32 1e-05, %v2058_v50  ;;  %v2059_v30 = vmul.f32 0.03125, %v2003_v15  ;;  %2038 = vadd.xlane.f32.xlu1 %v1963_v7  ;;  %3192 = vmatprep.mubr.msk.bf16.mxu1 %vm3458_vm1, %v3457_v0 }
 0x545   :  { %v2168_v49 = vmul.f32 %v3406_v44, %v4648_v23  ;;  %v2005_v20 = vpop.xlane.xlu0 %2004  ;;  %vm2289_vm0 = vcmp.ge.f32.partialorder %v2251_v29, 0.0  ;;  %v2327_v17 = vmul.f32 0.01, %v2251_v29  ;;  %v2364_v16 = vsel %vm2288_vm15, %v2250_v57, %v2326_v40 }
 0x546   :  { %v3408_v45 = vpop.eup %3407  ;;  %3413 = vrsqrt.f32 %v2096_v60  ;;  %v2097_v1 = vadd.f32 1e-05, %v2059_v30  ;;  %v2060_v42 = vmul.f32 0.03125, %v2005_v20 }
 0x547   :  { %v2169_v54 = vmul.f32 %v3408_v45, %v4655_v13  ;;  %v2007_v37 = vpop.xlane.xlu1 %2006  ;;  %v2365_v18 = vsel %vm2289_vm0, %v2251_v29, %v2327_v17  ;;  %v2210_v32 = vmul.f32 %v4744_v19, %v2168_v49 }
 0x548   :  { %3415 = vrsqrt.f32 %v2097_v1  ;;  %v2098_v61 = vadd.f32 1e-05, %v2060_v42  ;;  %v2061_v52 = vmul.f32 0.03125, %v2007_v37  ;;  %v2396_v56 = vpack.c.bf16 %v2365_v18, %v2364_v16 }
 0x549   :  { %v2211_v23 = vmul.f32 %v4744_v19, %v2169_v54  ;;  %v2252_v2 = vadd.f32 %v4751_v3, %v2210_v32 }
 0x54a   :  { %v2099_v35 = vadd.f32 1e-05, %v2061_v52  ;;  %3417 = vrsqrt.f32 %v2098_v61 }
 0x54b   :  { %3193 = vmatmul.mubr.bf16.gmra.mrb[96].mxu1 %v2396_v56  ;;  %v2253_v53 = vadd.f32 %v4751_v3, %v2211_v23  ;;  %v2328_v39 = vmul.f32 0.01, %v2252_v2  ;;  %vm2290_vm2 = vcmp.ge.f32.partialorder %v2252_v2, 0.0 }
 0x54c   :  { %v3410_v13 = vpop.eup %3409  ;;  %3419 = vrsqrt.f32 %v2099_v35  ;;  %3196 = vmatprep.mubr.msk.bf16.mxu1 %vm3458_vm1, %v3457_v0 }
 0x54d   :  { %v2170_v8 = vmul.f32 %v3410_v13, %v4666_v34  ;;  %vm2291_vm3 = vcmp.ge.f32.partialorder %v2253_v53, 0.0  ;;  %v2329_v14 = vmul.f32 0.01, %v2253_v53  ;;  %v2366_v27 = vsel %vm2290_vm2, %v2252_v2, %v2328_v39 }
 0x54e   :  { %v3412_v9 = vpop.eup %3411 }
 0x54f   :  { %v2171_v11 = vmul.f32 %v3412_v9, %v4673_v36  ;;  %v2367_v47 = vsel %vm2291_vm3, %v2253_v53, %v2329_v14  ;;  %v2212_v43 = vmul.f32 %v4744_v19, %v2170_v8 }
 0x550   :  { %v3414_v57 = vpop.eup %3413  ;;  %v2397_v46 = vpack.c.bf16 %v2367_v47, %v2366_v27 }
 0x551   :  { %v2172_v50 = vmul.f32 %v3414_v57, %v4681_v26  ;;  %v2213_v7 = vmul.f32 %v4744_v19, %v2171_v11  ;;  %v2254_v15 = vadd.f32 %v4751_v3, %v2212_v43 }
 0x552   :  { %v3416_v29 = vpop.eup %3415 }
 0x553   :  { %v2173_v34 = vmul.f32 %v3416_v29, %v4687_v10  ;;  %3197 = vmatmul.mubr.bf16.gmra.mrb[100].mxu1 %v2397_v46  ;;  %v2255_v40 = vadd.f32 %v4751_v3, %v2213_v7  ;;  %v2330_v44 = vmul.f32 0.01, %v2254_v15  ;;  %vm2292_vm4 = vcmp.ge.f32.partialorder %v2254_v15, 0.0 }
 0x554   :  { %3200 = vmatprep.mubr.msk.bf16.mxu1 %vm3458_vm1, %v3457_v0  ;;  %v2214_v36 = vmul.f32 %v4744_v19, %v2172_v50  ;;  %v3418_v60 = vpop.eup %3417 }
 0x555   :  { %vm2293_vm5 = vcmp.ge.f32.partialorder %v2255_v40, 0.0  ;;  %v2331_v26 = vmul.f32 0.01, %v2255_v40  ;;  %v2215_v49 = vmul.f32 %v4744_v19, %v2173_v34  ;;  %v2368_v17 = vsel %vm2292_vm4, %v2254_v15, %v2330_v44 }
 0x556   :  { %v3420_v30 = vpop.eup %3419  ;;  %v2174_v45 = vmul.f32 %v3418_v60, %v4695_v58  ;;  %v2256_v42 = vadd.f32 %v4751_v3, %v2214_v36 }
 0x557   :  { %v2175_v20 = vmul.f32 %v3420_v30, %v4701_v28  ;;  %v2369_v10 = vsel %vm2293_vm5, %v2255_v40, %v2331_v26  ;;  %v2257_v54 = vadd.f32 %v4751_v3, %v2215_v49 }
 0x558   :  { %v2398_v1 = vpack.c.bf16 %v2369_v10, %v2368_v17  ;;  %v2332_v18 = vmul.f32 0.01, %v2256_v42  ;;  %v2216_v28 = vmul.f32 %v4744_v19, %v2174_v45  ;;  %vm2294_vm7 = vcmp.ge.f32.partialorder %v2256_v42, 0.0 }
 0x559   :  { %v2333_v37 = vmul.f32 0.01, %v2257_v54  ;;  %v2217_v16 = vmul.f32 %v4744_v19, %v2175_v20  ;;  %vm2295_vm6 = vcmp.ge.f32.partialorder %v2257_v54, 0.0 }
 0x55a   :  { %v2370_v61 = vsel %vm2294_vm7, %v2256_v42, %v2332_v18  ;;  %v2258_v52 = vadd.f32 %v4751_v3, %v2216_v28 }
 0x55b   :  { %3201 = vmatmul.mubr.bf16.gmra.mrb[104].mxu1 %v2398_v1  ;;  %v2371_v32 = vsel %vm2295_vm6, %v2257_v54, %v2333_v37  ;;  %v2259_v58 = vadd.f32 %v4751_v3, %v2217_v16 }
 0x55c   :  { %3204 = vmatprep.mubr.msk.bf16.mxu1 %vm3458_vm1, %v3457_v0  ;;  %v2399_v56 = vpack.c.bf16 %v2371_v32, %v2370_v61  ;;  %v2334_v2 = vmul.f32 0.01, %v2258_v52  ;;  %vm2296_vm9 = vcmp.ge.f32.partialorder %v2258_v52, 0.0 }
 0x55d   :  { %v2335_v23 = vmul.f32 0.01, %v2259_v58  ;;  %vm2297_vm8 = vcmp.ge.f32.partialorder %v2259_v58, 0.0 }
 0x55e   :  { %v2372_v53 = vsel %vm2296_vm9, %v2258_v52, %v2334_v2 }
 0x55f   :  { %v2373_v35 = vsel %vm2297_vm8, %v2259_v58, %v2335_v23 }
 0x560   :  { %v2400_v39 = vpack.c.bf16 %v2373_v35, %v2372_v53 }
 0x563   :  { %3205 = vmatmul.mubr.bf16.gmra.mrb[108].mxu1 %v2399_v56 }
 0x564   :  { %3208 = vmatprep.mubr.msk.bf16.mxu1 %vm3458_vm1, %v3457_v0 }
 0x56b   :  { %3209 = vmatmul.mubr.bf16.gmra.mrb[112].mxu1 %v2400_v39 }
 0x56c   :  { %3212 = vmatprep.mubr.msk.bf16.mxu1 %vm3458_vm1, %v3457_v0 }
 0x58e   :  { %v2009_v13 = vpop.xlane.xlu0 %2008 }
 0x58f   :  { %v2062_v8 = vmul.f32 0.03125, %v2009_v13 }
 0x590   :  { %v2011_v14 = vpop.xlane.xlu1 %2010 }
 0x591   :  { %v2100_v9 = vadd.f32 1e-05, %v2062_v8  ;;  %v2063_v11 = vmul.f32 0.03125, %v2011_v14 }
 0x593   :  { %3421 = vrsqrt.f32 %v2100_v9  ;;  %v2101_v27 = vadd.f32 1e-05, %v2063_v11 }
 0x595   :  { %3423 = vrsqrt.f32 %v2101_v27 }
 0x596   :  { %v2013_v47 = vpop.xlane.xlu0 %2012 }
 0x597   :  { %v2064_v43 = vmul.f32 0.03125, %v2013_v47 }
 0x598   :  { %v2015_v57 = vpop.xlane.xlu1 %2014 }
 0x599   :  { %v2102_v46 = vadd.f32 1e-05, %v2064_v43  ;;  %v2065_v50 = vmul.f32 0.03125, %v2015_v57 }
 0x59b   :  { %3425 = vrsqrt.f32 %v2102_v46  ;;  %v2103_v7 = vadd.f32 1e-05, %v2065_v50 }
 0x59d   :  { %v3422_v15 = vpop.eup %3421  ;;  %3427 = vrsqrt.f32 %v2103_v7 }
 0x59e   :  { %v2176_v29 = vmul.f32 %v3422_v15, %v4709_v59 }
 0x59f   :  { %v3424_v34 = vpop.eup %3423  ;;  %v2017_v40 = vpop.xlane.xlu0 %2016 }
 0x5a0   :  { %v2177_v44 = vmul.f32 %v3424_v34, %v4713_v24  ;;  %v2066_v36 = vmul.f32 0.03125, %v2017_v40  ;;  %v2218_v60 = vmul.f32 %v4744_v19, %v2176_v29 }
 0x5a1   :  { %v2019_v26 = vpop.xlane.xlu1 %2018 }
 0x5a2   :  { %v2104_v30 = vadd.f32 1e-05, %v2066_v36  ;;  %v2067_v49 = vmul.f32 0.03125, %v2019_v26  ;;  %v2219_v20 = vmul.f32 %v4744_v19, %v2177_v44  ;;  %v2260_v17 = vadd.f32 %v4751_v3, %v2218_v60 }
 0x5a4   :  { %3429 = vrsqrt.f32 %v2104_v30  ;;  %v2105_v10 = vadd.f32 1e-05, %v2067_v49  ;;  %v2261_v45 = vadd.f32 %v4751_v3, %v2219_v20  ;;  %vm2298_vm10 = vcmp.ge.f32.partialorder %v2260_v17, 0.0 }
 0x5a5   :  { %v3426_v1 = vpop.eup %3425  ;;  %v2336_v59 = vmul.f32 0.01, %v2260_v17 }
 0x5a6   :  { %v2178_v42 = vmul.f32 %v3426_v1, %v4721_v12  ;;  %3431 = vrsqrt.f32 %v2105_v10  ;;  %vm2299_vm11 = vcmp.ge.f32.partialorder %v2261_v45, 0.0  ;;  %v2337_v24 = vmul.f32 0.01, %v2261_v45 }
 0x5a7   :  { %v3428_v54 = vpop.eup %3427  ;;  %v2374_v18 = vsel %vm2298_vm10, %v2260_v17, %v2336_v59 }
 0x5a8   :  { %v2179_v37 = vmul.f32 %v3428_v54, %v4725_v38  ;;  %v2021_v16 = vpop.xlane.xlu0 %2020  ;;  %v2375_v28 = vsel %vm2299_vm11, %v2261_v45, %v2337_v24  ;;  %v2220_v32 = vmul.f32 %v4744_v19, %v2178_v42 }
 0x5a9   :  { %v2068_v58 = vmul.f32 0.03125, %v2021_v16  ;;  %v2023_v61 = vpop.xlane.xlu1 %2022  ;;  %v2401_v52 = vpack.c.bf16 %v2375_v28, %v2374_v18 }
 0x5aa   :  { %v2069_v56 = vmul.f32 0.03125, %v2023_v61  ;;  %v2221_v23 = vmul.f32 %v4744_v19, %v2179_v37  ;;  %v2262_v2 = vadd.f32 %v4751_v3, %v2220_v32 }
 0x5ab   :  { %v2106_v12 = vadd.f32 1e-05, %v2068_v58  ;;  %3213 = vmatmul.mubr.bf16.gmra.mrb[116].mxu1 %v2401_v52 }
 0x5ac   :  { %v2107_v35 = vadd.f32 1e-05, %v2069_v56  ;;  %3216 = vmatprep.mubr.msk.bf16.mxu1 %vm3458_vm1, %v3457_v0  ;;  %v2263_v38 = vadd.f32 %v4751_v3, %v2221_v23  ;;  %v2338_v53 = vmul.f32 0.01, %v2262_v2  ;;  %vm2300_vm12 = vcmp.ge.f32.partialorder %v2262_v2, 0.0 }
 0x5ad   :  { %3433 = vrsqrt.f32 %v2106_v12 }
 0x5ae   :  { %v3430_v39 = vpop.eup %3429  ;;  %3435 = vrsqrt.f32 %v2107_v35  ;;  %vm2301_vm13 = vcmp.ge.f32.partialorder %v2263_v38, 0.0  ;;  %v2339_v13 = vmul.f32 0.01, %v2263_v38  ;;  %v2376_v11 = vsel %vm2300_vm12, %v2262_v2, %v2338_v53 }
 0x5af   :  { %v2180_v8 = vmul.f32 %v3430_v39, %v4733_v62 }
 0x5b0   :  { %v3432_v14 = vpop.eup %3431  ;;  %v2025_v9 = vpop.xlane.xlu0 %2024  ;;  %v2377_v27 = vsel %vm2301_vm13, %v2263_v38, %v2339_v13 }
 0x5b1   :  { %v2181_v47 = vmul.f32 %v3432_v14, %v4737_v51  ;;  %v2070_v43 = vmul.f32 0.03125, %v2025_v9  ;;  %v2027_v57 = vpop.xlane.xlu1 %2026  ;;  %v2402_v46 = vpack.c.bf16 %v2377_v27, %v2376_v11  ;;  %v2222_v50 = vmul.f32 %v4744_v19, %v2180_v8 }
 0x5b2   :  { %v2071_v7 = vmul.f32 0.03125, %v2027_v57 }
 0x5b3   :  { %v2108_v15 = vadd.f32 1e-05, %v2070_v43  ;;  %3217 = vmatmul.mubr.bf16.gmra.mrb[120].mxu1 %v2402_v46  ;;  %v2223_v29 = vmul.f32 %v4744_v19, %v2181_v47  ;;  %v2264_v34 = vadd.f32 %v4751_v3, %v2222_v50 }
 0x5b4   :  { %v2109_v40 = vadd.f32 1e-05, %v2071_v7  ;;  %3220 = vmatprep.mubr.msk.bf16.mxu1 %vm3458_vm1, %v3457_v0 }
 0x5b5   :  { %3437 = vrsqrt.f32 %v2108_v15  ;;  %v2265_v62 = vadd.f32 %v4751_v3, %v2223_v29  ;;  %v2340_v51 = vmul.f32 0.01, %v2264_v34  ;;  %vm2302_vm14 = vcmp.ge.f32.partialorder %v2264_v34, 0.0 }
 0x5b6   :  { %3439 = vrsqrt.f32 %v2109_v40 }
 0x5b7   :  { %v3434_v44 = vpop.eup %3433  ;;  %vm2303_vm15 = vcmp.ge.f32.partialorder %v2265_v62, 0.0  ;;  %v2341_v36 = vmul.f32 0.01, %v2265_v62  ;;  %v2378_v10 = vsel %vm2302_vm14, %v2264_v34, %v2340_v51 }
 0x5b8   :  { %v3436_v60 = vpop.eup %3435  ;;  %v2182_v26 = vmul.f32 %v3434_v44, %v4758_v63  ;;  %v2029_v30 = vpop.xlane.xlu0 %2028 }
 0x5b9   :  { %v2183_v49 = vmul.f32 %v3436_v60, %v4764_v4  ;;  %v2072_v20 = vmul.f32 0.03125, %v2029_v30  ;;  %v2031_v17 = vpop.xlane.xlu1 %2030  ;;  %v2379_v45 = vsel %vm2303_vm15, %v2265_v62, %v2341_v36 }
 0x5ba   :  { %v2073_v1 = vmul.f32 0.03125, %v2031_v17  ;;  %v2403_v59 = vpack.c.bf16 %v2379_v45, %v2378_v10  ;;  %v2224_v42 = vmul.f32 %v4744_v19, %v2182_v26 }
 0x5bb   :  { %v2110_v24 = vadd.f32 1e-05, %v2072_v20  ;;  %v2225_v54 = vmul.f32 %v4744_v19, %v2183_v49 }
 0x5bc   :  { %v2111_v37 = vadd.f32 1e-05, %v2073_v1  ;;  %3221 = vmatmul.mubr.bf16.gmra.mrb[124].mxu1 %v2403_v59  ;;  %v2266_v16 = vadd.f32 %v4751_v3, %v2224_v42 }
 0x5bd   :  { %3441 = vrsqrt.f32 %v2110_v24  ;;  %3224 = vmatprep.mubr.msk.bf16.mxu1 %vm3458_vm1, %v3457_v0  ;;  %v2267_v63 = vadd.f32 %v4751_v3, %v2225_v54 }
 0x5be   :  { %3443 = vrsqrt.f32 %v2111_v37  ;;  %vm2304_vm0 = vcmp.ge.f32.partialorder %v2266_v16, 0.0  ;;  %v2342_v4 = vmul.f32 0.01, %v2266_v16 }
 0x5bf   :  { %v3438_v18 = vpop.eup %3437  ;;  %vm2305_vm2 = vcmp.ge.f32.partialorder %v2267_v63, 0.0  ;;  %v2343_v28 = vmul.f32 0.01, %v2267_v63 }
 0x5c0   :  { %v3440_v32 = vpop.eup %3439  ;;  %v2184_v58 = vmul.f32 %v3438_v18, %v4774_v21  ;;  %v2033_v61 = vpop.xlane.xlu0 %2032  ;;  %v2380_v2 = vsel %vm2304_vm0, %v2266_v16, %v2342_v4 }
 0x5c1   :  { %v2185_v52 = vmul.f32 %v3440_v32, %v4781_v31  ;;  %v2074_v56 = vmul.f32 0.03125, %v2033_v61  ;;  %v2035_v23 = vpop.xlane.xlu1 %2034  ;;  %v2381_v12 = vsel %vm2305_vm2, %v2267_v63, %v2343_v28 }
 0x5c2   :  { %v2075_v35 = vmul.f32 0.03125, %v2035_v23  ;;  %v2404_v38 = vpack.c.bf16 %v2381_v12, %v2380_v2  ;;  %v2226_v53 = vmul.f32 %v4744_v19, %v2184_v58 }
 0x5c3   :  { %v2112_v39 = vadd.f32 1e-05, %v2074_v56  ;;  %v2227_v13 = vmul.f32 %v4744_v19, %v2185_v52 }
 0x5c4   :  { %v2113_v8 = vadd.f32 1e-05, %v2075_v35  ;;  %3225 = vmatmul.mubr.bf16.gmra.mrb[128].mxu1 %v2404_v38  ;;  %v2268_v14 = vadd.f32 %v4751_v3, %v2226_v53 }
 0x5c5   :  { %3445 = vrsqrt.f32 %v2112_v39  ;;  %3228 = vmatprep.mubr.msk.bf16.mxu1 %vm3458_vm1, %v3457_v0  ;;  %v2269_v21 = vadd.f32 %v4751_v3, %v2227_v13 }
 0x5c6   :  { %3447 = vrsqrt.f32 %v2113_v8  ;;  %vm2306_vm3 = vcmp.ge.f32.partialorder %v2268_v14, 0.0  ;;  %v2344_v31 = vmul.f32 0.01, %v2268_v14 }
 0x5c7   :  { %v3442_v9 = vpop.eup %3441  ;;  %vm2307_vm4 = vcmp.ge.f32.partialorder %v2269_v21, 0.0  ;;  %v2345_v11 = vmul.f32 0.01, %v2269_v21 }
 0x5c8   :  { %v3444_v27 = vpop.eup %3443  ;;  %v2186_v47 = vmul.f32 %v3442_v9, %v4795_v55  ;;  %v1965_v43 = vpop.xlane.xlu0 %1964  ;;  %v2382_v7 = vsel %vm2306_vm3, %v2268_v14, %v2344_v31 }
 0x5c9   :  { %v2187_v57 = vmul.f32 %v3444_v27, %v4800_v41  ;;  %v2040_v46 = vmul.f32 0.03125, %v1965_v43  ;;  %v1967_v50 = vpop.xlane.xlu1 %1966  ;;  %v2383_v15 = vsel %vm2307_vm4, %v2269_v21, %v2345_v11 }
 0x5ca   :  { %v2041_v29 = vmul.f32 0.03125, %v1967_v50  ;;  %v2405_v34 = vpack.c.bf16 %v2383_v15, %v2382_v7  ;;  %v2228_v40 = vmul.f32 %v4744_v19, %v2186_v47 }
 0x5cb   :  { %v2078_v62 = vadd.f32 1e-05, %v2040_v46  ;;  %v2229_v51 = vmul.f32 %v4744_v19, %v2187_v57 }
 0x5cc   :  { %v2079_v44 = vadd.f32 1e-05, %v2041_v29  ;;  %3229 = vmatmul.mubr.bf16.gmra.mrb[132].mxu1 %v2405_v34  ;;  %v2270_v36 = vadd.f32 %v4751_v3, %v2228_v40 }
 0x5cd   :  { %3449 = vrsqrt.f32 %v2078_v62  ;;  %3232 = vmatprep.mubr.msk.bf16.mxu1 %vm3458_vm1, %v3457_v0  ;;  %v2271_v55 = vadd.f32 %v4751_v3, %v2229_v51 }
 0x5ce   :  { %3451 = vrsqrt.f32 %v2079_v44  ;;  %vm2308_vm5 = vcmp.ge.f32.partialorder %v2270_v36, 0.0  ;;  %v2346_v41 = vmul.f32 0.01, %v2270_v36 }
 0x5cf   :  { %v3446_v60 = vpop.eup %3445  ;;  %vm2309_vm6 = vcmp.ge.f32.partialorder %v2271_v55, 0.0  ;;  %v2347_v26 = vmul.f32 0.01, %v2271_v55 }
 0x5d0   :  { %v3448_v30 = vpop.eup %3447  ;;  %v2188_v49 = vmul.f32 %v3446_v60, %v4815_v5  ;;  %v2037_v20 = vpop.xlane.xlu0 %2036  ;;  %v2384_v1 = vsel %vm2308_vm5, %v2270_v36, %v2346_v41 }
 0x5d1   :  { %v2189_v17 = vmul.f32 %v3448_v30, %v4821_v22  ;;  %v2076_v10 = vmul.f32 0.03125, %v2037_v20  ;;  %v2039_v45 = vpop.xlane.xlu1 %2038  ;;  %v2385_v59 = vsel %vm2309_vm6, %v2271_v55, %v2347_v26 }
 0x5d2   :  { %v2077_v42 = vmul.f32 0.03125, %v2039_v45  ;;  %v2406_v24 = vpack.c.bf16 %v2385_v59, %v2384_v1  ;;  %v2230_v54 = vmul.f32 %v4744_v19, %v2188_v49 }
 0x5d3   :  { %v2114_v37 = vadd.f32 1e-05, %v2076_v10  ;;  %v2231_v16 = vmul.f32 %v4744_v19, %v2189_v17 }
 0x5d4   :  { %v2115_v63 = vadd.f32 1e-05, %v2077_v42  ;;  %3233 = vmatmul.mubr.bf16.gmra.mrb[136].mxu1 %v2406_v24  ;;  %v2272_v4 = vadd.f32 %v4751_v3, %v2230_v54 }
 0x5d5   :  { %3453 = vrsqrt.f32 %v2114_v37  ;;  %3236 = vmatprep.mubr.msk.bf16.mxu1 %vm3458_vm1, %v3457_v0  ;;  %v2273_v5 = vadd.f32 %v4751_v3, %v2231_v16 }
 0x5d6   :  { %3455 = vrsqrt.f32 %v2115_v63  ;;  %vm2310_vm7 = vcmp.ge.f32.partialorder %v2272_v4, 0.0  ;;  %v2348_v22 = vmul.f32 0.01, %v2272_v4 }
 0x5d7   :  { %v3450_v18 = vpop.eup %3449  ;;  %vm2311_vm8 = vcmp.ge.f32.partialorder %v2273_v5, 0.0  ;;  %v2349_v28 = vmul.f32 0.01, %v2273_v5 }
 0x5d8   :  { %v3452_v32 = vpop.eup %3451  ;;  %v2154_v58 = vmul.f32 %v3450_v18, %v4835_v48  ;;  %v2386_v52 = vsel %vm2310_vm7, %v2272_v4, %v2348_v22 }
 0x5d9   :  { %v2155_v61 = vmul.f32 %v3452_v32, %v4841_v33  ;;  %v2387_v56 = vsel %vm2311_vm8, %v2273_v5, %v2349_v28 }
 0x5da   :  { %v2196_v23 = vmul.f32 %v4744_v19, %v2154_v58  ;;  %v2407_v2 = vpack.c.bf16 %v2387_v56, %v2386_v52 }
 0x5db   :  { %v2197_v12 = vmul.f32 %v4744_v19, %v2155_v61 }
 0x5dc   :  { %v2238_v35 = vadd.f32 %v4751_v3, %v2196_v23  ;;  %3237 = vmatmul.mubr.bf16.gmra.mrb[140].mxu1 %v2407_v2 }
 0x5dd   :  { %v2239_v38 = vadd.f32 %v4751_v3, %v2197_v12  ;;  %3240 = vmatprep.mubr.msk.bf16.mxu1 %vm3458_vm1, %v3457_v0 }
 0x5de   :  { %vm2276_vm9 = vcmp.ge.f32.partialorder %v2238_v35, 0.0  ;;  %v2314_v53 = vmul.f32 0.01, %v2238_v35 }
 0x5df   :  { %v3454_v48 = vpop.eup %3453  ;;  %vm2277_vm10 = vcmp.ge.f32.partialorder %v2239_v38, 0.0  ;;  %v2315_v33 = vmul.f32 0.01, %v2239_v38 }
 0x5e0   :  { %v3456_v39 = vpop.eup %3455  ;;  %v2190_v13 = vmul.f32 %v3454_v48, %v4855_v25  ;;  %v2352_v14 = vsel %vm2276_vm9, %v2238_v35, %v2314_v53 }
 0x5e1   :  { %v2191_v8 = vmul.f32 %v3456_v39, %v4861_v6  ;;  %v2353_v21 = vsel %vm2277_vm10, %v2239_v38, %v2315_v33  ;;  %v4977_v6 = vld [vmem:[%s5137_s6] ss:$0 sm:$0xff] }
 0x5e2   :  { %v2390_v31 = vpack.c.bf16 %v2353_v21, %v2352_v14  ;;  %v2232_v9 = vmul.f32 %v4744_v19, %v2190_v13 }
 0x5e3   :  { %v2233_v11 = vmul.f32 %v4744_v19, %v2191_v8 }
 0x5e4   :  { %3169 = vmatmul.mubr.bf16.vlgmr.msra.gmra.mrb[152].mxu0 %v2390_v31  ;;  %v2274_v0 = vadd.f32 %v4751_v3, %v2232_v9 }
 0x5e5   :  { %v2275_v27 = vadd.f32 %v4751_v3, %v2233_v11 }
 0x5e6   :  { %vm2312_vm1 = vcmp.ge.f32.partialorder %v2274_v0, 0.0  ;;  %v2350_v47 = vmul.f32 0.01, %v2274_v0 }
 0x5e7   :  { %vm2313_vm11 = vcmp.ge.f32.partialorder %v2275_v27, 0.0  ;;  %v2351_v43 = vmul.f32 0.01, %v2275_v27 }
 0x5e8   :  { %v2388_v57 = vsel %vm2312_vm1, %v2274_v0, %v2350_v47 }
 0x5e9   :  { %v2389_v25 = vsel %vm2313_vm11, %v2275_v27, %v2351_v43 }
 0x5ea   :  { %v2408_v46 = vpack.c.bf16 %v2389_v25, %v2388_v57 }
 0x5ec   :  { %3241 = vmatmul.mubr.bf16.gmra.mrb[144].mxu1 %v2408_v46 }
 0x5f5   :  { %v2522_v50 = vpop.f32.mrb[76].mxu1 }
 0x5f6   :  { %v2523_v19 = vadd.f32 %v4977_v6, %v2522_v50  ;;  %v3174_v7 = vpop.f32.mrb[77].mxu1 }
 0x5f7   :  { %v2525_v15 = vpop.f32.mrb[78].mxu1 }
 0x5f8   :  { %2667 = vst [vmem:[%s5138_s7 + $0x10] sm:$0xff] %v2523_v19  ;;  %v2526_v3 = vadd.f32 %v4977_v6, %v2525_v15  ;;  %v3175_v29 = vpop.f32.mrb[79].mxu1 }
 0x5fa   :  { %2668 = vst [vmem:[%s5138_s7 + $0x18] sm:$0xff] %v2526_v3 }
 0x5fd   :  { %v2530_v34 = vpop.f32.mrb[80].mxu1 }
 0x5fe   :  { %v2531_v40 = vadd.f32 %v4977_v6, %v2530_v34  ;;  %v3178_v62 = vpop.f32.mrb[81].mxu1 }
 0x5ff   :  { %v2533_v51 = vpop.f32.mrb[82].mxu1 }
 0x600   :  { %2669 = vst [vmem:[%s5138_s7 + $0x20] sm:$0xff] %v2531_v40  ;;  %v2534_v44 = vadd.f32 %v4977_v6, %v2533_v51  ;;  %v3179_v36 = vpop.f32.mrb[83].mxu1 }
 0x602   :  { %2670 = vst [vmem:[%s5138_s7 + $0x28] sm:$0xff] %v2534_v44 }
 0x606   :  { %v2538_v55 = vpop.f32.mrb[84].mxu1 }
 0x607   :  { %v2539_v41 = vadd.f32 %v4977_v6, %v2538_v55  ;;  %v3182_v60 = vpop.f32.mrb[85].mxu1 }
 0x608   :  { %v2541_v26 = vpop.f32.mrb[86].mxu1 }
 0x609   :  { %2671 = vst [vmem:[%s5138_s7 + $0x30] sm:$0xff] %v2539_v41  ;;  %v2542_v30 = vadd.f32 %v4977_v6, %v2541_v26  ;;  %v3183_v49 = vpop.f32.mrb[87].mxu1 }
 0x60b   :  { %2672 = vst [vmem:[%s5138_s7 + $0x38] sm:$0xff] %v2542_v30 }
 0x60e   :  { %v2546_v20 = vpop.f32.mrb[88].mxu1 }
 0x60f   :  { %v2547_v17 = vadd.f32 %v4977_v6, %v2546_v20  ;;  %v3186_v10 = vpop.f32.mrb[89].mxu1 }
 0x610   :  { %v2549_v45 = vpop.f32.mrb[90].mxu1 }
 0x611   :  { %2673 = vst [vmem:[%s5138_s7 + $0x40] sm:$0xff] %v2547_v17  ;;  %v2550_v1 = vadd.f32 %v4977_v6, %v2549_v45  ;;  %v3187_v59 = vpop.f32.mrb[91].mxu1 }
 0x613   :  { %2674 = vst [vmem:[%s5138_s7 + $0x48] sm:$0xff] %v2550_v1 }
 0x616   :  { %v2554_v42 = vpop.f32.mrb[92].mxu1 }
 0x617   :  { %v2555_v24 = vadd.f32 %v4977_v6, %v2554_v42  ;;  %v3190_v54 = vpop.f32.mrb[93].mxu1 }
 0x618   :  { %v2557_v37 = vpop.f32.mrb[94].mxu1 }
 0x619   :  { %2675 = vst [vmem:[%s5138_s7 + $0x50] sm:$0xff] %v2555_v24  ;;  %v2558_v16 = vadd.f32 %v4977_v6, %v2557_v37  ;;  %v3191_v63 = vpop.f32.mrb[95].mxu1 }
 0x61b   :  { %2676 = vst [vmem:[%s5138_s7 + $0x58] sm:$0xff] %v2558_v16 }
 0x61e   :  { %v2562_v4 = vpop.f32.mrb[96].mxu1 }
 0x61f   :  { %v2563_v5 = vadd.f32 %v4977_v6, %v2562_v4  ;;  %v3194_v22 = vpop.f32.mrb[97].mxu1 }
 0x620   :  { %v2565_v18 = vpop.f32.mrb[98].mxu1 }
 0x621   :  { %2677 = vst [vmem:[%s5138_s7 + $0x60] sm:$0xff] %v2563_v5  ;;  %v2566_v28 = vadd.f32 %v4977_v6, %v2565_v18  ;;  %v3195_v32 = vpop.f32.mrb[99].mxu1 }
 0x623   :  { %2678 = vst [vmem:[%s5138_s7 + $0x68] sm:$0xff] %v2566_v28 }
 0x626   :  { %v2570_v58 = vpop.f32.mrb[100].mxu1 }
 0x627   :  { %v2571_v61 = vadd.f32 %v4977_v6, %v2570_v58  ;;  %v3198_v52 = vpop.f32.mrb[101].mxu1 }
 0x628   :  { %v2573_v56 = vpop.f32.mrb[102].mxu1 }
 0x629   :  { %2679 = vst [vmem:[%s5138_s7 + $0x70] sm:$0xff] %v2571_v61  ;;  %v2574_v23 = vadd.f32 %v4977_v6, %v2573_v56  ;;  %v3199_v2 = vpop.f32.mrb[103].mxu1 }
 0x62b   :  { %2680 = vst [vmem:[%s5138_s7 + $0x78] sm:$0xff] %v2574_v23 }
 0x62e   :  { %v2578_v12 = vpop.f32.mrb[104].mxu1 }
 0x62f   :  { %v2579_v35 = vadd.f32 %v4977_v6, %v2578_v12  ;;  %v3202_v38 = vpop.f32.mrb[105].mxu1 }
 0x630   :  { %v2581_v53 = vpop.f32.mrb[106].mxu1 }
 0x631   :  { %2681 = vst [vmem:[%s5138_s7 + $0x80] sm:$0xff] %v2579_v35  ;;  %v2582_v48 = vadd.f32 %v4977_v6, %v2581_v53  ;;  %v3203_v33 = vpop.f32.mrb[107].mxu1 }
 0x633   :  { %2682 = vst [vmem:[%s5138_s7 + $0x88] sm:$0xff] %v2582_v48 }
 0x636   :  { %v2586_v39 = vpop.f32.mrb[108].mxu1 }
 0x637   :  { %v2587_v13 = vadd.f32 %v4977_v6, %v2586_v39  ;;  %v3206_v8 = vpop.f32.mrb[109].mxu1 }
 0x638   :  { %v2589_v14 = vpop.f32.mrb[110].mxu1 }
 0x639   :  { %2683 = vst [vmem:[%s5138_s7 + $0x90] sm:$0xff] %v2587_v13  ;;  %v2590_v21 = vadd.f32 %v4977_v6, %v2589_v14  ;;  %v3207_v31 = vpop.f32.mrb[111].mxu1 }
 0x63b   :  { %2684 = vst [vmem:[%s5138_s7 + $0x98] sm:$0xff] %v2590_v21 }
 0x63e   :  { %v2594_v9 = vpop.f32.mrb[112].mxu1 }
 0x63f   :  { %v2595_v11 = vadd.f32 %v4977_v6, %v2594_v9  ;;  %v3210_v0 = vpop.f32.mrb[113].mxu1 }
 0x640   :  { %v2597_v27 = vpop.f32.mrb[114].mxu1 }
 0x641   :  { %2685 = vst [vmem:[%s5138_s7 + $0xa0] sm:$0xff] %v2595_v11  ;;  %v2598_v47 = vadd.f32 %v4977_v6, %v2597_v27  ;;  %v3211_v43 = vpop.f32.mrb[115].mxu1 }
 0x643   :  { %2686 = vst [vmem:[%s5138_s7 + $0xa8] sm:$0xff] %v2598_v47 }
 0x67e   :  { %v2602_v57 = vpop.f32.mrb[116].mxu1 }
 0x67f   :  { %v2603_v25 = vadd.f32 %v4977_v6, %v2602_v57  ;;  %v3214_v46 = vpop.f32.mrb[117].mxu1 }
 0x680   :  { %v2605_v50 = vpop.f32.mrb[118].mxu1 }
 0x681   :  { %2687 = vst [vmem:[%s5138_s7 + $0xb0] sm:$0xff] %v2603_v25  ;;  %v2606_v19 = vadd.f32 %v4977_v6, %v2605_v50  ;;  %v3215_v7 = vpop.f32.mrb[119].mxu1 }
 0x683   :  { %2688 = vst [vmem:[%s5138_s7 + $0xb8] sm:$0xff] %v2606_v19 }
 0x686   :  { %v2610_v15 = vpop.f32.mrb[120].mxu1 }
 0x687   :  { %v2611_v3 = vadd.f32 %v4977_v6, %v2610_v15  ;;  %v3218_v29 = vpop.f32.mrb[121].mxu1 }
 0x688   :  { %v2613_v34 = vpop.f32.mrb[122].mxu1 }
 0x689   :  { %2689 = vst [vmem:[%s5138_s7 + $0xc0] sm:$0xff] %v2611_v3  ;;  %v2614_v40 = vadd.f32 %v4977_v6, %v2613_v34  ;;  %v3219_v62 = vpop.f32.mrb[123].mxu1 }
 0x68b   :  { %2690 = vst [vmem:[%s5138_s7 + $0xc8] sm:$0xff] %v2614_v40 }
 0x68f   :  { %v2618_v51 = vpop.f32.mrb[124].mxu1 }
 0x690   :  { %v2619_v44 = vadd.f32 %v4977_v6, %v2618_v51  ;;  %v3222_v36 = vpop.f32.mrb[125].mxu1 }
 0x691   :  { %v2621_v55 = vpop.f32.mrb[126].mxu1 }
 0x692   :  { %2691 = vst [vmem:[%s5138_s7 + $0xd0] sm:$0xff] %v2619_v44  ;;  %v2622_v41 = vadd.f32 %v4977_v6, %v2621_v55  ;;  %v3223_v60 = vpop.f32.mrb[127].mxu1 }
 0x694   :  { %2692 = vst [vmem:[%s5138_s7 + $0xd8] sm:$0xff] %v2622_v41 }
 0x697   :  { %v2626_v26 = vpop.f32.mrb[128].mxu1 }
 0x698   :  { %v2627_v30 = vadd.f32 %v4977_v6, %v2626_v26  ;;  %v3226_v49 = vpop.f32.mrb[129].mxu1 }
 0x699   :  { %v2629_v20 = vpop.f32.mrb[130].mxu1 }
 0x69a   :  { %2693 = vst [vmem:[%s5138_s7 + $0xe0] sm:$0xff] %v2627_v30  ;;  %v2630_v17 = vadd.f32 %v4977_v6, %v2629_v20  ;;  %v3227_v10 = vpop.f32.mrb[131].mxu1 }
 0x69c   :  { %2694 = vst [vmem:[%s5138_s7 + $0xe8] sm:$0xff] %v2630_v17 }
 0x69f   :  { %v2634_v45 = vpop.f32.mrb[132].mxu1 }
 0x6a0   :  { %v2635_v1 = vadd.f32 %v4977_v6, %v2634_v45  ;;  %v3230_v59 = vpop.f32.mrb[133].mxu1 }
 0x6a1   :  { %v2637_v42 = vpop.f32.mrb[134].mxu1 }
 0x6a2   :  { %2695 = vst [vmem:[%s5138_s7 + $0xf0] sm:$0xff] %v2635_v1  ;;  %v2638_v24 = vadd.f32 %v4977_v6, %v2637_v42  ;;  %v3231_v54 = vpop.f32.mrb[135].mxu1 }
 0x6a4   :  { %2696 = vst [vmem:[%s5138_s7 + $0xf8] sm:$0xff] %v2638_v24 }
 0x6a7   :  { %v2642_v37 = vpop.f32.mrb[136].mxu1 }
 0x6a8   :  { %v2643_v16 = vadd.f32 %v4977_v6, %v2642_v37  ;;  %v3234_v63 = vpop.f32.mrb[137].mxu1 }
 0x6a9   :  { %v2645_v4 = vpop.f32.mrb[138].mxu1 }
 0x6aa   :  { %2697 = vst [vmem:[%s5138_s7 + $0x100] sm:$0xff] %v2643_v16  ;;  %v2646_v5 = vadd.f32 %v4977_v6, %v2645_v4  ;;  %v3235_v22 = vpop.f32.mrb[139].mxu1 }
 0x6ac   :  { %2698 = vst [vmem:[%s5138_s7 + $0x108] sm:$0xff] %v2646_v5 }
 0x6af   :  { %v2650_v18 = vpop.f32.mrb[140].mxu1 }
 0x6b0   :  { %v2651_v28 = vadd.f32 %v4977_v6, %v2650_v18  ;;  %v3238_v32 = vpop.f32.mrb[141].mxu1 }
 0x6b1   :  { %v2653_v58 = vpop.f32.mrb[142].mxu1 }
 0x6b2   :  { %2699 = vst [vmem:[%s5138_s7 + $0x110] sm:$0xff] %v2651_v28  ;;  %v2654_v61 = vadd.f32 %v4977_v6, %v2653_v58  ;;  %v3239_v52 = vpop.f32.mrb[143].mxu1 }
 0x6b4   :  { %2700 = vst [vmem:[%s5138_s7 + $0x118] sm:$0xff] %v2654_v61 }
 0x6b7   :  { %v2514_v56 = vpop.f32.mrb[152].mxu0 }
 0x6b8   :  { %v2515_v23 = vadd.f32 %v4977_v6, %v2514_v56  ;;  %v3170_v2 = vpop.f32.mrb[153].mxu0 }
 0x6b9   :  { %v2517_v12 = vpop.f32.mrb[154].mxu0 }
 0x6ba   :  { %2665 = vst [vmem:[%s5138_s7] sm:$0xff] %v2515_v23  ;;  %v2518_v35 = vadd.f32 %v4977_v6, %v2517_v12  ;;  %v3171_v38 = vpop.f32.mrb[155].mxu0 }
 0x6bc   :  { %2666 = vst [vmem:[%s5138_s7 + $0x8] sm:$0xff] %v2518_v35 }
 0x6bf   :  { %v2658_v53 = vpop.f32.mrb[144].mxu1 }
 0x6c0   :  { %v2659_v48 = vadd.f32 %v4977_v6, %v2658_v53  ;;  %v3242_v33 = vpop.f32.mrb[145].mxu1 }
 0x6c1   :  { %v2661_v39 = vpop.f32.mrb[146].mxu1 }
 0x6c2   :  { %2701 = vst [vmem:[%s5138_s7 + $0x120] sm:$0xff] %v2659_v48  ;;  %v2662_v13 = vadd.f32 %v4977_v6, %v2661_v39  ;;  %v3243_v8 = vpop.f32.mrb[147].mxu1 }
 0x6c4   :  { %2702 = vst [vmem:[%s5138_s7 + $0x128] sm:$0xff] %v2662_v13 }

</bundles_post_ra>
